<compile_context>
chip_gen: v6e
topology: v6e:2x2x1
jax: 0.10.0
libtpu: 0.0.40
codegen_flags: <defaults>
</compile_context>

<pallas_src>
import math

import jax
import jax.numpy as jnp
from jax.experimental import pallas as pl
from jax.experimental.pallas import tpu as pltpu


# ---------------------------------------------------------------------------
# Fused kernel: input projection + pos encoding + all encoder layers + fc head
# ---------------------------------------------------------------------------
def _make_forecaster_kernel(*, nhead, d_model, num_layers, batch_tile, seq,
                            dim_ff, input_size, output_size):
    H, D, S, BT, FF, IN = nhead, d_model, seq, batch_tile, dim_ff, input_size
    dh = D // H
    scale = 1.0 / math.sqrt(dh)
    R = BT * S                    # rows in this batch tile
    bf16 = jnp.bfloat16

    def _layer_norm(x, gamma, beta, eps=1e-5):
        mu = jnp.mean(x, axis=-1, keepdims=True)
        var = jnp.mean(jnp.square(x - mu), axis=-1, keepdims=True)
        return (x - mu) * jax.lax.rsqrt(var + eps) * gamma + beta

    def kernel(x_ref, pos_ref, w_in_ref, b_in_ref,
               wqkv_ref, bqkv_ref, wo_ref, bo_ref,
               g1_ref, bt1_ref, w1_ref, b1_ref, w2_ref, b2_ref,
               g2_ref, bt2_ref, w_fc_ref, b_fc_ref, o_ref):

        # ---- input projection + positional encoding (pos pre-tiled to (R, D)) ----
        h = (jnp.dot(x_ref[...].astype(bf16), w_in_ref[...],
                     preferred_element_type=jnp.float32)
             + b_in_ref[...] + pos_ref[...])                      # (R, D) f32

        # ---- TransformerEncoder: post-norm layers, dropout = identity (eval) ----
        for l in range(num_layers):                               # static, small L
            hb = h.astype(bf16)                                   # cast once per layer
            qkv = (jnp.dot(hb, wqkv_ref[l],
                           preferred_element_type=jnp.float32)
                   + bqkv_ref[l])                                 # (R, 3D) f32
            q = qkv[:, 0:D].astype(bf16).reshape(BT, S, D)
            k = qkv[:, D:2 * D].astype(bf16).reshape(BT, S, D)
            v = qkv[:, 2 * D:3 * D].astype(bf16).reshape(BT, S, D)
            wo_l = wo_ref[l]                                      # (D, D) bf16

            # Multi-head self-attention, batched over the batch tile.
            # TODO(synk): a single head-batched einsum would remove this loop, but the
            # required (BT,S,H,dh)->(BT,H,S,dh) transpose does not lower reliably in
            # Mosaic; H is tiny so each head's context is instead accumulated directly
            # through its slice of W_o (no lane concatenate).
            attn = jnp.zeros((R, D), jnp.float32)
            for hh in range(H):
                c0 = hh * dh
                qh = q[:, :, c0:c0 + dh]                          # (BT, S, dh) bf16
                kh = k[:, :, c0:c0 + dh]
                vh = v[:, :, c0:c0 + dh]
                s = jnp.einsum('bqd,bkd->bqk', qh, kh,
                               preferred_element_type=jnp.float32) * scale
                s = s - jnp.max(s, axis=-1, keepdims=True)        # softmax in f32
                p = jnp.exp(s)
                p = p * pl.reciprocal(jnp.sum(p, axis=-1, keepdims=True), approx=True)
                ctx_h = jnp.einsum('bqk,bkd->bqd', p.astype(bf16), vh,
                                   preferred_element_type=jnp.float32)
                attn = attn + jnp.dot(ctx_h.reshape(R, dh).astype(bf16),
                                      wo_l[c0:c0 + dh, :],
                                      preferred_element_type=jnp.float32)
            attn = attn + bo_ref[l]

            # residual + norm1 (norm_first=False), dropout = identity
            x1 = _layer_norm(h + attn, g1_ref[l], bt1_ref[l])

            # feed forward: linear1 -> relu -> linear2, residual + norm2
            h1 = jnp.maximum(jnp.dot(x1.astype(bf16), w1_ref[l],
                                     preferred_element_type=jnp.float32)
                             + b1_ref[l], 0.0)                    # (R, FF)
            h2 = (jnp.dot(h1.astype(bf16), w2_ref[l],
                          preferred_element_type=jnp.float32) + b2_ref[l])
            h = _layer_norm(x1 + h2, g2_ref[l], bt2_ref[l])       # (R, D)

        # ---- fused head: last timestep of each sequence -> fc (dropout = identity) ----
        last = h.reshape(BT, S, D)[:, S - 1, :]                   # (BT, D) f32
        o_ref[...] = (jnp.dot(last, w_fc_ref[...],
                              preferred_element_type=jnp.float32)
                      + b_fc_ref[...])                            # (BT, OUT)

    return kernel


# ---------------------------------------------------------------------------
# Parameters / positional encoding (plain JAX glue)
# ---------------------------------------------------------------------------
def sinusoidal_pos_encoding(max_len: int, d_model: int) -> jnp.ndarray:
    position = jnp.arange(max_len, dtype=jnp.float32)[:, None]
    div_term = jnp.exp(jnp.arange(0, d_model, 2, dtype=jnp.float32)
                       * (-math.log(10000.0) / d_model))
    angles = position * div_term
    pe = jnp.zeros((max_len, d_model), jnp.float32)
    pe = pe.at[:, 0::2].set(jnp.sin(angles))
    pe = pe.at[:, 1::2].set(jnp.cos(angles))
    return pe                                         # (max_len, d_model)


def init_params(key, input_size, d_model, nhead, num_layers, output_size,
                dim_feedforward=2048):
    """Deterministic synthetic weights, stacked over layers for the fused kernel.

    Matmul weights are pre-transposed (y = x @ W) and stored bf16 (accumulation is
    f32 inside the kernel).  Q/K/V are packed into one (D, 3D) weight per layer.
    Biases / LayerNorm params stay f32.
    """
    bf16 = jnp.bfloat16
    L = num_layers

    def nrm(k, shape, s=0.05, dtype=jnp.float32):
        return (s * jax.random.normal(k, shape, dtype=jnp.float32)).astype(dtype)

    keys = jax.random.split(key, 12)
    return {
        "w_in": nrm(keys[0], (input_size, d_model), dtype=bf16),
        "b_in": nrm(keys[1], (1, d_model)),
        "pos_enc": sinusoidal_pos_encoding(1000, d_model),
        "wqkv": nrm(keys[2], (L, d_model, 3 * d_model), dtype=bf16),   # packed Q|K|V
        "bqkv": nrm(keys[3], (L, 1, 3 * d_model)),
        "wo": nrm(keys[4], (L, d_model, d_model), dtype=bf16),
        "bo": nrm(keys[5], (L, 1, d_model)),
        "g1": jnp.ones((L, 1, d_model), jnp.float32),
        "bt1": jnp.zeros((L, 1, d_model), jnp.float32),
        "w1": nrm(keys[6], (L, d_model, dim_feedforward), dtype=bf16),
        "b1": nrm(keys[7], (L, 1, dim_feedforward)),
        "w2": nrm(keys[8], (L, dim_feedforward, d_model), dtype=bf16),
        "b2": nrm(keys[9], (L, 1, d_model)),
        "g2": jnp.ones((L, 1, d_model), jnp.float32),
        "bt2": jnp.zeros((L, 1, d_model), jnp.float32),
        "w_fc": nrm(keys[10], (d_model, output_size)),
        "b_fc": nrm(keys[11], (1, output_size)),
    }


def _pick_batch_tile(B, S, FF):
    """Pick BT so R = BT*S fills the MXU while the f32 (R, FF) FF intermediate
    stays ~<= 8 MiB (well under the 32 MiB scoped-VMEM default; v7x VMEM is 64 MiB)."""
    row_budget = max(S, (8 * 1024 * 1024) // (4 * FF))
    bt = max(1, min(B, row_budget // S))
    while B % bt:                          # keep BT a divisor of B
        bt -= 1
    # Prefer >= 2 batch tiles (v7x megacore) when each tile still fills the MXU M dim.
    if bt == B and B > 1:
        half = B // 2
        while B % half:
            half -= 1
        if half * S >= 256:
            bt = half
    # Partial tiles must satisfy the (8, 128) block constraint on the (B, OUT) output.
    if bt != B and bt % 8 != 0:
        bt = B
    return bt


# ---------------------------------------------------------------------------
# Forward pass (wrapper): one fused pallas_call
# ---------------------------------------------------------------------------
def transformer_forecaster_forward(params, x, *, nhead, batch_tile=None):
    """x: (B, S, input_size) float32 -> (B, output_size) float32."""
    B, S, IN = x.shape
    D = params["w_in"].shape[1]
    OUT = params["w_fc"].shape[1]
    L = params["wqkv"].shape[0]
    FF = params["w1"].shape[2]

    BT = batch_tile if batch_tile is not None else _pick_batch_tile(B, S, FF)
    assert B % BT == 0, "batch must be divisible by the batch tile"
    R = BT * S

    # Plain-JAX (free) preprocessing: row-contiguous input, pre-tiled pos encoding.
    x_flat = x.reshape(B * S, IN)
    pos = jnp.tile(params["pos_enc"][:S, :], (BT, 1))             # (R, D)

    kernel = _make_forecaster_kernel(
        nhead=nhead, d_model=D, num_layers=L, batch_tile=BT, seq=S,
        dim_ff=FF, input_size=IN, output_size=OUT)

    const2 = lambda b: (0, 0)
    const3 = lambda b: (0, 0, 0)

    grid_spec = pltpu.PrefetchScalarGridSpec(
        num_scalar_prefetch=0,
        grid=(B // BT,),                                          # batch tiles only
        in_specs=[
            pl.BlockSpec((R, IN), lambda b: (b, 0)),              # x rows
            pl.BlockSpec((R, D), const2),                         # pos (tiled)
            pl.BlockSpec((IN, D), const2),                        # w_in
            pl.BlockSpec((1, D), const2),                         # b_in
            pl.BlockSpec((L, D, 3 * D), const3),                  # wqkv (stacked)
            pl.BlockSpec((L, 1, 3 * D), const3),                  # bqkv
            pl.BlockSpec((L, D, D), const3),                      # wo
            pl.BlockSpec((L, 1, D), const3),                      # bo
            pl.BlockSpec((L, 1, D), const3),                      # g1
            pl.BlockSpec((L, 1, D), const3),                      # bt1
            pl.BlockSpec((L, D, FF), const3),                     # w1
            pl.BlockSpec((L, 1, FF), const3),                     # b1
            pl.BlockSpec((L, FF, D), const3),                     # w2
            pl.BlockSpec((L, 1, D), const3),                      # b2
            pl.BlockSpec((L, 1, D), const3),                      # g2
            pl.BlockSpec((L, 1, D), const3),                      # bt2
            pl.BlockSpec((D, OUT), const2),                       # w_fc
            pl.BlockSpec((1, OUT), const2),                       # b_fc
        ],
        out_specs=pl.BlockSpec((BT, OUT), lambda b: (b, 0)),
    )

    return pl.pallas_call(
        kernel,
        out_shape=jax.ShapeDtypeStruct((B, OUT), jnp.float32),
        grid_spec=grid_spec,
        compiler_params=pltpu.CompilerParams(
            dimension_semantics=("parallel",),
            vmem_limit_bytes=32 * 1024 * 1024),
    )(x_flat, pos, params["w_in"], params["b_in"],
      params["wqkv"], params["bqkv"], params["wo"], params["bo"],
      params["g1"], params["bt1"], params["w1"], params["b1"],
      params["w2"], params["b2"], params["g2"], params["bt2"],
      params["w_fc"], params["b_fc"])


# ---------------------------------------------------------------------------
if __name__ == "__main__":
    # Small shapes consistent with the module's forward:
    B, S = 2, 8
    INPUT_SIZE, D_MODEL, NHEAD, NUM_LAYERS, OUTPUT_SIZE = 4, 32, 4, 2, 1

    root = jax.random.PRNGKey(0)
    k_params, k_x = jax.random.split(root)

    params = init_params(k_params, INPUT_SIZE, D_MODEL, NHEAD, NUM_LAYERS,
                         OUTPUT_SIZE)
    x = jax.random.normal(k_x, (B, S, INPUT_SIZE), dtype=jnp.float32)

    out = transformer_forecaster_forward(params, x, nhead=NHEAD)
    out = jax.block_until_ready(out)
    assert out.shape == (B, OUTPUT_SIZE)
    assert bool(jnp.all(jnp.isfinite(out)))
    print("KERNEL_OK")
</pallas_src>

<mosaic_0001>
module attributes {stable_mosaic.version = 11 : i64} {
  func.func @kernel(%arg0: i32, %arg1: memref<16x4xf32, #tpu.memory_space<vmem>>, %arg2: memref<16x32xf32, #tpu.memory_space<vmem>>, %arg3: memref<4x32xbf16, #tpu.memory_space<vmem>>, %arg4: memref<1x32xf32, #tpu.memory_space<vmem>>, %arg5: memref<2x32x96xbf16, #tpu.memory_space<vmem>>, %arg6: memref<2x1x96xf32, #tpu.memory_space<vmem>>, %arg7: memref<2x32x32xbf16, #tpu.memory_space<vmem>>, %arg8: memref<2x1x32xf32, #tpu.memory_space<vmem>>, %arg9: memref<2x1x32xf32, #tpu.memory_space<vmem>>, %arg10: memref<2x1x32xf32, #tpu.memory_space<vmem>>, %arg11: memref<2x32x2048xbf16, #tpu.memory_space<vmem>>, %arg12: memref<2x1x2048xf32, #tpu.memory_space<vmem>>, %arg13: memref<2x2048x32xbf16, #tpu.memory_space<vmem>>, %arg14: memref<2x1x32xf32, #tpu.memory_space<vmem>>, %arg15: memref<2x1x32xf32, #tpu.memory_space<vmem>>, %arg16: memref<2x1x32xf32, #tpu.memory_space<vmem>>, %arg17: memref<32x1xf32, #tpu.memory_space<vmem>>, %arg18: memref<1x1xf32, #tpu.memory_space<vmem>>, %arg19: memref<2x1xf32, #tpu.memory_space<vmem>>) attributes {dimension_semantics = [#tpu.dimension_semantics<parallel>], iteration_bounds = array<i64: 1>, scalar_prefetch = 0 : i64, scratch_operands = 0 : i64, tpu.core_type = #tpu.core_type<tc>, window_params = [{transform_indices = @transform_0, window_bounds = array<i64: 16, 4>}, {pipeline_mode = #tpu.pipeline_mode<synchronous>, transform_indices = @transform_1, window_bounds = array<i64: 16, 32>}, {pipeline_mode = #tpu.pipeline_mode<synchronous>, transform_indices = @transform_2, window_bounds = array<i64: 4, 32>}, {pipeline_mode = #tpu.pipeline_mode<synchronous>, transform_indices = @transform_3, window_bounds = array<i64: 1, 32>}, {pipeline_mode = #tpu.pipeline_mode<synchronous>, transform_indices = @transform_4, window_bounds = array<i64: 2, 32, 96>}, {pipeline_mode = #tpu.pipeline_mode<synchronous>, transform_indices = @transform_5, window_bounds = array<i64: 2, 1, 96>}, {pipeline_mode = #tpu.pipeline_mode<synchronous>, transform_indices = @transform_6, window_bounds = array<i64: 2, 32, 32>}, {pipeline_mode = #tpu.pipeline_mode<synchronous>, transform_indices = @transform_7, window_bounds = array<i64: 2, 1, 32>}, {pipeline_mode = #tpu.pipeline_mode<synchronous>, transform_indices = @transform_8, window_bounds = array<i64: 2, 1, 32>}, {pipeline_mode = #tpu.pipeline_mode<synchronous>, transform_indices = @transform_9, window_bounds = array<i64: 2, 1, 32>}, {pipeline_mode = #tpu.pipeline_mode<synchronous>, transform_indices = @transform_10, window_bounds = array<i64: 2, 32, 2048>}, {pipeline_mode = #tpu.pipeline_mode<synchronous>, transform_indices = @transform_11, window_bounds = array<i64: 2, 1, 2048>}, {pipeline_mode = #tpu.pipeline_mode<synchronous>, transform_indices = @transform_12, window_bounds = array<i64: 2, 2048, 32>}, {pipeline_mode = #tpu.pipeline_mode<synchronous>, transform_indices = @transform_13, window_bounds = array<i64: 2, 1, 32>}, {pipeline_mode = #tpu.pipeline_mode<synchronous>, transform_indices = @transform_14, window_bounds = array<i64: 2, 1, 32>}, {pipeline_mode = #tpu.pipeline_mode<synchronous>, transform_indices = @transform_15, window_bounds = array<i64: 2, 1, 32>}, {pipeline_mode = #tpu.pipeline_mode<synchronous>, transform_indices = @transform_16, window_bounds = array<i64: 32, 1>}, {pipeline_mode = #tpu.pipeline_mode<synchronous>, transform_indices = @transform_17, window_bounds = array<i64: 1, 1>}, {transform_indices = @transform_18, window_bounds = array<i64: 2, 1>}]} {
    %c0 = arith.constant 0 : index
    %c0_0 = arith.constant 0 : index
    %0 = vector.load %arg1[%c0, %c0_0] : memref<16x4xf32, #tpu.memory_space<vmem>>, vector<16x4xf32>
    %1 = arith.truncf %0 : vector<16x4xf32> to vector<16x4xbf16>
    %c0_1 = arith.constant 0 : index
    %c0_2 = arith.constant 0 : index
    %2 = vector.load %arg3[%c0_1, %c0_2] : memref<4x32xbf16, #tpu.memory_space<vmem>>, vector<4x32xbf16>
    %cst = arith.constant dense<0.000000e+00> : vector<16x32xf32>
    %3 = tpu.matmul %1, %2, %cst {dimension_numbers = #tpu.dot_dimension_numbers<[1], [0], [0], [1], [0, 0, 1, 1], [], []>} : vector<16x4xbf16>, vector<4x32xbf16>, vector<16x32xf32> -> vector<16x32xf32>
    %c0_3 = arith.constant 0 : index
    %c0_4 = arith.constant 0 : index
    %4 = vector.load %arg4[%c0_3, %c0_4] : memref<1x32xf32, #tpu.memory_space<vmem>>, vector<1x32xf32>
    %5 = vector.broadcast %4 : vector<1x32xf32> to vector<16x32xf32>
    %6 = arith.addf %3, %5 : vector<16x32xf32>
    %c0_5 = arith.constant 0 : index
    %c0_6 = arith.constant 0 : index
    %7 = vector.load %arg2[%c0_5, %c0_6] : memref<16x32xf32, #tpu.memory_space<vmem>>, vector<16x32xf32>
    %8 = arith.addf %6, %7 : vector<16x32xf32>
    %9 = arith.truncf %8 : vector<16x32xf32> to vector<16x32xbf16>
    %c0_7 = arith.constant 0 : index
    %c0_8 = arith.constant 0 : index
    %c0_9 = arith.constant 0 : index
    %10 = vector.load %arg5[%c0_7, %c0_8, %c0_9] : memref<2x32x96xbf16, #tpu.memory_space<vmem>>, vector<1x32x96xbf16>
    %11 = vector.shape_cast %10 : vector<1x32x96xbf16> to vector<32x96xbf16>
    %cst_10 = arith.constant dense<0.000000e+00> : vector<16x96xf32>
    %12 = tpu.matmul %9, %11, %cst_10 {dimension_numbers = #tpu.dot_dimension_numbers<[1], [0], [0], [1], [0, 0, 1, 1], [], []>} : vector<16x32xbf16>, vector<32x96xbf16>, vector<16x96xf32> -> vector<16x96xf32>
    %c0_11 = arith.constant 0 : index
    %c0_12 = arith.constant 0 : index
    %c0_13 = arith.constant 0 : index
    %13 = vector.load %arg6[%c0_11, %c0_12, %c0_13] : memref<2x1x96xf32, #tpu.memory_space<vmem>>, vector<1x1x96xf32>
    %14 = vector.shape_cast %13 : vector<1x1x96xf32> to vector<1x96xf32>
    %15 = vector.broadcast %14 : vector<1x96xf32> to vector<16x96xf32>
    %16 = arith.addf %12, %15 : vector<16x96xf32>
    %17 = vector.extract_strided_slice %16 {offsets = [0, 0], sizes = [16, 32], strides = [1, 1]} : vector<16x96xf32> to vector<16x32xf32>
    %18 = arith.truncf %17 : vector<16x32xf32> to vector<16x32xbf16>
    %19 = vector.shape_cast %18 : vector<16x32xbf16> to vector<2x8x32xbf16>
    %20 = vector.extract_strided_slice %16 {offsets = [0, 32], sizes = [16, 32], strides = [1, 1]} : vector<16x96xf32> to vector<16x32xf32>
    %21 = arith.truncf %20 : vector<16x32xf32> to vector<16x32xbf16>
    %22 = vector.shape_cast %21 : vector<16x32xbf16> to vector<2x8x32xbf16>
    %23 = vector.extract_strided_slice %16 {offsets = [0, 64], sizes = [16, 32], strides = [1, 1]} : vector<16x96xf32> to vector<16x32xf32>
    %24 = arith.truncf %23 : vector<16x32xf32> to vector<16x32xbf16>
    %25 = vector.shape_cast %24 : vector<16x32xbf16> to vector<2x8x32xbf16>
    %c0_14 = arith.constant 0 : index
    %c0_15 = arith.constant 0 : index
    %c0_16 = arith.constant 0 : index
    %26 = vector.load %arg7[%c0_14, %c0_15, %c0_16] : memref<2x32x32xbf16, #tpu.memory_space<vmem>>, vector<1x32x32xbf16>
    %27 = vector.shape_cast %26 : vector<1x32x32xbf16> to vector<32x32xbf16>
    %cst_17 = arith.constant 0.000000e+00 : f32
    %28 = vector.broadcast %cst_17 : f32 to vector<16x32xf32>
    %29 = vector.extract_strided_slice %19 {offsets = [0, 0, 0], sizes = [2, 8, 8], strides = [1, 1, 1]} : vector<2x8x32xbf16> to vector<2x8x8xbf16>
    %30 = vector.extract_strided_slice %22 {offsets = [0, 0, 0], sizes = [2, 8, 8], strides = [1, 1, 1]} : vector<2x8x32xbf16> to vector<2x8x8xbf16>
    %31 = vector.extract_strided_slice %25 {offsets = [0, 0, 0], sizes = [2, 8, 8], strides = [1, 1, 1]} : vector<2x8x32xbf16> to vector<2x8x8xbf16>
    "tpu.trace_start"() <{level = 10 : i32, message = "bqd,bkd->bqk"}> : () -> ()
    %cst_18 = arith.constant dense<0.000000e+00> : vector<2x8x8xf32>
    %32 = tpu.matmul %29, %30, %cst_18 {dimension_numbers = #tpu.dot_dimension_numbers<[2], [2], [1], [1], [0, 0, 0, 1, 1, 1], [0], [0]>} : vector<2x8x8xbf16>, vector<2x8x8xbf16>, vector<2x8x8xf32> -> vector<2x8x8xf32>
    "tpu.trace_stop"() : () -> ()
    %cst_19 = arith.constant 0.353553385 : f32
    %33 = vector.broadcast %cst_19 : f32 to vector<2x8x8xf32>
    %34 = arith.mulf %32, %33 : vector<2x8x8xf32>
    %cst_20 = arith.constant dense<0xFF800000> : vector<2x8xf32>
    %35 = vector.multi_reduction <maximumf>, %34, %cst_20 [2] : vector<2x8x8xf32> to vector<2x8xf32>
    %36 = vector.shape_cast %35 : vector<2x8xf32> to vector<2x8x1xf32>
    %37 = vector.broadcast %36 : vector<2x8x1xf32> to vector<2x8x8xf32>
    %38 = arith.subf %34, %37 : vector<2x8x8xf32>
    %39 = math.exp %38 : vector<2x8x8xf32>
    %cst_21 = arith.constant dense<0.000000e+00> : vector<2x8xf32>
    %40 = vector.multi_reduction <add>, %39, %cst_21 [2] : vector<2x8x8xf32> to vector<2x8xf32>
    %41 = vector.shape_cast %40 : vector<2x8xf32> to vector<2x8x1xf32>
    %42 = tpu.reciprocal %41 {approx = true} : vector<2x8x1xf32> -> vector<2x8x1xf32>
    %43 = vector.broadcast %42 : vector<2x8x1xf32> to vector<2x8x8xf32>
    %44 = arith.mulf %39, %43 : vector<2x8x8xf32>
    %45 = arith.truncf %44 : vector<2x8x8xf32> to vector<2x8x8xbf16>
    "tpu.trace_start"() <{level = 10 : i32, message = "bqk,bkd->bqd"}> : () -> ()
    %cst_22 = arith.constant dense<0.000000e+00> : vector<2x8x8xf32>
    %46 = tpu.matmul %45, %31, %cst_22 {dimension_numbers = #tpu.dot_dimension_numbers<[2], [1], [1], [2], [0, 0, 0, 1, 1, 2], [0], [0]>} : vector<2x8x8xbf16>, vector<2x8x8xbf16>, vector<2x8x8xf32> -> vector<2x8x8xf32>
    "tpu.trace_stop"() : () -> ()
    %47 = vector.shape_cast %46 : vector<2x8x8xf32> to vector<16x8xf32>
    %48 = arith.truncf %47 : vector<16x8xf32> to vector<16x8xbf16>
    %49 = vector.extract_strided_slice %27 {offsets = [0, 0], sizes = [8, 32], strides = [1, 1]} : vector<32x32xbf16> to vector<8x32xbf16>
    %cst_23 = arith.constant dense<0.000000e+00> : vector<16x32xf32>
    %50 = tpu.matmul %48, %49, %cst_23 {dimension_numbers = #tpu.dot_dimension_numbers<[1], [0], [0], [1], [0, 0, 1, 1], [], []>} : vector<16x8xbf16>, vector<8x32xbf16>, vector<16x32xf32> -> vector<16x32xf32>
    %51 = arith.addf %28, %50 : vector<16x32xf32>
    %52 = vector.extract_strided_slice %19 {offsets = [0, 0, 8], sizes = [2, 8, 8], strides = [1, 1, 1]} : vector<2x8x32xbf16> to vector<2x8x8xbf16>
    %53 = vector.extract_strided_slice %22 {offsets = [0, 0, 8], sizes = [2, 8, 8], strides = [1, 1, 1]} : vector<2x8x32xbf16> to vector<2x8x8xbf16>
    %54 = vector.extract_strided_slice %25 {offsets = [0, 0, 8], sizes = [2, 8, 8], strides = [1, 1, 1]} : vector<2x8x32xbf16> to vector<2x8x8xbf16>
    "tpu.trace_start"() <{level = 10 : i32, message = "bqd,bkd->bqk"}> : () -> ()
    %cst_24 = arith.constant dense<0.000000e+00> : vector<2x8x8xf32>
    %55 = tpu.matmul %52, %53, %cst_24 {dimension_numbers = #tpu.dot_dimension_numbers<[2], [2], [1], [1], [0, 0, 0, 1, 1, 1], [0], [0]>} : vector<2x8x8xbf16>, vector<2x8x8xbf16>, vector<2x8x8xf32> -> vector<2x8x8xf32>
    "tpu.trace_stop"() : () -> ()
    %cst_25 = arith.constant 0.353553385 : f32
    %56 = vector.broadcast %cst_25 : f32 to vector<2x8x8xf32>
    %57 = arith.mulf %55, %56 : vector<2x8x8xf32>
    %cst_26 = arith.constant dense<0xFF800000> : vector<2x8xf32>
    %58 = vector.multi_reduction <maximumf>, %57, %cst_26 [2] : vector<2x8x8xf32> to vector<2x8xf32>
    %59 = vector.shape_cast %58 : vector<2x8xf32> to vector<2x8x1xf32>
    %60 = vector.broadcast %59 : vector<2x8x1xf32> to vector<2x8x8xf32>
    %61 = arith.subf %57, %60 : vector<2x8x8xf32>
    %62 = math.exp %61 : vector<2x8x8xf32>
    %cst_27 = arith.constant dense<0.000000e+00> : vector<2x8xf32>
    %63 = vector.multi_reduction <add>, %62, %cst_27 [2] : vector<2x8x8xf32> to vector<2x8xf32>
    %64 = vector.shape_cast %63 : vector<2x8xf32> to vector<2x8x1xf32>
    %65 = tpu.reciprocal %64 {approx = true} : vector<2x8x1xf32> -> vector<2x8x1xf32>
    %66 = vector.broadcast %65 : vector<2x8x1xf32> to vector<2x8x8xf32>
    %67 = arith.mulf %62, %66 : vector<2x8x8xf32>
    %68 = arith.truncf %67 : vector<2x8x8xf32> to vector<2x8x8xbf16>
    "tpu.trace_start"() <{level = 10 : i32, message = "bqk,bkd->bqd"}> : () -> ()
    %cst_28 = arith.constant dense<0.000000e+00> : vector<2x8x8xf32>
    %69 = tpu.matmul %68, %54, %cst_28 {dimension_numbers = #tpu.dot_dimension_numbers<[2], [1], [1], [2], [0, 0, 0, 1, 1, 2], [0], [0]>} : vector<2x8x8xbf16>, vector<2x8x8xbf16>, vector<2x8x8xf32> -> vector<2x8x8xf32>
    "tpu.trace_stop"() : () -> ()
    %70 = vector.shape_cast %69 : vector<2x8x8xf32> to vector<16x8xf32>
    %71 = arith.truncf %70 : vector<16x8xf32> to vector<16x8xbf16>
    %72 = vector.extract_strided_slice %27 {offsets = [8, 0], sizes = [8, 32], strides = [1, 1]} : vector<32x32xbf16> to vector<8x32xbf16>
    %cst_29 = arith.constant dense<0.000000e+00> : vector<16x32xf32>
    %73 = tpu.matmul %71, %72, %cst_29 {dimension_numbers = #tpu.dot_dimension_numbers<[1], [0], [0], [1], [0, 0, 1, 1], [], []>} : vector<16x8xbf16>, vector<8x32xbf16>, vector<16x32xf32> -> vector<16x32xf32>
    %74 = arith.addf %51, %73 : vector<16x32xf32>
    %75 = vector.extract_strided_slice %19 {offsets = [0, 0, 16], sizes = [2, 8, 8], strides = [1, 1, 1]} : vector<2x8x32xbf16> to vector<2x8x8xbf16>
    %76 = vector.extract_strided_slice %22 {offsets = [0, 0, 16], sizes = [2, 8, 8], strides = [1, 1, 1]} : vector<2x8x32xbf16> to vector<2x8x8xbf16>
    %77 = vector.extract_strided_slice %25 {offsets = [0, 0, 16], sizes = [2, 8, 8], strides = [1, 1, 1]} : vector<2x8x32xbf16> to vector<2x8x8xbf16>
    "tpu.trace_start"() <{level = 10 : i32, message = "bqd,bkd->bqk"}> : () -> ()
    %cst_30 = arith.constant dense<0.000000e+00> : vector<2x8x8xf32>
    %78 = tpu.matmul %75, %76, %cst_30 {dimension_numbers = #tpu.dot_dimension_numbers<[2], [2], [1], [1], [0, 0, 0, 1, 1, 1], [0], [0]>} : vector<2x8x8xbf16>, vector<2x8x8xbf16>, vector<2x8x8xf32> -> vector<2x8x8xf32>
    "tpu.trace_stop"() : () -> ()
    %cst_31 = arith.constant 0.353553385 : f32
    %79 = vector.broadcast %cst_31 : f32 to vector<2x8x8xf32>
    %80 = arith.mulf %78, %79 : vector<2x8x8xf32>
    %cst_32 = arith.constant dense<0xFF800000> : vector<2x8xf32>
    %81 = vector.multi_reduction <maximumf>, %80, %cst_32 [2] : vector<2x8x8xf32> to vector<2x8xf32>
    %82 = vector.shape_cast %81 : vector<2x8xf32> to vector<2x8x1xf32>
    %83 = vector.broadcast %82 : vector<2x8x1xf32> to vector<2x8x8xf32>
    %84 = arith.subf %80, %83 : vector<2x8x8xf32>
    %85 = math.exp %84 : vector<2x8x8xf32>
    %cst_33 = arith.constant dense<0.000000e+00> : vector<2x8xf32>
    %86 = vector.multi_reduction <add>, %85, %cst_33 [2] : vector<2x8x8xf32> to vector<2x8xf32>
    %87 = vector.shape_cast %86 : vector<2x8xf32> to vector<2x8x1xf32>
    %88 = tpu.reciprocal %87 {approx = true} : vector<2x8x1xf32> -> vector<2x8x1xf32>
    %89 = vector.broadcast %88 : vector<2x8x1xf32> to vector<2x8x8xf32>
    %90 = arith.mulf %85, %89 : vector<2x8x8xf32>
    %91 = arith.truncf %90 : vector<2x8x8xf32> to vector<2x8x8xbf16>
    "tpu.trace_start"() <{level = 10 : i32, message = "bqk,bkd->bqd"}> : () -> ()
    %cst_34 = arith.constant dense<0.000000e+00> : vector<2x8x8xf32>
    %92 = tpu.matmul %91, %77, %cst_34 {dimension_numbers = #tpu.dot_dimension_numbers<[2], [1], [1], [2], [0, 0, 0, 1, 1, 2], [0], [0]>} : vector<2x8x8xbf16>, vector<2x8x8xbf16>, vector<2x8x8xf32> -> vector<2x8x8xf32>
    "tpu.trace_stop"() : () -> ()
    %93 = vector.shape_cast %92 : vector<2x8x8xf32> to vector<16x8xf32>
    %94 = arith.truncf %93 : vector<16x8xf32> to vector<16x8xbf16>
    %95 = vector.extract_strided_slice %27 {offsets = [16, 0], sizes = [8, 32], strides = [1, 1]} : vector<32x32xbf16> to vector<8x32xbf16>
    %cst_35 = arith.constant dense<0.000000e+00> : vector<16x32xf32>
    %96 = tpu.matmul %94, %95, %cst_35 {dimension_numbers = #tpu.dot_dimension_numbers<[1], [0], [0], [1], [0, 0, 1, 1], [], []>} : vector<16x8xbf16>, vector<8x32xbf16>, vector<16x32xf32> -> vector<16x32xf32>
    %97 = arith.addf %74, %96 : vector<16x32xf32>
    %98 = vector.extract_strided_slice %19 {offsets = [0, 0, 24], sizes = [2, 8, 8], strides = [1, 1, 1]} : vector<2x8x32xbf16> to vector<2x8x8xbf16>
    %99 = vector.extract_strided_slice %22 {offsets = [0, 0, 24], sizes = [2, 8, 8], strides = [1, 1, 1]} : vector<2x8x32xbf16> to vector<2x8x8xbf16>
    %100 = vector.extract_strided_slice %25 {offsets = [0, 0, 24], sizes = [2, 8, 8], strides = [1, 1, 1]} : vector<2x8x32xbf16> to vector<2x8x8xbf16>
    "tpu.trace_start"() <{level = 10 : i32, message = "bqd,bkd->bqk"}> : () -> ()
    %cst_36 = arith.constant dense<0.000000e+00> : vector<2x8x8xf32>
    %101 = tpu.matmul %98, %99, %cst_36 {dimension_numbers = #tpu.dot_dimension_numbers<[2], [2], [1], [1], [0, 0, 0, 1, 1, 1], [0], [0]>} : vector<2x8x8xbf16>, vector<2x8x8xbf16>, vector<2x8x8xf32> -> vector<2x8x8xf32>
    "tpu.trace_stop"() : () -> ()
    %cst_37 = arith.constant 0.353553385 : f32
    %102 = vector.broadcast %cst_37 : f32 to vector<2x8x8xf32>
    %103 = arith.mulf %101, %102 : vector<2x8x8xf32>
    %cst_38 = arith.constant dense<0xFF800000> : vector<2x8xf32>
    %104 = vector.multi_reduction <maximumf>, %103, %cst_38 [2] : vector<2x8x8xf32> to vector<2x8xf32>
    %105 = vector.shape_cast %104 : vector<2x8xf32> to vector<2x8x1xf32>
    %106 = vector.broadcast %105 : vector<2x8x1xf32> to vector<2x8x8xf32>
    %107 = arith.subf %103, %106 : vector<2x8x8xf32>
    %108 = math.exp %107 : vector<2x8x8xf32>
    %cst_39 = arith.constant dense<0.000000e+00> : vector<2x8xf32>
    %109 = vector.multi_reduction <add>, %108, %cst_39 [2] : vector<2x8x8xf32> to vector<2x8xf32>
    %110 = vector.shape_cast %109 : vector<2x8xf32> to vector<2x8x1xf32>
    %111 = tpu.reciprocal %110 {approx = true} : vector<2x8x1xf32> -> vector<2x8x1xf32>
    %112 = vector.broadcast %111 : vector<2x8x1xf32> to vector<2x8x8xf32>
    %113 = arith.mulf %108, %112 : vector<2x8x8xf32>
    %114 = arith.truncf %113 : vector<2x8x8xf32> to vector<2x8x8xbf16>
    "tpu.trace_start"() <{level = 10 : i32, message = "bqk,bkd->bqd"}> : () -> ()
    %cst_40 = arith.constant dense<0.000000e+00> : vector<2x8x8xf32>
    %115 = tpu.matmul %114, %100, %cst_40 {dimension_numbers = #tpu.dot_dimension_numbers<[2], [1], [1], [2], [0, 0, 0, 1, 1, 2], [0], [0]>} : vector<2x8x8xbf16>, vector<2x8x8xbf16>, vector<2x8x8xf32> -> vector<2x8x8xf32>
    "tpu.trace_stop"() : () -> ()
    %116 = vector.shape_cast %115 : vector<2x8x8xf32> to vector<16x8xf32>
    %117 = arith.truncf %116 : vector<16x8xf32> to vector<16x8xbf16>
    %118 = vector.extract_strided_slice %27 {offsets = [24, 0], sizes = [8, 32], strides = [1, 1]} : vector<32x32xbf16> to vector<8x32xbf16>
    %cst_41 = arith.constant dense<0.000000e+00> : vector<16x32xf32>
    %119 = tpu.matmul %117, %118, %cst_41 {dimension_numbers = #tpu.dot_dimension_numbers<[1], [0], [0], [1], [0, 0, 1, 1], [], []>} : vector<16x8xbf16>, vector<8x32xbf16>, vector<16x32xf32> -> vector<16x32xf32>
    %120 = arith.addf %97, %119 : vector<16x32xf32>
    %c0_42 = arith.constant 0 : index
    %c0_43 = arith.constant 0 : index
    %c0_44 = arith.constant 0 : index
    %121 = vector.load %arg8[%c0_42, %c0_43, %c0_44] : memref<2x1x32xf32, #tpu.memory_space<vmem>>, vector<1x1x32xf32>
    %122 = vector.shape_cast %121 : vector<1x1x32xf32> to vector<1x32xf32>
    %123 = vector.broadcast %122 : vector<1x32xf32> to vector<16x32xf32>
    %124 = arith.addf %120, %123 : vector<16x32xf32>
    %125 = arith.addf %8, %124 : vector<16x32xf32>
    %c0_45 = arith.constant 0 : index
    %c0_46 = arith.constant 0 : index
    %c0_47 = arith.constant 0 : index
    %126 = vector.load %arg9[%c0_45, %c0_46, %c0_47] : memref<2x1x32xf32, #tpu.memory_space<vmem>>, vector<1x1x32xf32>
    %127 = vector.shape_cast %126 : vector<1x1x32xf32> to vector<1x32xf32>
    %c0_48 = arith.constant 0 : index
    %c0_49 = arith.constant 0 : index
    %c0_50 = arith.constant 0 : index
    %128 = vector.load %arg10[%c0_48, %c0_49, %c0_50] : memref<2x1x32xf32, #tpu.memory_space<vmem>>, vector<1x1x32xf32>
    %129 = vector.shape_cast %128 : vector<1x1x32xf32> to vector<1x32xf32>
    %cst_51 = arith.constant dense<0.000000e+00> : vector<16xf32>
    %130 = vector.multi_reduction <add>, %125, %cst_51 [1] : vector<16x32xf32> to vector<16xf32>
    %131 = vector.shape_cast %130 : vector<16xf32> to vector<16x1xf32>
    %cst_52 = arith.constant 3.200000e+01 : f32
    %132 = vector.broadcast %cst_52 : f32 to vector<16x1xf32>
    %133 = arith.divf %131, %132 : vector<16x1xf32>
    %134 = vector.broadcast %133 : vector<16x1xf32> to vector<16x32xf32>
    %135 = arith.subf %125, %134 : vector<16x32xf32>
    %136 = arith.mulf %135, %135 : vector<16x32xf32>
    %cst_53 = arith.constant dense<0.000000e+00> : vector<16xf32>
    %137 = vector.multi_reduction <add>, %136, %cst_53 [1] : vector<16x32xf32> to vector<16xf32>
    %138 = vector.shape_cast %137 : vector<16xf32> to vector<16x1xf32>
    %cst_54 = arith.constant 3.200000e+01 : f32
    %139 = vector.broadcast %cst_54 : f32 to vector<16x1xf32>
    %140 = arith.divf %138, %139 : vector<16x1xf32>
    %141 = vector.broadcast %133 : vector<16x1xf32> to vector<16x32xf32>
    %142 = arith.subf %125, %141 : vector<16x32xf32>
    %cst_55 = arith.constant 9.99999974E-6 : f32
    %143 = vector.broadcast %cst_55 : f32 to vector<16x1xf32>
    %144 = arith.addf %140, %143 : vector<16x1xf32>
    %145 = math.rsqrt %144 : vector<16x1xf32>
    %146 = vector.broadcast %145 : vector<16x1xf32> to vector<16x32xf32>
    %147 = arith.mulf %142, %146 : vector<16x32xf32>
    %148 = vector.broadcast %127 : vector<1x32xf32> to vector<16x32xf32>
    %149 = arith.mulf %147, %148 : vector<16x32xf32>
    %150 = vector.broadcast %129 : vector<1x32xf32> to vector<16x32xf32>
    %151 = arith.addf %149, %150 : vector<16x32xf32>
    %152 = arith.truncf %151 : vector<16x32xf32> to vector<16x32xbf16>
    %c0_56 = arith.constant 0 : index
    %c0_57 = arith.constant 0 : index
    %c0_58 = arith.constant 0 : index
    %153 = vector.load %arg11[%c0_56, %c0_57, %c0_58] : memref<2x32x2048xbf16, #tpu.memory_space<vmem>>, vector<1x32x2048xbf16>
    %154 = vector.shape_cast %153 : vector<1x32x2048xbf16> to vector<32x2048xbf16>
    %cst_59 = arith.constant dense<0.000000e+00> : vector<16x2048xf32>
    %155 = tpu.matmul %152, %154, %cst_59 {dimension_numbers = #tpu.dot_dimension_numbers<[1], [0], [0], [1], [0, 0, 1, 1], [], []>} : vector<16x32xbf16>, vector<32x2048xbf16>, vector<16x2048xf32> -> vector<16x2048xf32>
    %c0_60 = arith.constant 0 : index
    %c0_61 = arith.constant 0 : index
    %c0_62 = arith.constant 0 : index
    %156 = vector.load %arg12[%c0_60, %c0_61, %c0_62] : memref<2x1x2048xf32, #tpu.memory_space<vmem>>, vector<1x1x2048xf32>
    %157 = vector.shape_cast %156 : vector<1x1x2048xf32> to vector<1x2048xf32>
    %158 = vector.broadcast %157 : vector<1x2048xf32> to vector<16x2048xf32>
    %159 = arith.addf %155, %158 : vector<16x2048xf32>
    %cst_63 = arith.constant 0.000000e+00 : f32
    %160 = vector.broadcast %cst_63 : f32 to vector<16x2048xf32>
    %161 = arith.maximumf %159, %160 : vector<16x2048xf32>
    %162 = arith.truncf %161 : vector<16x2048xf32> to vector<16x2048xbf16>
    %c0_64 = arith.constant 0 : index
    %c0_65 = arith.constant 0 : index
    %c0_66 = arith.constant 0 : index
    %163 = vector.load %arg13[%c0_64, %c0_65, %c0_66] : memref<2x2048x32xbf16, #tpu.memory_space<vmem>>, vector<1x2048x32xbf16>
    %164 = vector.shape_cast %163 : vector<1x2048x32xbf16> to vector<2048x32xbf16>
    %cst_67 = arith.constant dense<0.000000e+00> : vector<16x32xf32>
    %165 = tpu.matmul %162, %164, %cst_67 {dimension_numbers = #tpu.dot_dimension_numbers<[1], [0], [0], [1], [0, 0, 1, 1], [], []>} : vector<16x2048xbf16>, vector<2048x32xbf16>, vector<16x32xf32> -> vector<16x32xf32>
    %c0_68 = arith.constant 0 : index
    %c0_69 = arith.constant 0 : index
    %c0_70 = arith.constant 0 : index
    %166 = vector.load %arg14[%c0_68, %c0_69, %c0_70] : memref<2x1x32xf32, #tpu.memory_space<vmem>>, vector<1x1x32xf32>
    %167 = vector.shape_cast %166 : vector<1x1x32xf32> to vector<1x32xf32>
    %168 = vector.broadcast %167 : vector<1x32xf32> to vector<16x32xf32>
    %169 = arith.addf %165, %168 : vector<16x32xf32>
    %170 = arith.addf %151, %169 : vector<16x32xf32>
    %c0_71 = arith.constant 0 : index
    %c0_72 = arith.constant 0 : index
    %c0_73 = arith.constant 0 : index
    %171 = vector.load %arg15[%c0_71, %c0_72, %c0_73] : memref<2x1x32xf32, #tpu.memory_space<vmem>>, vector<1x1x32xf32>
    %172 = vector.shape_cast %171 : vector<1x1x32xf32> to vector<1x32xf32>
    %c0_74 = arith.constant 0 : index
    %c0_75 = arith.constant 0 : index
    %c0_76 = arith.constant 0 : index
    %173 = vector.load %arg16[%c0_74, %c0_75, %c0_76] : memref<2x1x32xf32, #tpu.memory_space<vmem>>, vector<1x1x32xf32>
    %174 = vector.shape_cast %173 : vector<1x1x32xf32> to vector<1x32xf32>
    %cst_77 = arith.constant dense<0.000000e+00> : vector<16xf32>
    %175 = vector.multi_reduction <add>, %170, %cst_77 [1] : vector<16x32xf32> to vector<16xf32>
    %176 = vector.shape_cast %175 : vector<16xf32> to vector<16x1xf32>
    %cst_78 = arith.constant 3.200000e+01 : f32
    %177 = vector.broadcast %cst_78 : f32 to vector<16x1xf32>
    %178 = arith.divf %176, %177 : vector<16x1xf32>
    %179 = vector.broadcast %178 : vector<16x1xf32> to vector<16x32xf32>
    %180 = arith.subf %170, %179 : vector<16x32xf32>
    %181 = arith.mulf %180, %180 : vector<16x32xf32>
    %cst_79 = arith.constant dense<0.000000e+00> : vector<16xf32>
    %182 = vector.multi_reduction <add>, %181, %cst_79 [1] : vector<16x32xf32> to vector<16xf32>
    %183 = vector.shape_cast %182 : vector<16xf32> to vector<16x1xf32>
    %cst_80 = arith.constant 3.200000e+01 : f32
    %184 = vector.broadcast %cst_80 : f32 to vector<16x1xf32>
    %185 = arith.divf %183, %184 : vector<16x1xf32>
    %186 = vector.broadcast %178 : vector<16x1xf32> to vector<16x32xf32>
    %187 = arith.subf %170, %186 : vector<16x32xf32>
    %cst_81 = arith.constant 9.99999974E-6 : f32
    %188 = vector.broadcast %cst_81 : f32 to vector<16x1xf32>
    %189 = arith.addf %185, %188 : vector<16x1xf32>
    %190 = math.rsqrt %189 : vector<16x1xf32>
    %191 = vector.broadcast %190 : vector<16x1xf32> to vector<16x32xf32>
    %192 = arith.mulf %187, %191 : vector<16x32xf32>
    %193 = vector.broadcast %172 : vector<1x32xf32> to vector<16x32xf32>
    %194 = arith.mulf %192, %193 : vector<16x32xf32>
    %195 = vector.broadcast %174 : vector<1x32xf32> to vector<16x32xf32>
    %196 = arith.addf %194, %195 : vector<16x32xf32>
    %197 = arith.truncf %196 : vector<16x32xf32> to vector<16x32xbf16>
    %c1 = arith.constant 1 : index
    %c0_82 = arith.constant 0 : index
    %c0_83 = arith.constant 0 : index
    %198 = vector.load %arg5[%c1, %c0_82, %c0_83] : memref<2x32x96xbf16, #tpu.memory_space<vmem>>, vector<1x32x96xbf16>
    %199 = vector.shape_cast %198 : vector<1x32x96xbf16> to vector<32x96xbf16>
    %cst_84 = arith.constant dense<0.000000e+00> : vector<16x96xf32>
    %200 = tpu.matmul %197, %199, %cst_84 {dimension_numbers = #tpu.dot_dimension_numbers<[1], [0], [0], [1], [0, 0, 1, 1], [], []>} : vector<16x32xbf16>, vector<32x96xbf16>, vector<16x96xf32> -> vector<16x96xf32>
    %c1_85 = arith.constant 1 : index
    %c0_86 = arith.constant 0 : index
    %c0_87 = arith.constant 0 : index
    %201 = vector.load %arg6[%c1_85, %c0_86, %c0_87] : memref<2x1x96xf32, #tpu.memory_space<vmem>>, vector<1x1x96xf32>
    %202 = vector.shape_cast %201 : vector<1x1x96xf32> to vector<1x96xf32>
    %203 = vector.broadcast %202 : vector<1x96xf32> to vector<16x96xf32>
    %204 = arith.addf %200, %203 : vector<16x96xf32>
    %205 = vector.extract_strided_slice %204 {offsets = [0, 0], sizes = [16, 32], strides = [1, 1]} : vector<16x96xf32> to vector<16x32xf32>
    %206 = arith.truncf %205 : vector<16x32xf32> to vector<16x32xbf16>
    %207 = vector.shape_cast %206 : vector<16x32xbf16> to vector<2x8x32xbf16>
    %208 = vector.extract_strided_slice %204 {offsets = [0, 32], sizes = [16, 32], strides = [1, 1]} : vector<16x96xf32> to vector<16x32xf32>
    %209 = arith.truncf %208 : vector<16x32xf32> to vector<16x32xbf16>
    %210 = vector.shape_cast %209 : vector<16x32xbf16> to vector<2x8x32xbf16>
    %211 = vector.extract_strided_slice %204 {offsets = [0, 64], sizes = [16, 32], strides = [1, 1]} : vector<16x96xf32> to vector<16x32xf32>
    %212 = arith.truncf %211 : vector<16x32xf32> to vector<16x32xbf16>
    %213 = vector.shape_cast %212 : vector<16x32xbf16> to vector<2x8x32xbf16>
    %c1_88 = arith.constant 1 : index
    %c0_89 = arith.constant 0 : index
    %c0_90 = arith.constant 0 : index
    %214 = vector.load %arg7[%c1_88, %c0_89, %c0_90] : memref<2x32x32xbf16, #tpu.memory_space<vmem>>, vector<1x32x32xbf16>
    %215 = vector.shape_cast %214 : vector<1x32x32xbf16> to vector<32x32xbf16>
    %cst_91 = arith.constant 0.000000e+00 : f32
    %216 = vector.broadcast %cst_91 : f32 to vector<16x32xf32>
    %217 = vector.extract_strided_slice %207 {offsets = [0, 0, 0], sizes = [2, 8, 8], strides = [1, 1, 1]} : vector<2x8x32xbf16> to vector<2x8x8xbf16>
    %218 = vector.extract_strided_slice %210 {offsets = [0, 0, 0], sizes = [2, 8, 8], strides = [1, 1, 1]} : vector<2x8x32xbf16> to vector<2x8x8xbf16>
    %219 = vector.extract_strided_slice %213 {offsets = [0, 0, 0], sizes = [2, 8, 8], strides = [1, 1, 1]} : vector<2x8x32xbf16> to vector<2x8x8xbf16>
    "tpu.trace_start"() <{level = 10 : i32, message = "bqd,bkd->bqk"}> : () -> ()
    %cst_92 = arith.constant dense<0.000000e+00> : vector<2x8x8xf32>
    %220 = tpu.matmul %217, %218, %cst_92 {dimension_numbers = #tpu.dot_dimension_numbers<[2], [2], [1], [1], [0, 0, 0, 1, 1, 1], [0], [0]>} : vector<2x8x8xbf16>, vector<2x8x8xbf16>, vector<2x8x8xf32> -> vector<2x8x8xf32>
    "tpu.trace_stop"() : () -> ()
    %cst_93 = arith.constant 0.353553385 : f32
    %221 = vector.broadcast %cst_93 : f32 to vector<2x8x8xf32>
    %222 = arith.mulf %220, %221 : vector<2x8x8xf32>
    %cst_94 = arith.constant dense<0xFF800000> : vector<2x8xf32>
    %223 = vector.multi_reduction <maximumf>, %222, %cst_94 [2] : vector<2x8x8xf32> to vector<2x8xf32>
    %224 = vector.shape_cast %223 : vector<2x8xf32> to vector<2x8x1xf32>
    %225 = vector.broadcast %224 : vector<2x8x1xf32> to vector<2x8x8xf32>
    %226 = arith.subf %222, %225 : vector<2x8x8xf32>
    %227 = math.exp %226 : vector<2x8x8xf32>
    %cst_95 = arith.constant dense<0.000000e+00> : vector<2x8xf32>
    %228 = vector.multi_reduction <add>, %227, %cst_95 [2] : vector<2x8x8xf32> to vector<2x8xf32>
    %229 = vector.shape_cast %228 : vector<2x8xf32> to vector<2x8x1xf32>
    %230 = tpu.reciprocal %229 {approx = true} : vector<2x8x1xf32> -> vector<2x8x1xf32>
    %231 = vector.broadcast %230 : vector<2x8x1xf32> to vector<2x8x8xf32>
    %232 = arith.mulf %227, %231 : vector<2x8x8xf32>
    %233 = arith.truncf %232 : vector<2x8x8xf32> to vector<2x8x8xbf16>
    "tpu.trace_start"() <{level = 10 : i32, message = "bqk,bkd->bqd"}> : () -> ()
    %cst_96 = arith.constant dense<0.000000e+00> : vector<2x8x8xf32>
    %234 = tpu.matmul %233, %219, %cst_96 {dimension_numbers = #tpu.dot_dimension_numbers<[2], [1], [1], [2], [0, 0, 0, 1, 1, 2], [0], [0]>} : vector<2x8x8xbf16>, vector<2x8x8xbf16>, vector<2x8x8xf32> -> vector<2x8x8xf32>
    "tpu.trace_stop"() : () -> ()
    %235 = vector.shape_cast %234 : vector<2x8x8xf32> to vector<16x8xf32>
    %236 = arith.truncf %235 : vector<16x8xf32> to vector<16x8xbf16>
    %237 = vector.extract_strided_slice %215 {offsets = [0, 0], sizes = [8, 32], strides = [1, 1]} : vector<32x32xbf16> to vector<8x32xbf16>
    %cst_97 = arith.constant dense<0.000000e+00> : vector<16x32xf32>
    %238 = tpu.matmul %236, %237, %cst_97 {dimension_numbers = #tpu.dot_dimension_numbers<[1], [0], [0], [1], [0, 0, 1, 1], [], []>} : vector<16x8xbf16>, vector<8x32xbf16>, vector<16x32xf32> -> vector<16x32xf32>
    %239 = arith.addf %216, %238 : vector<16x32xf32>
    %240 = vector.extract_strided_slice %207 {offsets = [0, 0, 8], sizes = [2, 8, 8], strides = [1, 1, 1]} : vector<2x8x32xbf16> to vector<2x8x8xbf16>
    %241 = vector.extract_strided_slice %210 {offsets = [0, 0, 8], sizes = [2, 8, 8], strides = [1, 1, 1]} : vector<2x8x32xbf16> to vector<2x8x8xbf16>
    %242 = vector.extract_strided_slice %213 {offsets = [0, 0, 8], sizes = [2, 8, 8], strides = [1, 1, 1]} : vector<2x8x32xbf16> to vector<2x8x8xbf16>
    "tpu.trace_start"() <{level = 10 : i32, message = "bqd,bkd->bqk"}> : () -> ()
    %cst_98 = arith.constant dense<0.000000e+00> : vector<2x8x8xf32>
    %243 = tpu.matmul %240, %241, %cst_98 {dimension_numbers = #tpu.dot_dimension_numbers<[2], [2], [1], [1], [0, 0, 0, 1, 1, 1], [0], [0]>} : vector<2x8x8xbf16>, vector<2x8x8xbf16>, vector<2x8x8xf32> -> vector<2x8x8xf32>
    "tpu.trace_stop"() : () -> ()
    %cst_99 = arith.constant 0.353553385 : f32
    %244 = vector.broadcast %cst_99 : f32 to vector<2x8x8xf32>
    %245 = arith.mulf %243, %244 : vector<2x8x8xf32>
    %cst_100 = arith.constant dense<0xFF800000> : vector<2x8xf32>
    %246 = vector.multi_reduction <maximumf>, %245, %cst_100 [2] : vector<2x8x8xf32> to vector<2x8xf32>
    %247 = vector.shape_cast %246 : vector<2x8xf32> to vector<2x8x1xf32>
    %248 = vector.broadcast %247 : vector<2x8x1xf32> to vector<2x8x8xf32>
    %249 = arith.subf %245, %248 : vector<2x8x8xf32>
    %250 = math.exp %249 : vector<2x8x8xf32>
    %cst_101 = arith.constant dense<0.000000e+00> : vector<2x8xf32>
    %251 = vector.multi_reduction <add>, %250, %cst_101 [2] : vector<2x8x8xf32> to vector<2x8xf32>
    %252 = vector.shape_cast %251 : vector<2x8xf32> to vector<2x8x1xf32>
    %253 = tpu.reciprocal %252 {approx = true} : vector<2x8x1xf32> -> vector<2x8x1xf32>
    %254 = vector.broadcast %253 : vector<2x8x1xf32> to vector<2x8x8xf32>
    %255 = arith.mulf %250, %254 : vector<2x8x8xf32>
    %256 = arith.truncf %255 : vector<2x8x8xf32> to vector<2x8x8xbf16>
    "tpu.trace_start"() <{level = 10 : i32, message = "bqk,bkd->bqd"}> : () -> ()
    %cst_102 = arith.constant dense<0.000000e+00> : vector<2x8x8xf32>
    %257 = tpu.matmul %256, %242, %cst_102 {dimension_numbers = #tpu.dot_dimension_numbers<[2], [1], [1], [2], [0, 0, 0, 1, 1, 2], [0], [0]>} : vector<2x8x8xbf16>, vector<2x8x8xbf16>, vector<2x8x8xf32> -> vector<2x8x8xf32>
    "tpu.trace_stop"() : () -> ()
    %258 = vector.shape_cast %257 : vector<2x8x8xf32> to vector<16x8xf32>
    %259 = arith.truncf %258 : vector<16x8xf32> to vector<16x8xbf16>
    %260 = vector.extract_strided_slice %215 {offsets = [8, 0], sizes = [8, 32], strides = [1, 1]} : vector<32x32xbf16> to vector<8x32xbf16>
    %cst_103 = arith.constant dense<0.000000e+00> : vector<16x32xf32>
    %261 = tpu.matmul %259, %260, %cst_103 {dimension_numbers = #tpu.dot_dimension_numbers<[1], [0], [0], [1], [0, 0, 1, 1], [], []>} : vector<16x8xbf16>, vector<8x32xbf16>, vector<16x32xf32> -> vector<16x32xf32>
    %262 = arith.addf %239, %261 : vector<16x32xf32>
    %263 = vector.extract_strided_slice %207 {offsets = [0, 0, 16], sizes = [2, 8, 8], strides = [1, 1, 1]} : vector<2x8x32xbf16> to vector<2x8x8xbf16>
    %264 = vector.extract_strided_slice %210 {offsets = [0, 0, 16], sizes = [2, 8, 8], strides = [1, 1, 1]} : vector<2x8x32xbf16> to vector<2x8x8xbf16>
    %265 = vector.extract_strided_slice %213 {offsets = [0, 0, 16], sizes = [2, 8, 8], strides = [1, 1, 1]} : vector<2x8x32xbf16> to vector<2x8x8xbf16>
    "tpu.trace_start"() <{level = 10 : i32, message = "bqd,bkd->bqk"}> : () -> ()
    %cst_104 = arith.constant dense<0.000000e+00> : vector<2x8x8xf32>
    %266 = tpu.matmul %263, %264, %cst_104 {dimension_numbers = #tpu.dot_dimension_numbers<[2], [2], [1], [1], [0, 0, 0, 1, 1, 1], [0], [0]>} : vector<2x8x8xbf16>, vector<2x8x8xbf16>, vector<2x8x8xf32> -> vector<2x8x8xf32>
    "tpu.trace_stop"() : () -> ()
    %cst_105 = arith.constant 0.353553385 : f32
    %267 = vector.broadcast %cst_105 : f32 to vector<2x8x8xf32>
    %268 = arith.mulf %266, %267 : vector<2x8x8xf32>
    %cst_106 = arith.constant dense<0xFF800000> : vector<2x8xf32>
    %269 = vector.multi_reduction <maximumf>, %268, %cst_106 [2] : vector<2x8x8xf32> to vector<2x8xf32>
    %270 = vector.shape_cast %269 : vector<2x8xf32> to vector<2x8x1xf32>
    %271 = vector.broadcast %270 : vector<2x8x1xf32> to vector<2x8x8xf32>
    %272 = arith.subf %268, %271 : vector<2x8x8xf32>
    %273 = math.exp %272 : vector<2x8x8xf32>
    %cst_107 = arith.constant dense<0.000000e+00> : vector<2x8xf32>
    %274 = vector.multi_reduction <add>, %273, %cst_107 [2] : vector<2x8x8xf32> to vector<2x8xf32>
    %275 = vector.shape_cast %274 : vector<2x8xf32> to vector<2x8x1xf32>
    %276 = tpu.reciprocal %275 {approx = true} : vector<2x8x1xf32> -> vector<2x8x1xf32>
    %277 = vector.broadcast %276 : vector<2x8x1xf32> to vector<2x8x8xf32>
    %278 = arith.mulf %273, %277 : vector<2x8x8xf32>
    %279 = arith.truncf %278 : vector<2x8x8xf32> to vector<2x8x8xbf16>
    "tpu.trace_start"() <{level = 10 : i32, message = "bqk,bkd->bqd"}> : () -> ()
    %cst_108 = arith.constant dense<0.000000e+00> : vector<2x8x8xf32>
    %280 = tpu.matmul %279, %265, %cst_108 {dimension_numbers = #tpu.dot_dimension_numbers<[2], [1], [1], [2], [0, 0, 0, 1, 1, 2], [0], [0]>} : vector<2x8x8xbf16>, vector<2x8x8xbf16>, vector<2x8x8xf32> -> vector<2x8x8xf32>
    "tpu.trace_stop"() : () -> ()
    %281 = vector.shape_cast %280 : vector<2x8x8xf32> to vector<16x8xf32>
    %282 = arith.truncf %281 : vector<16x8xf32> to vector<16x8xbf16>
    %283 = vector.extract_strided_slice %215 {offsets = [16, 0], sizes = [8, 32], strides = [1, 1]} : vector<32x32xbf16> to vector<8x32xbf16>
    %cst_109 = arith.constant dense<0.000000e+00> : vector<16x32xf32>
    %284 = tpu.matmul %282, %283, %cst_109 {dimension_numbers = #tpu.dot_dimension_numbers<[1], [0], [0], [1], [0, 0, 1, 1], [], []>} : vector<16x8xbf16>, vector<8x32xbf16>, vector<16x32xf32> -> vector<16x32xf32>
    %285 = arith.addf %262, %284 : vector<16x32xf32>
    %286 = vector.extract_strided_slice %207 {offsets = [0, 0, 24], sizes = [2, 8, 8], strides = [1, 1, 1]} : vector<2x8x32xbf16> to vector<2x8x8xbf16>
    %287 = vector.extract_strided_slice %210 {offsets = [0, 0, 24], sizes = [2, 8, 8], strides = [1, 1, 1]} : vector<2x8x32xbf16> to vector<2x8x8xbf16>
    %288 = vector.extract_strided_slice %213 {offsets = [0, 0, 24], sizes = [2, 8, 8], strides = [1, 1, 1]} : vector<2x8x32xbf16> to vector<2x8x8xbf16>
    "tpu.trace_start"() <{level = 10 : i32, message = "bqd,bkd->bqk"}> : () -> ()
    %cst_110 = arith.constant dense<0.000000e+00> : vector<2x8x8xf32>
    %289 = tpu.matmul %286, %287, %cst_110 {dimension_numbers = #tpu.dot_dimension_numbers<[2], [2], [1], [1], [0, 0, 0, 1, 1, 1], [0], [0]>} : vector<2x8x8xbf16>, vector<2x8x8xbf16>, vector<2x8x8xf32> -> vector<2x8x8xf32>
    "tpu.trace_stop"() : () -> ()
    %cst_111 = arith.constant 0.353553385 : f32
    %290 = vector.broadcast %cst_111 : f32 to vector<2x8x8xf32>
    %291 = arith.mulf %289, %290 : vector<2x8x8xf32>
    %cst_112 = arith.constant dense<0xFF800000> : vector<2x8xf32>
    %292 = vector.multi_reduction <maximumf>, %291, %cst_112 [2] : vector<2x8x8xf32> to vector<2x8xf32>
    %293 = vector.shape_cast %292 : vector<2x8xf32> to vector<2x8x1xf32>
    %294 = vector.broadcast %293 : vector<2x8x1xf32> to vector<2x8x8xf32>
    %295 = arith.subf %291, %294 : vector<2x8x8xf32>
    %296 = math.exp %295 : vector<2x8x8xf32>
    %cst_113 = arith.constant dense<0.000000e+00> : vector<2x8xf32>
    %297 = vector.multi_reduction <add>, %296, %cst_113 [2] : vector<2x8x8xf32> to vector<2x8xf32>
    %298 = vector.shape_cast %297 : vector<2x8xf32> to vector<2x8x1xf32>
    %299 = tpu.reciprocal %298 {approx = true} : vector<2x8x1xf32> -> vector<2x8x1xf32>
    %300 = vector.broadcast %299 : vector<2x8x1xf32> to vector<2x8x8xf32>
    %301 = arith.mulf %296, %300 : vector<2x8x8xf32>
    %302 = arith.truncf %301 : vector<2x8x8xf32> to vector<2x8x8xbf16>
    "tpu.trace_start"() <{level = 10 : i32, message = "bqk,bkd->bqd"}> : () -> ()
    %cst_114 = arith.constant dense<0.000000e+00> : vector<2x8x8xf32>
    %303 = tpu.matmul %302, %288, %cst_114 {dimension_numbers = #tpu.dot_dimension_numbers<[2], [1], [1], [2], [0, 0, 0, 1, 1, 2], [0], [0]>} : vector<2x8x8xbf16>, vector<2x8x8xbf16>, vector<2x8x8xf32> -> vector<2x8x8xf32>
    "tpu.trace_stop"() : () -> ()
    %304 = vector.shape_cast %303 : vector<2x8x8xf32> to vector<16x8xf32>
    %305 = arith.truncf %304 : vector<16x8xf32> to vector<16x8xbf16>
    %306 = vector.extract_strided_slice %215 {offsets = [24, 0], sizes = [8, 32], strides = [1, 1]} : vector<32x32xbf16> to vector<8x32xbf16>
    %cst_115 = arith.constant dense<0.000000e+00> : vector<16x32xf32>
    %307 = tpu.matmul %305, %306, %cst_115 {dimension_numbers = #tpu.dot_dimension_numbers<[1], [0], [0], [1], [0, 0, 1, 1], [], []>} : vector<16x8xbf16>, vector<8x32xbf16>, vector<16x32xf32> -> vector<16x32xf32>
    %308 = arith.addf %285, %307 : vector<16x32xf32>
    %c1_116 = arith.constant 1 : index
    %c0_117 = arith.constant 0 : index
    %c0_118 = arith.constant 0 : index
    %309 = vector.load %arg8[%c1_116, %c0_117, %c0_118] : memref<2x1x32xf32, #tpu.memory_space<vmem>>, vector<1x1x32xf32>
    %310 = vector.shape_cast %309 : vector<1x1x32xf32> to vector<1x32xf32>
    %311 = vector.broadcast %310 : vector<1x32xf32> to vector<16x32xf32>
    %312 = arith.addf %308, %311 : vector<16x32xf32>
    %313 = arith.addf %196, %312 : vector<16x32xf32>
    %c1_119 = arith.constant 1 : index
    %c0_120 = arith.constant 0 : index
    %c0_121 = arith.constant 0 : index
    %314 = vector.load %arg9[%c1_119, %c0_120, %c0_121] : memref<2x1x32xf32, #tpu.memory_space<vmem>>, vector<1x1x32xf32>
    %315 = vector.shape_cast %314 : vector<1x1x32xf32> to vector<1x32xf32>
    %c1_122 = arith.constant 1 : index
    %c0_123 = arith.constant 0 : index
    %c0_124 = arith.constant 0 : index
    %316 = vector.load %arg10[%c1_122, %c0_123, %c0_124] : memref<2x1x32xf32, #tpu.memory_space<vmem>>, vector<1x1x32xf32>
    %317 = vector.shape_cast %316 : vector<1x1x32xf32> to vector<1x32xf32>
    %cst_125 = arith.constant dense<0.000000e+00> : vector<16xf32>
    %318 = vector.multi_reduction <add>, %313, %cst_125 [1] : vector<16x32xf32> to vector<16xf32>
    %319 = vector.shape_cast %318 : vector<16xf32> to vector<16x1xf32>
    %cst_126 = arith.constant 3.200000e+01 : f32
    %320 = vector.broadcast %cst_126 : f32 to vector<16x1xf32>
    %321 = arith.divf %319, %320 : vector<16x1xf32>
    %322 = vector.broadcast %321 : vector<16x1xf32> to vector<16x32xf32>
    %323 = arith.subf %313, %322 : vector<16x32xf32>
    %324 = arith.mulf %323, %323 : vector<16x32xf32>
    %cst_127 = arith.constant dense<0.000000e+00> : vector<16xf32>
    %325 = vector.multi_reduction <add>, %324, %cst_127 [1] : vector<16x32xf32> to vector<16xf32>
    %326 = vector.shape_cast %325 : vector<16xf32> to vector<16x1xf32>
    %cst_128 = arith.constant 3.200000e+01 : f32
    %327 = vector.broadcast %cst_128 : f32 to vector<16x1xf32>
    %328 = arith.divf %326, %327 : vector<16x1xf32>
    %329 = vector.broadcast %321 : vector<16x1xf32> to vector<16x32xf32>
    %330 = arith.subf %313, %329 : vector<16x32xf32>
    %cst_129 = arith.constant 9.99999974E-6 : f32
    %331 = vector.broadcast %cst_129 : f32 to vector<16x1xf32>
    %332 = arith.addf %328, %331 : vector<16x1xf32>
    %333 = math.rsqrt %332 : vector<16x1xf32>
    %334 = vector.broadcast %333 : vector<16x1xf32> to vector<16x32xf32>
    %335 = arith.mulf %330, %334 : vector<16x32xf32>
    %336 = vector.broadcast %315 : vector<1x32xf32> to vector<16x32xf32>
    %337 = arith.mulf %335, %336 : vector<16x32xf32>
    %338 = vector.broadcast %317 : vector<1x32xf32> to vector<16x32xf32>
    %339 = arith.addf %337, %338 : vector<16x32xf32>
    %340 = arith.truncf %339 : vector<16x32xf32> to vector<16x32xbf16>
    %c1_130 = arith.constant 1 : index
    %c0_131 = arith.constant 0 : index
    %c0_132 = arith.constant 0 : index
    %341 = vector.load %arg11[%c1_130, %c0_131, %c0_132] : memref<2x32x2048xbf16, #tpu.memory_space<vmem>>, vector<1x32x2048xbf16>
    %342 = vector.shape_cast %341 : vector<1x32x2048xbf16> to vector<32x2048xbf16>
    %cst_133 = arith.constant dense<0.000000e+00> : vector<16x2048xf32>
    %343 = tpu.matmul %340, %342, %cst_133 {dimension_numbers = #tpu.dot_dimension_numbers<[1], [0], [0], [1], [0, 0, 1, 1], [], []>} : vector<16x32xbf16>, vector<32x2048xbf16>, vector<16x2048xf32> -> vector<16x2048xf32>
    %c1_134 = arith.constant 1 : index
    %c0_135 = arith.constant 0 : index
    %c0_136 = arith.constant 0 : index
    %344 = vector.load %arg12[%c1_134, %c0_135, %c0_136] : memref<2x1x2048xf32, #tpu.memory_space<vmem>>, vector<1x1x2048xf32>
    %345 = vector.shape_cast %344 : vector<1x1x2048xf32> to vector<1x2048xf32>
    %346 = vector.broadcast %345 : vector<1x2048xf32> to vector<16x2048xf32>
    %347 = arith.addf %343, %346 : vector<16x2048xf32>
    %cst_137 = arith.constant 0.000000e+00 : f32
    %348 = vector.broadcast %cst_137 : f32 to vector<16x2048xf32>
    %349 = arith.maximumf %347, %348 : vector<16x2048xf32>
    %350 = arith.truncf %349 : vector<16x2048xf32> to vector<16x2048xbf16>
    %c1_138 = arith.constant 1 : index
    %c0_139 = arith.constant 0 : index
    %c0_140 = arith.constant 0 : index
    %351 = vector.load %arg13[%c1_138, %c0_139, %c0_140] : memref<2x2048x32xbf16, #tpu.memory_space<vmem>>, vector<1x2048x32xbf16>
    %352 = vector.shape_cast %351 : vector<1x2048x32xbf16> to vector<2048x32xbf16>
    %cst_141 = arith.constant dense<0.000000e+00> : vector<16x32xf32>
    %353 = tpu.matmul %350, %352, %cst_141 {dimension_numbers = #tpu.dot_dimension_numbers<[1], [0], [0], [1], [0, 0, 1, 1], [], []>} : vector<16x2048xbf16>, vector<2048x32xbf16>, vector<16x32xf32> -> vector<16x32xf32>
    %c1_142 = arith.constant 1 : index
    %c0_143 = arith.constant 0 : index
    %c0_144 = arith.constant 0 : index
    %354 = vector.load %arg14[%c1_142, %c0_143, %c0_144] : memref<2x1x32xf32, #tpu.memory_space<vmem>>, vector<1x1x32xf32>
    %355 = vector.shape_cast %354 : vector<1x1x32xf32> to vector<1x32xf32>
    %356 = vector.broadcast %355 : vector<1x32xf32> to vector<16x32xf32>
    %357 = arith.addf %353, %356 : vector<16x32xf32>
    %358 = arith.addf %339, %357 : vector<16x32xf32>
    %c1_145 = arith.constant 1 : index
    %c0_146 = arith.constant 0 : index
    %c0_147 = arith.constant 0 : index
    %359 = vector.load %arg15[%c1_145, %c0_146, %c0_147] : memref<2x1x32xf32, #tpu.memory_space<vmem>>, vector<1x1x32xf32>
    %360 = vector.shape_cast %359 : vector<1x1x32xf32> to vector<1x32xf32>
    %c1_148 = arith.constant 1 : index
    %c0_149 = arith.constant 0 : index
    %c0_150 = arith.constant 0 : index
    %361 = vector.load %arg16[%c1_148, %c0_149, %c0_150] : memref<2x1x32xf32, #tpu.memory_space<vmem>>, vector<1x1x32xf32>
    %362 = vector.shape_cast %361 : vector<1x1x32xf32> to vector<1x32xf32>
    %cst_151 = arith.constant dense<0.000000e+00> : vector<16xf32>
    %363 = vector.multi_reduction <add>, %358, %cst_151 [1] : vector<16x32xf32> to vector<16xf32>
    %364 = vector.shape_cast %363 : vector<16xf32> to vector<16x1xf32>
    %cst_152 = arith.constant 3.200000e+01 : f32
    %365 = vector.broadcast %cst_152 : f32 to vector<16x1xf32>
    %366 = arith.divf %364, %365 : vector<16x1xf32>
    %367 = vector.broadcast %366 : vector<16x1xf32> to vector<16x32xf32>
    %368 = arith.subf %358, %367 : vector<16x32xf32>
    %369 = arith.mulf %368, %368 : vector<16x32xf32>
    %cst_153 = arith.constant dense<0.000000e+00> : vector<16xf32>
    %370 = vector.multi_reduction <add>, %369, %cst_153 [1] : vector<16x32xf32> to vector<16xf32>
    %371 = vector.shape_cast %370 : vector<16xf32> to vector<16x1xf32>
    %cst_154 = arith.constant 3.200000e+01 : f32
    %372 = vector.broadcast %cst_154 : f32 to vector<16x1xf32>
    %373 = arith.divf %371, %372 : vector<16x1xf32>
    %374 = vector.broadcast %366 : vector<16x1xf32> to vector<16x32xf32>
    %375 = arith.subf %358, %374 : vector<16x32xf32>
    %cst_155 = arith.constant 9.99999974E-6 : f32
    %376 = vector.broadcast %cst_155 : f32 to vector<16x1xf32>
    %377 = arith.addf %373, %376 : vector<16x1xf32>
    %378 = math.rsqrt %377 : vector<16x1xf32>
    %379 = vector.broadcast %378 : vector<16x1xf32> to vector<16x32xf32>
    %380 = arith.mulf %375, %379 : vector<16x32xf32>
    %381 = vector.broadcast %360 : vector<1x32xf32> to vector<16x32xf32>
    %382 = arith.mulf %380, %381 : vector<16x32xf32>
    %383 = vector.broadcast %362 : vector<1x32xf32> to vector<16x32xf32>
    %384 = arith.addf %382, %383 : vector<16x32xf32>
    %385 = vector.shape_cast %384 : vector<16x32xf32> to vector<2x8x32xf32>
    %386 = vector.extract_strided_slice %385 {offsets = [0, 7, 0], sizes = [2, 1, 32], strides = [1, 1, 1]} : vector<2x8x32xf32> to vector<2x1x32xf32>
    %387 = vector.shape_cast %386 : vector<2x1x32xf32> to vector<2x32xf32>
    %c0_156 = arith.constant 0 : index
    %c0_157 = arith.constant 0 : index
    %388 = vector.load %arg17[%c0_156, %c0_157] : memref<32x1xf32, #tpu.memory_space<vmem>>, vector<32x1xf32>
    %cst_158 = arith.constant dense<0.000000e+00> : vector<2x1xf32>
    %389 = tpu.matmul %387, %388, %cst_158 {dimension_numbers = #tpu.dot_dimension_numbers<[1], [0], [0], [1], [0, 0, 1, 1], [], []>} : vector<2x32xf32>, vector<32x1xf32>, vector<2x1xf32> -> vector<2x1xf32>
    %c0_159 = arith.constant 0 : index
    %c0_160 = arith.constant 0 : index
    %390 = vector.load %arg18[%c0_159, %c0_160] : memref<1x1xf32, #tpu.memory_space<vmem>>, vector<1x1xf32>
    %391 = vector.broadcast %390 : vector<1x1xf32> to vector<2x1xf32>
    %392 = arith.addf %389, %391 : vector<2x1xf32>
    %c0_161 = arith.constant 0 : index
    %c0_162 = arith.constant 0 : index
    %393 = vector.load %arg19[%c0_161, %c0_162] : memref<2x1xf32, #tpu.memory_space<vmem>>, vector<2x1xf32>
    tpu.vector_store %arg19[%c0_161, %c0_162], %392 {strides = array<i32>} : memref<2x1xf32, #tpu.memory_space<vmem>>, vector<2x1xf32>,
    return
  }
  func.func @transform_0(%arg0: i32) -> (i32, i32) {
    %c0_i32 = arith.constant 0 : i32
    %c0_i32_0 = arith.constant 0 : i32
    return %arg0, %c0_i32 : i32, i32
  }
  func.func @transform_1(%arg0: i32) -> (i32, i32) {
    %c0_i32 = arith.constant 0 : i32
    %c0_i32_0 = arith.constant 0 : i32
    %c0_i32_1 = arith.constant 0 : i32
    return %c0_i32, %c0_i32_0 : i32, i32
  }
  func.func @transform_2(%arg0: i32) -> (i32, i32) {
    %c0_i32 = arith.constant 0 : i32
    %c0_i32_0 = arith.constant 0 : i32
    %c0_i32_1 = arith.constant 0 : i32
    return %c0_i32, %c0_i32_0 : i32, i32
  }
  func.func @transform_3(%arg0: i32) -> (i32, i32) {
    %c0_i32 = arith.constant 0 : i32
    %c0_i32_0 = arith.constant 0 : i32
    %c0_i32_1 = arith.constant 0 : i32
    return %c0_i32, %c0_i32_0 : i32, i32
  }
  func.func @transform_4(%arg0: i32) -> (i32, i32, i32) {
    %c0_i32 = arith.constant 0 : i32
    %c0_i32_0 = arith.constant 0 : i32
    %c0_i32_1 = arith.constant 0 : i32
    %c0_i32_2 = arith.constant 0 : i32
    return %c0_i32, %c0_i32_0, %c0_i32_1 : i32, i32, i32
  }
  func.func @transform_5(%arg0: i32) -> (i32, i32, i32) {
    %c0_i32 = arith.constant 0 : i32
    %c0_i32_0 = arith.constant 0 : i32
    %c0_i32_1 = arith.constant 0 : i32
    %c0_i32_2 = arith.constant 0 : i32
    return %c0_i32, %c0_i32_0, %c0_i32_1 : i32, i32, i32
  }
  func.func @transform_6(%arg0: i32) -> (i32, i32, i32) {
    %c0_i32 = arith.constant 0 : i32
    %c0_i32_0 = arith.constant 0 : i32
    %c0_i32_1 = arith.constant 0 : i32
    %c0_i32_2 = arith.constant 0 : i32
    return %c0_i32, %c0_i32_0, %c0_i32_1 : i32, i32, i32
  }
  func.func @transform_7(%arg0: i32) -> (i32, i32, i32) {
    %c0_i32 = arith.constant 0 : i32
    %c0_i32_0 = arith.constant 0 : i32
    %c0_i32_1 = arith.constant 0 : i32
    %c0_i32_2 = arith.constant 0 : i32
    return %c0_i32, %c0_i32_0, %c0_i32_1 : i32, i32, i32
  }
  func.func @transform_8(%arg0: i32) -> (i32, i32, i32) {
    %c0_i32 = arith.constant 0 : i32
    %c0_i32_0 = arith.constant 0 : i32
    %c0_i32_1 = arith.constant 0 : i32
    %c0_i32_2 = arith.constant 0 : i32
    return %c0_i32, %c0_i32_0, %c0_i32_1 : i32, i32, i32
  }
  func.func @transform_9(%arg0: i32) -> (i32, i32, i32) {
    %c0_i32 = arith.constant 0 : i32
    %c0_i32_0 = arith.constant 0 : i32
    %c0_i32_1 = arith.constant 0 : i32
    %c0_i32_2 = arith.constant 0 : i32
    return %c0_i32, %c0_i32_0, %c0_i32_1 : i32, i32, i32
  }
  func.func @transform_10(%arg0: i32) -> (i32, i32, i32) {
    %c0_i32 = arith.constant 0 : i32
    %c0_i32_0 = arith.constant 0 : i32
    %c0_i32_1 = arith.constant 0 : i32
    %c0_i32_2 = arith.constant 0 : i32
    return %c0_i32, %c0_i32_0, %c0_i32_1 : i32, i32, i32
  }
  func.func @transform_11(%arg0: i32) -> (i32, i32, i32) {
    %c0_i32 = arith.constant 0 : i32
    %c0_i32_0 = arith.constant 0 : i32
    %c0_i32_1 = arith.constant 0 : i32
    %c0_i32_2 = arith.constant 0 : i32
    return %c0_i32, %c0_i32_0, %c0_i32_1 : i32, i32, i32
  }
  func.func @transform_12(%arg0: i32) -> (i32, i32, i32) {
    %c0_i32 = arith.constant 0 : i32
    %c0_i32_0 = arith.constant 0 : i32
    %c0_i32_1 = arith.constant 0 : i32
    %c0_i32_2 = arith.constant 0 : i32
    return %c0_i32, %c0_i32_0, %c0_i32_1 : i32, i32, i32
  }
  func.func @transform_13(%arg0: i32) -> (i32, i32, i32) {
    %c0_i32 = arith.constant 0 : i32
    %c0_i32_0 = arith.constant 0 : i32
    %c0_i32_1 = arith.constant 0 : i32
    %c0_i32_2 = arith.constant 0 : i32
    return %c0_i32, %c0_i32_0, %c0_i32_1 : i32, i32, i32
  }
  func.func @transform_14(%arg0: i32) -> (i32, i32, i32) {
    %c0_i32 = arith.constant 0 : i32
    %c0_i32_0 = arith.constant 0 : i32
    %c0_i32_1 = arith.constant 0 : i32
    %c0_i32_2 = arith.constant 0 : i32
    return %c0_i32, %c0_i32_0, %c0_i32_1 : i32, i32, i32
  }
  func.func @transform_15(%arg0: i32) -> (i32, i32, i32) {
    %c0_i32 = arith.constant 0 : i32
    %c0_i32_0 = arith.constant 0 : i32
    %c0_i32_1 = arith.constant 0 : i32
    %c0_i32_2 = arith.constant 0 : i32
    return %c0_i32, %c0_i32_0, %c0_i32_1 : i32, i32, i32
  }
  func.func @transform_16(%arg0: i32) -> (i32, i32) {
    %c0_i32 = arith.constant 0 : i32
    %c0_i32_0 = arith.constant 0 : i32
    %c0_i32_1 = arith.constant 0 : i32
    return %c0_i32, %c0_i32_0 : i32, i32
  }
  func.func @transform_17(%arg0: i32) -> (i32, i32) {
    %c0_i32 = arith.constant 0 : i32
    %c0_i32_0 = arith.constant 0 : i32
    %c0_i32_1 = arith.constant 0 : i32
    return %c0_i32, %c0_i32_0 : i32, i32
  }
  func.func @transform_18(%arg0: i32) -> (i32, i32) {
    %c0_i32 = arith.constant 0 : i32
    %c0_i32_0 = arith.constant 0 : i32
    return %arg0, %c0_i32 : i32, i32
  }
}

</mosaic_0001>

<bundles_post_ra>
// kernel: tpu_custom_call.1
= control target key start
LH: loop header
LB: loop body
LE: loop exit
PB: predicated region body
PF: predicated region fallthrough
CT: control target
= control target key end

     0   :  { %vm77_vm0 = vcmask 1041408   ;;  %v8602_v0 = vmov 0.0   ;;  %vm8603_vm1 = vmmov 0   ;;  %vm73_vm2 = vcmask 31744   ;;  %s8607_s20 = smov 120   ;;  %s8608_s21 = smov 56   ;;  %s10461_s2 = inlined_call_operand.vmem [shape: bf16[4,32], index: 2, kind: input, shape index: {}]   ;;  %s10462_s0 = inlined_call_operand.vmem [shape: f32[16,4], index: 0, kind: input, shape index: {}]   ;;  %s10463_s4 = inlined_call_operand.vmem [shape: bf16[2,32,96], index: 4, kind: input, shape index: {}]   ;;  %s10464_s3 = inlined_call_operand.vmem [shape: f32[1,32], index: 3, kind: input, shape index: {}]   ;;  %s10465_s1 = inlined_call_operand.vmem [shape: f32[16,32], index: 1, kind: input, shape index: {}]   ;;  %s10466_s5 = inlined_call_operand.vmem [shape: f32[2,1,96], index: 5, kind: input, shape index: {}]   ;;  %s10467_s6 = inlined_call_operand.vmem [shape: bf16[2,32,32], index: 6, kind: input, shape index: {}]   ;;  %s10468_s7 = inlined_call_operand.vmem [shape: f32[2,1,32], index: 7, kind: input, shape index: {}]   ;;  %s10469_s10 = inlined_call_operand.vmem [shape: bf16[2,32,2048], index: 10, kind: input, shape index: {}]   ;;  %s10470_s12 = inlined_call_operand.vmem [shape: bf16[2,2048,32], index: 12, kind: input, shape index: {}]   ;;  %s10471_s8 = inlined_call_operand.vmem [shape: f32[2,1,32], index: 8, kind: input, shape index: {}]   ;;  %s10472_s9 = inlined_call_operand.vmem [shape: f32[2,1,32], index: 9, kind: input, shape index: {}]   ;;  %s10473_s11 = inlined_call_operand.vmem [shape: f32[2,1,2048], index: 11, kind: input, shape index: {}]   ;;  %s10474_s13 = inlined_call_operand.vmem [shape: f32[2,1,32], index: 13, kind: input, shape index: {}]   ;;  %s10475_s14 = inlined_call_operand.vmem [shape: f32[2,1,32], index: 14, kind: input, shape index: {}]   ;;  %s10476_s15 = inlined_call_operand.vmem [shape: f32[2,1,32], index: 15, kind: input, shape index: {}]   ;;  %s10477_s16 = inlined_call_operand.vmem [shape: f32[32,1], index: 16, kind: input, shape index: {}]   ;;  %s10478_s17 = inlined_call_operand.<no memory space> [shape: f32[1,1], index: 17, kind: input, shape index: {}]   ;;  %s10479_s18 = inlined_call_operand.vmem [shape: f32[2,1], index: 18, kind: output, shape index: {}]  }
   0x1   :  { %10492 = sst [smem:[#allocation3_spill]] %s10461_s2  ;;  %7975 = vmatprep.subr.bf16.mxu0 %v8602_v0  ;;  %7977 = vmatprep.mubr.msk.bf16.mxu0 %vm8603_vm1, %v8602_v0  ;;  %v6817_v8 = vld [vmem:[%s10464_s3] ss:$0 sm:$0xff]  ;;  %v123_v14 = vld [vmem:[%s10465_s1 + $0x8] sm:$0xff]  ;;  %vm150_vm3 = vcmask 261120   ;;  %vm207_vm4 = vcmask 64512  }
   0x2   :  { %10493 = sst [smem:[#allocation4_spill]] %s10462_s0  ;;  %7981 = vmatprep.subr.bf16.mxu1 %v8602_v0  ;;  %7985 = vmatprep.mubr.msk.bf16.mxu1 %vm8603_vm1, %v8602_v0  ;;  %v122_v12 = vld [vmem:[%s10465_s1] sm:$0xff]  ;;  %s8604_s1 = smov 96   ;;  %vm333_vm5 = vcmask 1043456   ;;  %vm6737_vm6 = vcmask 1041409   ;;  %vm6811_vm7 = vcmask 1024  }
   0x3   :  { %10494 = sst [smem:[#allocation5_spill]] %s10463_s4  ;;  %v6819_v20 = vld [vmem:[%s10466_s5] ss:$0 sm:$0xff]  ;;  %s8606_s0 = smov 88  }
   0x4   :  { %s10495_s29 = sld [smem:[#allocation3_spill]]  ;;  %s10490_s22 = smov 112  }
   0x5   :  { %s10496_s19 = sld [smem:[#allocation4_spill]]  ;;  %s8610_s23 = smov 80  }
   0x6   :  { %s10497_s4 = sld [smem:[#allocation5_spill]]  ;;  %s10488_s28 = smov 48  }
   0x7   :  { %s10484_s30 = smov 104   ;;  %s10482_s24 = smov 40  }
   0x8   :  { %s10501_s3 = smov 104  }
   0xa   :  { %v65_v1 = vld [vmem:[%s10495_s29] sm:$0x3]  ;;  %s10486_s29 = smov 72  }
   0xb   :  { %v62_v2 = vld [vmem:[%s10496_s19] sm:$0xff]  ;;  %v63_v3 = vld [vmem:[%s10496_s19 + $0x8] sm:$0xff]  ;;  %v79_v4 = vsel %vm77_vm0, %v65_v1, 0  ;;  %s8605_s19 = smov 64  }
   0xc   :  { %v64_v5 = vpack.c.bf16 %v63_v3, %v62_v2  ;;  %7976 = vmatpush3.bf16.msra.mxu0 %v79_v4  ;;  %v8262_v6 = vld [vmem:[%s10497_s4 + $0x8] sm:$0xff]   ;;  %v8263_v7 = vld [vmem:[%s10497_s4] sm:$0xff]  }
   0xd   :  { %7989 = vmatprep.subr.bf16.mxu0 %v8602_v0  ;;  %7982 = vmatpush3.bf16.msra.mxu1 %v8262_v6 }
   0xe   :  { %7983 = vmatprep.subr.bf16.mxu1 %v8602_v0 }
   0xf   :  { %7978 = vmatmul.mubr.msk.bf16.vlgmr.msra.gmra.mxu0 %vm73_vm2, %v64_v5 }
  0x10   :  { %7991 = vmatprep.mubr.msk.bf16.mxu0 %vm8603_vm1, %v8602_v0 }
  0x11   :  { %7984 = vmatpush3.bf16.msra.mxu1 %v8263_v7 }
  0x12   :  { %7995 = vmatprep.subr.bf16.mxu1 %v8602_v0 }
  0xcf   :  { %v115_v9 = vpop.f32.mrf.mxu0 }
  0xd0   :  { %v116_v11 = vadd.f32 %v6817_v8, %v115_v9 }
  0xd1   :  { %v7979_v10 = vpop.f32.mrf.mxu0 }
  0xd2   :  { %v8746_v17 = vadd.f32 %v122_v12, %v116_v11 }
  0xd3   :  { %v118_v13 = vpop.f32.mrf.mxu0 }
  0xd4   :  { %v119_v15 = vadd.f32 %v6817_v8, %v118_v13 }
  0xd5   :  { %v7980_v16 = vpop.f32.mrf.mxu0 }
  0xd6   :  { %v8748_v18 = vadd.f32 %v123_v14, %v119_v15 }
  0xd8   :  { %v126_v19 = vpack.c.bf16 %v8748_v18, %v8746_v17 }
  0xda   :  { %7986 = vmatmul.mubr.msk.bf16.vlgmr.msra.gmra.mxu1 %vm150_vm3, %v126_v19 }
  0xdb   :  { %7997 = vmatprep.mubr.msk.bf16.mxu1 %vm8603_vm1, %v8602_v0 }
 0x19a   :  { %v188_v21 = vpop.f32.mrf.mxu1 }
 0x19b   :  { %v189_v22 = vadd.f32 %v6819_v20, %v188_v21 }
 0x19c   :  { %v7987_v23 = vpop.f32.mrf.mxu1 }
 0x19d   :  { %v8758_v24 = vpack.c.bf16 %v189_v22, %v189_v22 }
 0x19e   :  { %v191_v25 = vpop.f32.mrf.mxu1 }
 0x19f   :  { %v192_v26 = vadd.f32 %v6819_v20, %v191_v25  ;;  %205 = vrot.lane.b32.xlu0 %v8758_v24, %s8604_s1 }
 0x1a0   :  { %v7988_v27 = vpop.f32.mrf.mxu1 }
 0x1a1   :  { %v8762_v28 = vpack.c.bf16 %v192_v26, %v192_v26 }
 0x1a3   :  { %254 = vrot.lane.b32.xlu0 %v8762_v28, %s8604_s1 }
 0x211   :  { %v206_v29 = vpop.permute.xlu0 %205 }
 0x212   :  { %v212_v30 = vsel %vm207_vm4, %v206_v29, 0 }
 0x213   :  { %7990 = vmatpush3.bf16.xpose.msra.mxu0 %v212_v30 }
 0x214   :  { %8001 = vmatprep.subr.bf16.mxu0 %v8602_v0 }
 0x215   :  { %v255_v31 = vpop.permute.xlu0 %254 }
 0x216   :  { %v260_v32 = vsel %vm207_vm4, %v255_v31, 0 }
 0x217   :  { %7996 = vmatpush3.bf16.xpose.msra.mxu1 %v260_v32 }
 0x218   :  { %8007 = vmatprep.subr.bf16.mxu1 %v8602_v0 }
 0x21a   :  { %7992 = vmatmul.mubr.msk.bf16.vlgmr.msra.gmra.mxu0 %vm207_vm4, %v8758_v24 }
 0x21b   :  { %8003 = vmatprep.mubr.msk.bf16.mxu0 %vm8603_vm1, %v8602_v0 }
 0x21e   :  { %7998 = vmatmul.mubr.msk.bf16.vlgmr.msra.gmra.mxu1 %vm207_vm4, %v8762_v28 }
 0x21f   :  { %8009 = vmatprep.mubr.msk.bf16.mxu1 %vm8603_vm1, %v8602_v0 }
 0x2da   :  { %v248_v33 = vpop.f32.mrf.mxu0 }
 0x2db   :  { %v302_v34 = vmul.f32 0.35355338, %v248_v33 }
 0x2dc   :  { %v7993_v35 = vpop.f32.mrf.mxu0 }
 0x2dd   :  { %v304_v36 = vsel %vm207_vm4, %v302_v34, -inf }
 0x2de   :  { %v296_v37 = vpop.f32.mrf.mxu1  ;;  %305 = vmax.xlane.f32.xlu1 %v304_v36  ;;  %v251_v38 = vpop.f32.mrf.mxu0 }
 0x2df   :  { %v303_v39 = vmul.f32 0.35355338, %v296_v37 }
 0x2e0   :  { %v7994_v40 = vpop.f32.mrf.mxu0  ;;  %v7999_v41 = vpop.f32.mrf.mxu1 }
 0x2e1   :  { %v307_v42 = vsel %vm207_vm4, %v303_v39, -inf }
 0x2e2   :  { %v299_v43 = vpop.f32.mrf.mxu1  ;;  %308 = vmax.xlane.f32.xlu1 %v307_v42 }
 0x2e4   :  { %v8000_v44 = vpop.f32.mrf.mxu1 }
 0x2f3   :  { %328 = vrot.lane.b32.xlu1 %v8758_v24, %s8605_s19 }
 0x2f7   :  { %377 = vrot.lane.b32.xlu1 %v8762_v28, %s8605_s19 }
 0x2fb   :  { %428 = vrot.lane.b32.xlu1 %v8758_v24, %s8606_s0 }
 0x367   :  { %v306_v45 = vpop.xlane.xlu1 %305 }
 0x368   :  { %v310_v46 = vsub.f32 %v302_v34, %v306_v45 }
 0x36a   :  { %v312_v47 = vmul.f32 1.442695, %v310_v46 }
 0x36b   :  { %v309_v48 = vpop.xlane.xlu1 %308 }
 0x36c   :  { %8522 = vpow2.f32 %v312_v47  ;;  %v311_v49 = vsub.f32 %v303_v39, %v309_v48 }
 0x36e   :  { %v314_v50 = vmul.f32 1.442695, %v311_v49 }
 0x36f   :  { %v329_v51 = vpop.permute.xlu1 %328 }
 0x370   :  { %8524 = vpow2.f32 %v314_v50  ;;  %v335_v52 = vsel %vm333_vm5, %v329_v51, 0 }
 0x371   :  { %8002 = vmatpush3.bf16.msra.mxu0 %v335_v52 }
 0x372   :  { %8013 = vmatprep.subr.bf16.mxu0 %v8602_v0 }
 0x373   :  { %v378_v53 = vpop.permute.xlu1 %377 }
 0x374   :  { %v383_v54 = vsel %vm333_vm5, %v378_v53, 0 }
 0x375   :  { %8008 = vmatpush3.bf16.msra.mxu1 %v383_v54 }
 0x376   :  { %8019 = vmatprep.subr.bf16.mxu1 %v8602_v0 }
 0x377   :  { %v429_v59 = vpop.permute.xlu1 %428 }
 0x378   :  { %v434_v3 = vsel %vm207_vm4, %v429_v59, 0 }
 0x379   :  { %v8523_v55 = vpop.eup %8522 }
 0x37a   :  { %v316_v56 = vsel %vm207_vm4, %v8523_v55, 0.0 }
 0x37b   :  { %317 = vadd.xlane.f32.xlu0 %v316_v56 }
 0x37d   :  { %v8525_v57 = vpop.eup %8524 }
 0x37e   :  { %v319_v58 = vsel %vm207_vm4, %v8525_v57, 0.0 }
 0x37f   :  { %320 = vadd.xlane.f32.xlu1 %v319_v58 }
 0x390   :  { %478 = vrot.lane.b32.xlu1 %v8762_v28, %s8606_s0 }
 0x391   :  { %426 = vrot.lane.b32.xlu0 %v8758_v24, %s8607_s20 }
 0x394   :  { %476 = vrot.lane.b32.xlu1 %v8762_v28, %s8607_s20 }
 0x404   :  { %v318_v60 = vpop.xlane.xlu0 %317 }
 0x405   :  { %8526 = vrcp.f32 %v318_v60 }
 0x408   :  { %v321_v61 = vpop.xlane.xlu1 %320  ;;  %v427_v8 = vpop.permute.xlu0 %426 }
 0x409   :  { %8528 = vrcp.f32 %v321_v61 }
 0x40c   :  { %v479_v5 = vpop.permute.xlu1 %478 }
 0x40d   :  { %v484_v7 = vsel %vm207_vm4, %v479_v5, 0 }
 0x410   :  { %v477_v9 = vpop.permute.xlu1 %476 }
 0x412   :  { %v8527_v62 = vpop.eup %8526 }
 0x413   :  { %v324_v63 = vmul.f32 %v8527_v62, %v8523_v55  ;;  %v201_v55 = vld [vmem:[%s10467_s6] sm:$0xf] }
 0x414   :  { %v700_v58 = vsel %vm333_vm5, %v201_v55, 0 }
 0x415   :  { %v326_v1 = vpack.c.bf16 %v324_v63, %v324_v63  ;;  %v202_v63 = vld [vmem:[%s10467_s6 + $0x4] sm:$0xf] }
 0x416   :  { %v8529_v2 = vpop.eup %8528 }
 0x417   :  { %8004 = vmatmul.mubr.msk.bf16.vlgmr.msra.gmra.mxu0 %vm207_vm4, %v326_v1  ;;  %v325_v4 = vmul.f32 %v8529_v2, %v8525_v57  ;;  %v653_v1 = vsel %vm333_vm5, %v202_v63, 0 }
 0x418   :  { %8014 = vmatpush3.bf16.xpose.msra.mxu0 %v434_v3  ;;  %8015 = vmatprep.mubr.msk.bf16.mxu0 %vm8603_vm1, %v8602_v0 }
 0x419   :  { %v327_v6 = vpack.c.bf16 %v325_v4, %v325_v4  ;;  %8025 = vmatprep.subr.bf16.mxu0 %v8602_v0 }
 0x41b   :  { %8010 = vmatmul.mubr.msk.bf16.vlgmr.msra.gmra.mxu1 %vm207_vm4, %v327_v6 }
 0x41c   :  { %8020 = vmatpush3.bf16.xpose.msra.mxu1 %v484_v7  ;;  %8021 = vmatprep.mubr.msk.bf16.mxu1 %vm8603_vm1, %v8602_v0 }
 0x41d   :  { %8031 = vmatprep.subr.bf16.mxu1 %v8602_v0 }
 0x41f   :  { %8016 = vmatmul.mubr.msk.bf16.vlgmr.msra.gmra.mxu0 %vm207_vm4, %v427_v8 }
 0x420   :  { %8027 = vmatprep.mubr.msk.bf16.mxu0 %vm8603_vm1, %v8602_v0 }
 0x423   :  { %8022 = vmatmul.mubr.msk.bf16.vlgmr.msra.gmra.mxu1 %vm207_vm4, %v477_v9 }
 0x424   :  { %8033 = vmatprep.mubr.msk.bf16.mxu1 %vm8603_vm1, %v8602_v0 }
 0x4d7   :  { %v8814_v10 = vpop.f32.mrf.mxu0 }
 0x4d9   :  { %v8005_v11 = vpop.f32.mrf.mxu0 }
 0x4db   :  { %v374_v12 = vpop.f32.mrf.mxu0  ;;  %v8816_v13 = vpop.f32.mrf.mxu1 }
 0x4dc   :  { %v425_v14 = vpack.c.bf16 %v8816_v13, %v8814_v10 }
 0x4dd   :  { %v8006_v15 = vpop.f32.mrf.mxu0  ;;  %v8011_v16 = vpop.f32.mrf.mxu1 }
 0x4df   :  { %v422_v19 = vpop.f32.mrf.mxu1  ;;  %v470_v20 = vpop.f32.mrf.mxu0 }
 0x4e0   :  { %v526_v21 = vmul.f32 0.35355338, %v470_v20 }
 0x4e1   :  { %v8012_v22 = vpop.f32.mrf.mxu1  ;;  %v8017_v23 = vpop.f32.mrf.mxu0 }
 0x4e2   :  { %v528_v25 = vsel %vm207_vm4, %v526_v21, -inf }
 0x4e3   :  { %v520_v26 = vpop.f32.mrf.mxu1  ;;  %529 = vmax.xlane.f32.xlu1 %v528_v25  ;;  %v473_v27 = vpop.f32.mrf.mxu0 }
 0x4e4   :  { %v527_v29 = vmul.f32 0.35355338, %v520_v26 }
 0x4e5   :  { %v8018_v30 = vpop.f32.mrf.mxu0  ;;  %v8023_v31 = vpop.f32.mrf.mxu1 }
 0x4e6   :  { %v531_v32 = vsel %vm207_vm4, %v527_v29, -inf }
 0x4e7   :  { %532 = vmax.xlane.f32.xlu0 %v531_v32  ;;  %v523_v33 = vpop.f32.mrf.mxu1 }
 0x4e9   :  { %v8024_v34 = vpop.f32.mrf.mxu1 }
 0x4fd   :  { %600 = vrot.lane.b32.xlu0 %v8762_v28, %s8608_s21 }
 0x501   :  { %743 = vrot.lane.b32.xlu0 %v8758_v24, %s10490_s22 }
 0x56c   :  { %v530_v35 = vpop.xlane.xlu1 %529 }
 0x56d   :  { %v534_v36 = vsub.f32 %v526_v21, %v530_v35 }
 0x56f   :  { %v536_v37 = vmul.f32 1.442695, %v534_v36 }
 0x570   :  { %v533_v38 = vpop.xlane.xlu0 %532 }
 0x571   :  { %8530 = vpow2.f32 %v536_v37  ;;  %v535_v39 = vsub.f32 %v527_v29, %v533_v38 }
 0x573   :  { %v538_v40 = vmul.f32 1.442695, %v535_v39 }
 0x574   :  { %v601_v41 = vpop.permute.xlu0 %600 }
 0x575   :  { %8532 = vpow2.f32 %v538_v40  ;;  %v606_v42 = vsel %vm333_vm5, %v601_v41, 0 }
 0x576   :  { %8032 = vmatpush3.bf16.msra.mxu1 %v606_v42 }
 0x577   :  { %8043 = vmatprep.subr.bf16.mxu1 %v8602_v0 }
 0x578   :  { %v744_v13 = vpop.permute.xlu0 %743 }
 0x57e   :  { %v8531_v43 = vpop.eup %8530 }
 0x57f   :  { %v540_v44 = vsel %vm207_vm4, %v8531_v43, 0.0 }
 0x580   :  { %541 = vadd.xlane.f32.xlu1 %v540_v44 }
 0x582   :  { %v8533_v45 = vpop.eup %8532 }
 0x583   :  { %v543_v46 = vsel %vm207_vm4, %v8533_v45, 0.0 }
 0x584   :  { %544 = vadd.xlane.f32.xlu1 %v543_v46 }
 0x595   :  { %552 = vrot.lane.b32.xlu1 %v8758_v24, %s8608_s21 }
 0x599   :  { %745 = vrot.lane.b32.xlu1 %v8758_v24, %s8610_s23 }
 0x59d   :  { %795 = vrot.lane.b32.xlu1 %v8762_v28, %s8610_s23 }
 0x5a1   :  { %793 = vrot.lane.b32.xlu1 %v8762_v28, %s10490_s22 }
 0x609   :  { %v542_v47 = vpop.xlane.xlu1 %541 }
 0x60a   :  { %8534 = vrcp.f32 %v542_v47 }
 0x60d   :  { %v545_v48 = vpop.xlane.xlu1 %544 }
 0x60e   :  { %8536 = vrcp.f32 %v545_v48 }
 0x611   :  { %v553_v49 = vpop.permute.xlu1 %552 }
 0x612   :  { %v558_v50 = vsel %vm333_vm5, %v553_v49, 0 }
 0x613   :  { %8026 = vmatpush3.bf16.msra.mxu0 %v558_v50 }
 0x614   :  { %8037 = vmatprep.subr.bf16.mxu0 %v8602_v0 }
 0x615   :  { %v746_v59 = vpop.permute.xlu1 %745 }
 0x616   :  { %v751_v9 = vsel %vm207_vm4, %v746_v59, 0 }
 0x617   :  { %v8535_v51 = vpop.eup %8534 }
 0x618   :  { %v548_v52 = vmul.f32 %v8535_v51, %v8531_v43 }
 0x619   :  { %v796_v60 = vpop.permute.xlu1 %795 }
 0x61a   :  { %v550_v53 = vpack.c.bf16 %v548_v52, %v548_v52  ;;  %v801_v61 = vsel %vm207_vm4, %v796_v60, 0 }
 0x61b   :  { %v8537_v54 = vpop.eup %8536 }
 0x61c   :  { %8028 = vmatmul.mubr.msk.bf16.vlgmr.msra.gmra.mxu0 %vm207_vm4, %v550_v53  ;;  %v549_v56 = vmul.f32 %v8537_v54, %v8533_v45 }
 0x61d   :  { %8039 = vmatprep.mubr.msk.bf16.mxu0 %vm8603_vm1, %v8602_v0  ;;  %v794_v62 = vpop.permute.xlu1 %793  ;;  %8038 = vmatpush3.bf16.msra.mxu0 %v653_v1 }
 0x61e   :  { %v551_v57 = vpack.c.bf16 %v549_v56, %v549_v56  ;;  %8049 = vmatprep.subr.bf16.mxu0 %v8602_v0 }
 0x620   :  { %8034 = vmatmul.mubr.msk.bf16.vlgmr.msra.gmra.mxu1 %vm207_vm4, %v551_v57 }
 0x621   :  { %8044 = vmatpush3.bf16.msra.mxu1 %v700_v58  ;;  %8045 = vmatprep.mubr.msk.bf16.mxu1 %vm8603_vm1, %v8602_v0 }
 0x622   :  { %8055 = vmatprep.subr.bf16.mxu1 %v8602_v0 }
 0x628   :  { %8046 = vmatmul.mubr.msk.bf16.vlgmr.msra.gmra.mxu1 %vm207_vm4, %v425_v14 }
 0x629   :  { %8056 = vmatpush3.bf16.xpose.msra.mxu1 %v801_v61  ;;  %8057 = vmatprep.mubr.msk.bf16.mxu1 %vm8603_vm1, %v8602_v0 }
 0x62a   :  { %8067 = vmatprep.subr.bf16.mxu1 %v8602_v0 }
 0x630   :  { %8058 = vmatmul.mubr.msk.bf16.vlgmr.msra.gmra.mxu1 %vm207_vm4, %v794_v62  ;;  %v203_v62 = vld [vmem:[%s10467_s6 + $0x8] sm:$0xf] }
 0x631   :  { %8069 = vmatprep.mubr.msk.bf16.mxu1 %vm8603_vm1, %v8602_v0  ;;  %v970_v63 = vsel %vm333_vm5, %v203_v62, 0 }
 0x6dc   :  { %v594_v2 = vpop.f32.mrf.mxu0 }
 0x6de   :  { %v8029_v3 = vpop.f32.mrf.mxu0 }
 0x6e0   :  { %v597_v4 = vpop.f32.mrf.mxu0  ;;  %v642_v5 = vpop.f32.mrf.mxu1 }
 0x6e1   :  { %v648_v6 = vpack.c.bf16 %v642_v5, %v594_v2 }
 0x6e2   :  { %v8030_v7 = vpop.f32.mrf.mxu0  ;;  %v8035_v8 = vpop.f32.mrf.mxu1 }
 0x6e3   :  { %8040 = vmatmul.mubr.msk.bf16.vlgmr.msra.gmra.mxu0 %vm207_vm4, %v648_v6 }
 0x6e4   :  { %8050 = vmatpush3.bf16.xpose.msra.mxu0 %v751_v9  ;;  %v645_v10 = vpop.f32.mrf.mxu1  ;;  %8051 = vmatprep.mubr.msk.bf16.mxu0 %vm8603_vm1, %v8602_v0 }
 0x6e5   :  { %8061 = vmatprep.subr.bf16.mxu0 %v8602_v0 }
 0x6e6   :  { %v8036_v11 = vpop.f32.mrf.mxu1 }
 0x6e8   :  { %v8872_v12 = vpop.f32.mrf.mxu1 }
 0x6ea   :  { %v8047_v14 = vpop.f32.mrf.mxu1 }
 0x6eb   :  { %8052 = vmatmul.mubr.msk.bf16.vlgmr.msra.gmra.mxu0 %vm207_vm4, %v744_v13 }
 0x6ec   :  { %v8875_v15 = vpop.f32.mrf.mxu1  ;;  %8063 = vmatprep.mubr.msk.bf16.mxu0 %vm8603_vm1, %v8602_v0 }
 0x6ee   :  { %v8048_v16 = vpop.f32.mrf.mxu1 }
 0x6f0   :  { %v837_v19 = vpop.f32.mrf.mxu1 }
 0x6f1   :  { %v844_v20 = vmul.f32 0.35355338, %v837_v19 }
 0x6f2   :  { %v8059_v21 = vpop.f32.mrf.mxu1 }
 0x6f3   :  { %v848_v22 = vsel %vm207_vm4, %v844_v20, -inf }
 0x6f4   :  { %849 = vmax.xlane.f32.xlu1 %v848_v22  ;;  %v840_v23 = vpop.f32.mrf.mxu1 }
 0x6f6   :  { %v8060_v25 = vpop.f32.mrf.mxu1 }
 0x705   :  { %869 = vrot.lane.b32.xlu1 %v8758_v24, %s10488_s28 }
 0x709   :  { %1017 = vrot.lane.b32.xlu1 %v8758_v24, %s10486_s29 }
 0x70d   :  { %1067 = vrot.lane.b32.xlu1 %v8762_v28, %s10486_s29 }
 0x711   :  { %1065 = vrot.lane.b32.xlu1 %v8762_v28, %s10484_s30 }
 0x77d   :  { %v850_v26 = vpop.xlane.xlu1 %849 }
 0x77e   :  { %v852_v30 = vsub.f32 %v844_v20, %v850_v26 }
 0x780   :  { %v855_v31 = vmul.f32 1.442695, %v852_v30 }
 0x781   :  { %v870_v27 = vpop.permute.xlu1 %869 }
 0x782   :  { %v875_v29 = vsel %vm333_vm5, %v870_v27, 0  ;;  %8538 = vpow2.f32 %v855_v31 }
 0x783   :  { %8062 = vmatpush3.bf16.msra.mxu0 %v875_v29 }
 0x784   :  { %8073 = vmatprep.subr.bf16.mxu0 %v8602_v0 }
 0x785   :  { %v1018_v55 = vpop.permute.xlu1 %1017 }
 0x786   :  { %v1023_v57 = vsel %vm207_vm4, %v1018_v55, 0 }
 0x789   :  { %v1068_v6 = vpop.permute.xlu1 %1067 }
 0x78a   :  { %v1073_v16 = vsel %vm207_vm4, %v1068_v6, 0  ;;  %v6845_v6 = vld [vmem:[%s10468_s7] ss:$0 sm:$0xff] }
 0x78d   :  { %v1066_v22 = vpop.permute.xlu1 %1065 }
 0x78f   :  { %v8539_v40 = vpop.eup %8538 }
 0x790   :  { %v860_v43 = vsel %vm207_vm4, %v8539_v40, 0.0 }
 0x7a3   :  { %v8890_v32 = vpop.f32.mrf.mxu0 }
 0x7a4   :  { %v737_v30 = vadd.f32 %v8872_v12, %v8890_v32 }
 0x7a5   :  { %v8041_v33 = vpop.f32.mrf.mxu0 }
 0x7a7   :  { %v8892_v34 = vpop.f32.mrf.mxu0 }
 0x7a9   :  { %v8042_v35 = vpop.f32.mrf.mxu0 }
 0x7ab   :  { %v787_v36 = vpop.f32.mrf.mxu0 }
 0x7ac   :  { %v843_v37 = vmul.f32 0.35355338, %v787_v36  ;;  %v740_v36 = vadd.f32 %v8875_v15, %v8892_v34 }
 0x7ad   :  { %v8053_v38 = vpop.f32.mrf.mxu0 }
 0x7ae   :  { %v845_v39 = vsel %vm207_vm4, %v843_v37, -inf }
 0x7af   :  { %846 = vmax.xlane.f32.xlu0 %v845_v39  ;;  %v790_v41 = vpop.f32.mrf.mxu0 }
 0x7b1   :  { %v8054_v42 = vpop.f32.mrf.mxu0 }
 0x7b3   :  { %861 = vadd.xlane.f32.xlu0 %v860_v43 }
 0x838   :  { %v847_v44 = vpop.xlane.xlu0 %846 }
 0x839   :  { %v851_v45 = vsub.f32 %v843_v37, %v847_v44 }
 0x83b   :  { %v853_v46 = vmul.f32 1.442695, %v851_v45 }
 0x83c   :  { %v862_v49 = vpop.xlane.xlu0 %861 }
 0x83d   :  { %8540 = vpow2.f32 %v853_v46 }
 0x83e   :  { %8542 = vrcp.f32 %v862_v49 }
 0x84a   :  { %v8541_v47 = vpop.eup %8540 }
 0x84b   :  { %v857_v48 = vsel %vm207_vm4, %v8541_v47, 0.0  ;;  %v8543_v50 = vpop.eup %8542 }
 0x84c   :  { %858 = vadd.xlane.f32.xlu0 %v857_v48  ;;  %v866_v52 = vmul.f32 %v8543_v50, %v8539_v40 }
 0x84e   :  { %v868_v56 = vpack.c.bf16 %v866_v52, %v866_v52  ;;  %v204_v52 = vld [vmem:[%s10467_s6 + $0xc] sm:$0xf] }
 0x862   :  { %917 = vrot.lane.b32.xlu0 %v8762_v28, %s10488_s28  ;;  %s10502_s28 = smov 40  }
 0x866   :  { %1015 = vrot.lane.b32.xlu0 %v8758_v24, %s10484_s30 }
 0x8d5   :  { %v859_v51 = vpop.xlane.xlu0 %858 }
 0x8d6   :  { %8544 = vrcp.f32 %v859_v51 }
 0x8d9   :  { %v918_v53 = vpop.permute.xlu0 %917 }
 0x8da   :  { %v923_v54 = vsel %vm333_vm5, %v918_v53, 0  ;;  %v1242_v53 = vsel %vm333_vm5, %v204_v52, 0 }
 0x8db   :  { %8068 = vmatpush3.bf16.msra.mxu1 %v923_v54 }
 0x8dc   :  { %8079 = vmatprep.subr.bf16.mxu1 %v8602_v0 }
 0x8dd   :  { %v1016_v60 = vpop.permute.xlu0 %1015 }
 0x8de   :  { %8070 = vmatmul.mubr.msk.bf16.vlgmr.msra.gmra.mxu1 %vm207_vm4, %v868_v56 }
 0x8df   :  { %8080 = vmatpush3.bf16.xpose.msra.mxu1 %v1023_v57  ;;  %8081 = vmatprep.mubr.msk.bf16.mxu1 %vm8603_vm1, %v8602_v0 }
 0x8e0   :  { %8091 = vmatprep.subr.bf16.mxu1 %v8602_v0 }
 0x8e3   :  { %v8545_v58 = vpop.eup %8544 }
 0x8e4   :  { %v865_v59 = vmul.f32 %v8545_v58, %v8541_v47 }
 0x8e6   :  { %8082 = vmatmul.mubr.msk.bf16.vlgmr.msra.gmra.mxu1 %vm207_vm4, %v1016_v60  ;;  %v867_v61 = vpack.c.bf16 %v865_v59, %v865_v59 }
 0x8e7   :  { %8093 = vmatprep.mubr.msk.bf16.mxu1 %vm8603_vm1, %v8602_v0 }
 0x8e8   :  { %8064 = vmatmul.mubr.msk.bf16.vlgmr.msra.gmra.mxu0 %vm207_vm4, %v867_v61 }
 0x8e9   :  { %8075 = vmatprep.mubr.msk.bf16.mxu0 %vm8603_vm1, %v8602_v0  ;;  %8074 = vmatpush3.bf16.msra.mxu0 %v970_v63 }
 0x8ea   :  { %8085 = vmatprep.subr.bf16.mxu0 %v8602_v0 }
 0x99e   :  { %v959_v1 = vpop.f32.mrf.mxu1 }
 0x9a0   :  { %v8071_v2 = vpop.f32.mrf.mxu1 }
 0x9a2   :  { %v962_v3 = vpop.f32.mrf.mxu1 }
 0x9a4   :  { %v8072_v4 = vpop.f32.mrf.mxu1 }
 0x9a6   :  { %v1059_v5 = vpop.f32.mrf.mxu1 }
 0x9a7   :  { %v1115_v7 = vmul.f32 0.35355338, %v1059_v5 }
 0x9a8   :  { %v911_v8 = vpop.f32.mrf.mxu0  ;;  %v8083_v9 = vpop.f32.mrf.mxu1 }
 0x9a9   :  { %v965_v10 = vpack.c.bf16 %v959_v1, %v911_v8  ;;  %v1117_v11 = vsel %vm207_vm4, %v1115_v7, -inf }
 0x9aa   :  { %1118 = vmax.xlane.f32.xlu0 %v1117_v11  ;;  %v8065_v13 = vpop.f32.mrf.mxu0  ;;  %v1062_v14 = vpop.f32.mrf.mxu1 }
 0x9ab   :  { %8076 = vmatmul.mubr.msk.bf16.vlgmr.msra.gmra.mxu0 %vm207_vm4, %v965_v10 }
 0x9ac   :  { %8086 = vmatpush3.bf16.xpose.msra.mxu0 %v1073_v16  ;;  %v914_v19 = vpop.f32.mrf.mxu0  ;;  %v8084_v20 = vpop.f32.mrf.mxu1  ;;  %8087 = vmatprep.mubr.msk.bf16.mxu0 %vm8603_vm1, %v8602_v0 }
 0x9ad   :  { %8097 = vmatprep.subr.bf16.mxu0 %v8602_v0 }
 0x9ae   :  { %v8066_v21 = vpop.f32.mrf.mxu0 }
 0x9b3   :  { %8088 = vmatmul.mubr.msk.bf16.vlgmr.msra.gmra.mxu0 %vm207_vm4, %v1066_v22 }
 0x9b4   :  { %8099 = vmatprep.mubr.msk.bf16.mxu0 %vm8603_vm1, %v8602_v0 }
 0xa33   :  { %v1119_v23 = vpop.xlane.xlu0 %1118 }
 0xa34   :  { %v1123_v25 = vsub.f32 %v1115_v7, %v1119_v23 }
 0xa36   :  { %v1125_v26 = vmul.f32 1.442695, %v1123_v25 }
 0xa38   :  { %8546 = vpow2.f32 %v1125_v26 }
 0xa45   :  { %v8547_v27 = vpop.eup %8546 }
 0xa46   :  { %v1129_v29 = vsel %vm207_vm4, %v8547_v27, 0.0 }
 0xa47   :  { %1130 = vadd.xlane.f32.xlu0 %v1129_v29 }
 0xa6b   :  { %v1006_v31 = vpop.f32.mrf.mxu0 }
 0xa6c   :  { %v1013_v33 = vadd.f32 %v1006_v31, %v737_v30 }
 0xa6d   :  { %v8077_v35 = vpop.f32.mrf.mxu0 }
 0xa6e   :  { %v1368_v35 = vld [vmem:[%s10469_s10 + $0xc0] sm:$0xff] }
 0xa6f   :  { %v1009_v37 = vpop.f32.mrf.mxu0 }
 0xa70   :  { %v1014_v38 = vadd.f32 %v1009_v37, %v740_v36  ;;  %v1361_v36 = vld [vmem:[%s10469_s10 + $0x88] sm:$0xff] }
 0xa71   :  { %v8078_v39 = vpop.f32.mrf.mxu0 }
 0xa73   :  { %v1109_v40 = vpop.f32.mrf.mxu0 }
 0xa74   :  { %v1116_v41 = vmul.f32 0.35355338, %v1109_v40 }
 0xa75   :  { %v8089_v42 = vpop.f32.mrf.mxu0 }
 0xa76   :  { %v1120_v43 = vsel %vm207_vm4, %v1116_v41, -inf  ;;  %v1344_v42 = vld [vmem:[%s10469_s10] sm:$0xff] }
 0xa77   :  { %1121 = vmax.xlane.f32.xlu1 %v1120_v43  ;;  %v1112_v44 = vpop.f32.mrf.mxu0  ;;  %v1352_v43 = vld [vmem:[%s10469_s10 + $0x40] sm:$0xff] }
 0xa78   :  { %v1345_v44 = vld [vmem:[%s10469_s10 + $0x8] sm:$0xff] }
 0xa79   :  { %v8090_v45 = vpop.f32.mrf.mxu0 }
 0xa7a   :  { %v6849_v45 = vcombine.high %v1344_v42, %v1352_v43 }
 0xa88   :  { %1141 = vrot.lane.b32.xlu1 %v8758_v24, %s10482_s24 }
 0xad0   :  { %v1131_v12 = vpop.xlane.xlu0 %1130 }
 0xad1   :  { %8548 = vrcp.f32 %v1131_v12  ;;  %v1353_v12 = vld [vmem:[%s10469_s10 + $0x48] sm:$0xff] }
 0xade   :  { %v8549_v32 = vpop.eup %8548 }
 0xadf   :  { %v1137_v47 = vmul.f32 %v8549_v32, %v8547_v27  ;;  %v6848_v32 = vcombine.low %v1344_v42, %v1352_v43  ;;  %v1358_v42 = vld [vmem:[%s10469_s10 + $0x70] sm:$0xff]  ;;  %v1351_v43 = vld [vmem:[%s10469_s10 + $0x38] sm:$0xff] }
 0xae1   :  { %v1139_v50 = vpack.c.bf16 %v1137_v47, %v1137_v47  ;;  %v1370_v47 = vld [vmem:[%s10469_s10 + $0xd0] sm:$0xff] }
 0xb00   :  { %v1122_v46 = vpop.xlane.xlu1 %1121 }
 0xb01   :  { %v1124_v15 = vsub.f32 %v1116_v41, %v1122_v46  ;;  %v6850_v46 = vcombine.low %v1345_v44, %v1353_v12 }
 0xb03   :  { %v1127_v34 = vmul.f32 1.442695, %v1124_v15  ;;  %v6851_v15 = vcombine.high %v1345_v44, %v1353_v12  ;;  %v1359_v44 = vld [vmem:[%s10469_s10 + $0x78] sm:$0xff] }
 0xb04   :  { %v1142_v48 = vpop.permute.xlu1 %1141 }
 0xb05   :  { %8550 = vpow2.f32 %v1127_v34  ;;  %v1147_v49 = vsel %vm333_vm5, %v1142_v48, 0  ;;  %v1362_v34 = vld [vmem:[%s10469_s10 + $0x90] sm:$0xff]  ;;  %v1363_v48 = vld [vmem:[%s10469_s10 + $0x98] sm:$0xff] }
 0xb06   :  { %8092 = vmatpush3.bf16.msra.mxu1 %v1147_v49  ;;  %v8615_v49 = vmov 0  }
 0xb07   :  { %8103 = vmatprep.subr.bf16.mxu1 %v8602_v0 }
 0xb09   :  { %8094 = vmatmul.mubr.msk.bf16.vlgmr.msra.gmra.mxu1 %vm207_vm4, %v1139_v50  ;;  %v6869_v50 = vcombine.high %v1362_v34, %v1370_v47 }
 0xb0a   :  { %8105 = vmatprep.mubr.msk.bf16.mxu1 %vm8603_vm1, %v8602_v0  ;;  %8104 = vmatpush3.bf16.msra.mxu1 %v1242_v53 }
 0xb12   :  { %v8551_v24 = vpop.eup %8550 }
 0xb13   :  { %v1132_v51 = vsel %vm207_vm4, %v8551_v24, 0.0 }
 0xb14   :  { %1133 = vadd.xlane.f32.xlu0 %v1132_v51  ;;  %v6868_v51 = vcombine.low %v1362_v34, %v1370_v47  ;;  %v6863_v34 = vcombine.high %v1351_v43, %v1359_v44  ;;  %v8264_v47 = vld [vmem:[%s10470_s12 + $0x78] sm:$0xff]  }
 0xb2a   :  { %1189 = vrot.lane.b32.xlu0 %v8762_v28, %s10482_s24 }
 0xb9d   :  { %v1134_v54 = vpop.xlane.xlu0 %1133 }
 0xb9e   :  { %8552 = vrcp.f32 %v1134_v54 }
 0xba1   :  { %v1190_v55 = vpop.permute.xlu0 %1189 }
 0xba2   :  { %v1195_v56 = vsel %vm333_vm5, %v1190_v55, 0 }
 0xba3   :  { %8098 = vmatpush3.bf16.msra.mxu0 %v1195_v56 }
 0xbab   :  { %v8553_v57 = vpop.eup %8552 }
 0xbac   :  { %v1138_v58 = vmul.f32 %v8553_v57, %v8551_v24  ;;  %v1371_v24 = vld [vmem:[%s10469_s10 + $0xd8] sm:$0xff] }
 0xbad   :  { %v6870_v52 = vcombine.low %v1363_v48, %v1371_v24  ;;  %v6871_v53 = vcombine.high %v1363_v48, %v1371_v24  ;;  %v8265_v48 = vld [vmem:[%s10470_s12 + $0xf8] sm:$0xff]   ;;  %v6862_v24 = vcombine.low %v1351_v43, %v1359_v44 }
 0xbae   :  { %v1140_v59 = vpack.c.bf16 %v1138_v58, %v1138_v58 }
 0xbb0   :  { %8100 = vmatmul.mubr.msk.bf16.vlgmr.msra.gmra.mxu0 %vm207_vm4, %v1140_v59 }
 0xbb1   :  { %1655 = vmatprep.mubr.bf16.mxu0 %v8615_v49 }
 0xbc9   :  { %v1183_v60 = vpop.f32.mrf.mxu1 }
 0xbcb   :  { %v8095_v28 = vpop.f32.mrf.mxu1 }
 0xbcc   :  { %v6846_v28 = vld [vmem:[%s10471_s8] ss:$0 sm:$0xff] }
 0xbcd   :  { %v1186_v61 = vpop.f32.mrf.mxu1 }
 0xbcf   :  { %v8096_v62 = vpop.f32.mrf.mxu1 }
 0xc70   :  { %v1231_v63 = vpop.f32.mrf.mxu0 }
 0xc71   :  { %v1237_v1 = vpack.c.bf16 %v1231_v63, %v1183_v60  ;;  %v6847_v63 = vld [vmem:[%s10472_s9] ss:$0 sm:$0xff] }
 0xc72   :  { %v8101_v2 = vpop.f32.mrf.mxu0 }
 0xc73   :  { %8106 = vmatmul.mubr.msk.bf16.vlgmr.msra.gmra.mxu1 %vm207_vm4, %v1237_v1 }
 0xc74   :  { %v1234_v3 = vpop.f32.mrf.mxu0  ;;  %1698 = vmatprep.mubr.bf16.mxu1 %v8615_v49 }
 0xc75   :  { %v1346_v3 = vld [vmem:[%s10469_s10 + $0x10] sm:$0xff] }
 0xc76   :  { %v8102_v4 = vpop.f32.mrf.mxu0 }
 0xc77   :  { %v1354_v4 = vld [vmem:[%s10469_s10 + $0x50] sm:$0xff] }
 0xd33   :  { %v1278_v5 = vpop.f32.mrf.mxu1 }
 0xd34   :  { %v1285_v7 = vadd.f32 %v1278_v5, %v1013_v33  ;;  %v1347_v5 = vld [vmem:[%s10469_s10 + $0x18] sm:$0xff] }
 0xd35   :  { %v8107_v8 = vpop.f32.mrf.mxu1 }
 0xd36   :  { %v1294_v9 = vadd.f32 %v6845_v6, %v1285_v7 }
 0xd37   :  { %v1281_v10 = vpop.f32.mrf.mxu1 }
 0xd38   :  { %v1286_v11 = vadd.f32 %v1281_v10, %v1014_v38  ;;  %v1296_v13 = vadd.f32 %v1294_v9, %v8746_v17  ;;  %v1369_v38 = vld [vmem:[%s10469_s10 + $0xc8] sm:$0xff]  ;;  %v1364_v10 = vld [vmem:[%s10469_s10 + $0xa0] sm:$0xff] }
 0xd39   :  { %v8108_v14 = vpop.f32.mrf.mxu1  ;;  %v6866_v40 = vcombine.low %v1361_v36, %v1369_v38  ;;  %v6867_v41 = vcombine.high %v1361_v36, %v1369_v38  ;;  %v1375_v36 = vld [vmem:[%s10469_s10 + $0xf8] sm:$0xff] }
 0xd3a   :  { %v1295_v16 = vadd.f32 %v6845_v6, %v1286_v11  ;;  %v1300_v19 = vsel %vm150_vm3, %v1296_v13, 0.0  ;;  %v1355_v6 = vld [vmem:[%s10469_s10 + $0x58] sm:$0xff]  ;;  %v1372_v11 = vld [vmem:[%s10469_s10 + $0xe0] sm:$0xff]  ;;  %v1373_v14 = vld [vmem:[%s10469_s10 + $0xe8] sm:$0xff] }
 0xd3b   :  { %1301 = vadd.xlane.f32.xlu1 %v1300_v19  ;;  %1678 = vmatprep.subr.bf16.mxu1 %v6867_v41  ;;  %v6853_v19 = vcombine.high %v1346_v3, %v1354_v4  ;;  %v1350_v41 = vld [vmem:[%s10469_s10 + $0x30] sm:$0xff] }
 0xd3c   :  { %v1297_v20 = vadd.f32 %v1295_v16, %v8748_v18  ;;  %v1360_v18 = vld [vmem:[%s10469_s10 + $0x80] sm:$0xff]  ;;  %1679 = vmatpush1.bf16.msra.mxu1 %v6866_v40 }
 0xd3d   :  { %v6865_v37 = vcombine.high %v1360_v18, %v1368_v35  ;;  %v6864_v39 = vcombine.low %v1360_v18, %v1368_v35  ;;  %1680 = vmatprep.subr.bf16.mxu1 %v6851_v15  ;;  %v1374_v18 = vld [vmem:[%s10469_s10 + $0xf0] sm:$0xff]  ;;  %v1367_v35 = vld [vmem:[%s10469_s10 + $0xb8] sm:$0xff]  ;;  %v6861_v15 = vcombine.high %v1350_v41, %v1358_v42 }
 0xd3e   :  { %v1303_v21 = vsel %vm150_vm3, %v1297_v20, 0.0  ;;  %v6879_v12 = vcombine.high %v1367_v35, %v1375_v36 }
 0xd3f   :  { %1304 = vadd.xlane.f32.xlu0 %v1303_v21  ;;  %1635 = vmatprep.subr.bf16.mxu0 %v6865_v37  ;;  %v6852_v21 = vcombine.low %v1346_v3, %v1354_v4  ;;  %v8282_v3 = vld [vmem:[%s10470_s12 + $0x18] sm:$0xff]  }
 0xd40   :  { %1636 = vmatpush1.bf16.msra.mxu0 %v6864_v39  ;;  %1681 = vmatpush1.bf16.msra.mxu1 %v6850_v46  ;;  %v6878_v46 = vcombine.low %v1367_v35, %v1375_v36  ;;  %v8283_v4 = vld [vmem:[%s10470_s12 + $0x98] sm:$0xff]  }
 0xd41   :  { %1637 = vmatprep.subr.bf16.mxu0 %v6849_v45  ;;  %1764 = vmatprep.subr.bf16.mxu1 %v6871_v53  ;;  %v8268_v53 = vld [vmem:[%s10470_s12 + $0x70] sm:$0xff]  }
 0xd44   :  { %1638 = vmatpush1.bf16.msra.mxu0 %v6848_v32 }
 0xd45   :  { %1721 = vmatprep.subr.bf16.mxu0 %v6869_v50  ;;  %v6860_v50 = vcombine.low %v1350_v41, %v1358_v42 }
 0xdc4   :  { %v1302_v22 = vpop.xlane.xlu1 %1301 }
 0xdc5   :  { %v1307_v23 = vmul.f32 0.03125, %v1302_v22  ;;  %v6854_v22 = vcombine.low %v1347_v5, %v1355_v6 }
 0xdc7   :  { %v1309_v25 = vsub.f32 %v1296_v13, %v1307_v23  ;;  %v1365_v13 = vld [vmem:[%s10469_s10 + $0xa8] sm:$0xff]  ;;  %v1348_v23 = vld [vmem:[%s10469_s10 + $0x20] sm:$0xff] }
 0xdc8   :  { %v1305_v26 = vpop.xlane.xlu0 %1304 }
 0xdc9   :  { %v1308_v27 = vmul.f32 0.03125, %v1305_v26  ;;  %v1311_v29 = vmul.f32 %v1309_v25, %v1309_v25  ;;  %v1349_v26 = vld [vmem:[%s10469_s10 + $0x28] sm:$0xff] }
 0xdcb   :  { %v1310_v30 = vsub.f32 %v1297_v20, %v1308_v27  ;;  %v1313_v31 = vsel %vm150_vm3, %v1311_v29, 0.0  ;;  %v6855_v20 = vcombine.high %v1347_v5, %v1355_v6  ;;  %v1357_v27 = vld [vmem:[%s10469_s10 + $0x68] sm:$0xff]  ;;  %v6873_v29 = vcombine.high %v1364_v10, %v1372_v11  ;;  %v8284_v5 = vld [vmem:[%s10470_s12 + $0x50] sm:$0xff]  }
 0xdcc   :  { %1314 = vadd.xlane.f32.xlu1 %v1313_v31  ;;  %v6872_v31 = vcombine.low %v1364_v10, %v1372_v11  ;;  %v6859_v38 = vcombine.high %v1349_v26, %v1357_v27  ;;  %v6858_v40 = vcombine.low %v1349_v26, %v1357_v27  ;;  %v8285_v6 = vld [vmem:[%s10470_s12 + $0xd0] sm:$0xff]   ;;  %v8288_v11 = vld [vmem:[%s10470_s12 + $0x48] sm:$0xff]   ;;  %v1380_v26 = vlaneseq }
 0xdcd   :  { %v1312_v17 = vmul.f32 %v1310_v30, %v1310_v30  ;;  %v8287_v10 = vld [vmem:[%s10470_s12 + $0x90] sm:$0xff]  }
 0xdce   :  { %v9196_v27 = vshrl.u32 %v1380_v26, 7  ;;  %v8303_v26 = vld [vmem:[%s10470_s12 + $0x1b0] sm:$0xff]  }
 0xdcf   :  { %v1316_v33 = vsel %vm150_vm3, %v1312_v17, 0.0  ;;  %v6874_v17 = vcombine.low %v1365_v13, %v1373_v14 }
 0xdd0   :  { %1317 = vadd.xlane.f32.xlu0 %v1316_v33  ;;  %v1366_v33 = vld [vmem:[%s10469_s10 + $0xb0] sm:$0xff]  ;;  %v9224_v44 = vsub.s32 5, %v9196_v27 }
 0xdd1   :  { %v6877_v45 = vcombine.high %v1366_v33, %v1374_v18  ;;  %v6876_v32 = vcombine.low %v1366_v33, %v1374_v18  ;;  %v9213_v33 = vld [vmem:[%s10473_s11] sm:$0xff] }
 0xe55   :  { %v1315_v54 = vpop.xlane.xlu1 %1314 }
 0xe56   :  { %v1319_v55 = vmul.f32 0.03125, %v1315_v54  ;;  %v8269_v54 = vld [vmem:[%s10470_s12 + $0xf0] sm:$0xff]  }
 0xe58   :  { %v1321_v56 = vadd.f32 1e-05, %v1319_v55  ;;  %v8270_v55 = vld [vmem:[%s10470_s12 + $0x30] sm:$0xff]  }
 0xe59   :  { %v1318_v57 = vpop.xlane.xlu0 %1317 }
 0xe5a   :  { %8554 = vrsqrt.f32 %v1321_v56  ;;  %v1320_v58 = vmul.f32 0.03125, %v1318_v57  ;;  %v8271_v56 = vld [vmem:[%s10470_s12 + $0xb0] sm:$0xff]   ;;  %v8272_v57 = vld [vmem:[%s10470_s12 + $0x68] sm:$0xff]  }
 0xe5c   :  { %v1322_v59 = vadd.f32 1e-05, %v1320_v58  ;;  %v8273_v58 = vld [vmem:[%s10470_s12 + $0xe8] sm:$0xff]  }
 0xe5e   :  { %8556 = vrsqrt.f32 %v1322_v59  ;;  %v8274_v59 = vld [vmem:[%s10470_s12 + $0x28] sm:$0xff]  }
 0xe67   :  { %v8555_v60 = vpop.eup %8554 }
 0xe68   :  { %v1325_v61 = vmul.f32 %v8555_v60, %v1309_v25  ;;  %v1356_v25 = vld [vmem:[%s10469_s10 + $0x60] sm:$0xff]  ;;  %v8275_v60 = vld [vmem:[%s10470_s12 + $0xa8] sm:$0xff]  }
 0xe69   :  { %v6857_v37 = vcombine.high %v1348_v23, %v1356_v25  ;;  %v6856_v39 = vcombine.low %v1348_v23, %v1356_v25  ;;  %v8296_v23 = vld [vmem:[%s10470_s12 + $0x178] sm:$0xff]  }
 0xe6a   :  { %v1333_v1 = vmul.f32 %v6846_v28, %v1325_v61  ;;  %v8277_v61 = vld [vmem:[%s10470_s12 + $0xe0] sm:$0xff]   ;;  %v8297_v25 = vld [vmem:[%s10470_s12 + $0x1f8] sm:$0xff]  }
 0xe6b   :  { %v8557_v62 = vpop.eup %8556 }
 0xe6c   :  { %v1326_v2 = vmul.f32 %v8557_v62, %v1310_v30  ;;  %v9016_v8 = vadd.f32 %v6847_v63, %v1333_v1  ;;  %v6875_v30 = vcombine.high %v1365_v13, %v1373_v14  ;;  %v8278_v62 = vld [vmem:[%s10470_s12 + $0x20] sm:$0xff]   ;;  %v8280_v1 = vld [vmem:[%s10470_s12 + $0x58] sm:$0xff]   ;;  %v8289_v13 = vld [vmem:[%s10470_s12 + $0xc8] sm:$0xff]  }
 0xe6d   :  { %v8290_v14 = vld [vmem:[%s10470_s12 + $0x8] sm:$0xff]  }
 0xe6e   :  { %v1334_v7 = vmul.f32 %v6846_v28, %v1326_v2  ;;  %v8276_v28 = vld [vmem:[%s10470_s12 + $0x60] sm:$0xff]   ;;  %v8281_v2 = vld [vmem:[%s10470_s12 + $0xd8] sm:$0xff]  }
 0xe70   :  { %v9018_v9 = vadd.f32 %v6847_v63, %v1334_v7  ;;  %v8279_v63 = vld [vmem:[%s10470_s12 + $0xa0] sm:$0xff]   ;;  %v8286_v7 = vld [vmem:[%s10470_s12 + $0x10] sm:$0xff]  }
 0xe72   :  { %v9034_v16 = vpack.c.bf16 %v9018_v9, %v9016_v8 }
 0xe74   :  { %6880 = vmatmul.mubr.msk.bf16.vlgmr.msra.gmra.mxu0 %vm150_vm3, %v9034_v16  ;;  %6881 = vmatmul.mubr.msk.bf16.vlgmr.msra.gmra.mxu1 %vm150_vm3, %v9034_v16 }
 0xe75   :  { %1722 = vmatpush1.bf16.msra.mxu0 %v6868_v51  ;;  %1765 = vmatpush1.bf16.msra.mxu1 %v6870_v52  ;;  %v8266_v51 = vld [vmem:[%s10470_s12 + $0x38] sm:$0xff]  }
 0xe76   :  { %1723 = vmatprep.subr.bf16.mxu0 %v6853_v19  ;;  %1766 = vmatprep.subr.bf16.mxu1 %v6855_v20  ;;  %v8267_v52 = vld [vmem:[%s10470_s12 + $0xb8] sm:$0xff]   ;;  %v8292_v19 = vld [vmem:[%s10470_s12 + $0x40] sm:$0xff]  }
 0xe77   :  { %1741 = vmatprep.mubr.bf16.mxu0 %v8615_v49  ;;  %1784 = vmatprep.mubr.bf16.mxu1 %v8615_v49  ;;  %v8293_v20 = vld [vmem:[%s10470_s12 + $0xc0] sm:$0xff]  }
 0xe79   :  { %1724 = vmatpush1.bf16.msra.mxu0 %v6852_v21  ;;  %1767 = vmatpush1.bf16.msra.mxu1 %v6854_v22  ;;  %v8294_v21 = vld [vmem:[%s10470_s12] sm:$0xff]  }
 0xe7a   :  { %1807 = vmatprep.subr.bf16.mxu0 %v6873_v29  ;;  %1850 = vmatprep.subr.bf16.mxu1 %v6875_v30  ;;  %v8295_v22 = vld [vmem:[%s10470_s12 + $0x80] sm:$0xff]   ;;  %v9199_v29 = vsub.s32 1, %v9196_v27  ;;  %v9202_v30 = vsub.s32 3, %v9196_v27 }
 0xe7c   :  { %6882 = vmatmul.mubr.msk.bf16.vlgmr.msra.gmra.mxu0 %vm150_vm3, %v9034_v16  ;;  %6883 = vmatmul.mubr.msk.bf16.vlgmr.msra.gmra.mxu1 %vm150_vm3, %v9034_v16  ;;  %v1387_v36 = vrot.slane %v9213_v33, %v9199_v29 }
 0xe7d   :  { %1808 = vmatpush1.bf16.msra.mxu0 %v6872_v31  ;;  %1851 = vmatpush1.bf16.msra.mxu1 %v6874_v17  ;;  %v9205_v31 = vsub.s32 0, %v9196_v27  ;;  %v9208_v17 = vsub.s32 2, %v9196_v27 }
 0xe7e   :  { %1809 = vmatprep.subr.bf16.mxu0 %v6857_v37  ;;  %1852 = vmatprep.subr.bf16.mxu1 %v6859_v38  ;;  %v1395_v37 = vrot.slane %v9213_v33, %v9202_v30 }
 0xe7f   :  { %1827 = vmatprep.mubr.bf16.mxu0 %v8615_v49  ;;  %1870 = vmatprep.mubr.bf16.mxu1 %v8615_v49  ;;  %v1383_v38 = vrot.slane %v9213_v33, %v9205_v31 }
 0xe81   :  { %1810 = vmatpush1.bf16.msra.mxu0 %v6856_v39  ;;  %1853 = vmatpush1.bf16.msra.mxu1 %v6858_v40  ;;  %v1391_v39 = vrot.slane %v9213_v33, %v9208_v17 }
 0xe82   :  { %1893 = vmatprep.subr.bf16.mxu0 %v6877_v45  ;;  %1936 = vmatprep.subr.bf16.mxu1 %v6879_v12  ;;  %v9227_v45 = vsub.s32 7, %v9196_v27 }
 0xe84   :  { %6884 = vmatmul.mubr.msk.bf16.vlgmr.msra.gmra.mxu0 %vm150_vm3, %v9034_v16  ;;  %6885 = vmatmul.mubr.msk.bf16.vlgmr.msra.gmra.mxu1 %vm150_vm3, %v9034_v16 }
 0xe85   :  { %1894 = vmatpush1.bf16.msra.mxu0 %v6876_v32  ;;  %1937 = vmatpush1.bf16.msra.mxu1 %v6878_v46 }
 0xe86   :  { %1895 = vmatprep.subr.bf16.mxu0 %v6861_v15  ;;  %1938 = vmatprep.subr.bf16.mxu1 %v6863_v34 }
 0xe87   :  { %1913 = vmatprep.mubr.bf16.mxu0 %v8615_v49  ;;  %1956 = vmatprep.mubr.bf16.mxu1 %v8615_v49 }
 0xe89   :  { %1896 = vmatpush1.bf16.msra.mxu0 %v6860_v50  ;;  %1939 = vmatpush1.bf16.msra.mxu1 %v6862_v24 }
 0xe8a   :  { %7575 = vmatprep.subr.bf16.mxu0 %v8264_v47  ;;  %7597 = vmatprep.subr.bf16.mxu1 %v8265_v48 }
 0xe8c   :  { %6886 = vmatmul.mubr.msk.bf16.vlgmr.msra.gmra.mxu0 %vm150_vm3, %v9034_v16  ;;  %6887 = vmatmul.mubr.msk.bf16.vlgmr.msra.gmra.mxu1 %vm150_vm3, %v9034_v16  ;;  %v8291_v16 = vld [vmem:[%s10470_s12 + $0x88] sm:$0xff]  }
 0xe8d   :  { %7576 = vmatpush3.bf16.msra.mxu0 %v8266_v51  ;;  %7598 = vmatpush3.bf16.msra.mxu1 %v8267_v52 }
 0xe8e   :  { %7577 = vmatprep.subr.bf16.mxu0 %v8268_v53  ;;  %7599 = vmatprep.subr.bf16.mxu1 %v8269_v54 }
 0xe91   :  { %7578 = vmatpush3.bf16.msra.mxu0 %v8270_v55  ;;  %7600 = vmatpush3.bf16.msra.mxu1 %v8271_v56  ;;  %v1403_v56 = vrot.slane %v9213_v33, %v9224_v44 }
 0xe92   :  { %7579 = vmatprep.subr.bf16.mxu0 %v8272_v57  ;;  %7601 = vmatprep.subr.bf16.mxu1 %v8273_v58  ;;  %v1411_v57 = vrot.slane %v9213_v33, %v9227_v45 }
 0xe95   :  { %7580 = vmatpush3.bf16.msra.mxu0 %v8274_v59  ;;  %7602 = vmatpush3.bf16.msra.mxu1 %v8275_v60 }
 0xe96   :  { %7581 = vmatprep.subr.bf16.mxu0 %v8276_v28  ;;  %7603 = vmatprep.subr.bf16.mxu1 %v8277_v61 }
 0xe99   :  { %7582 = vmatpush3.bf16.msra.mxu0 %v8278_v62  ;;  %7604 = vmatpush3.bf16.msra.mxu1 %v8279_v63 }
 0xe9a   :  { %7583 = vmatprep.subr.bf16.mxu0 %v8280_v1  ;;  %7605 = vmatprep.subr.bf16.mxu1 %v8281_v2 }
 0xe9d   :  { %7584 = vmatpush3.bf16.msra.mxu0 %v8282_v3  ;;  %7606 = vmatpush3.bf16.msra.mxu1 %v8283_v4  ;;  %v8298_v4 = vld [vmem:[%s10470_s12 + $0x138] sm:$0xff]  }
 0xe9e   :  { %7585 = vmatprep.subr.bf16.mxu0 %v8284_v5  ;;  %7607 = vmatprep.subr.bf16.mxu1 %v8285_v6  ;;  %v8299_v5 = vld [vmem:[%s10470_s12 + $0x1b8] sm:$0xff]  }
 0xea1   :  { %7586 = vmatpush3.bf16.msra.mxu0 %v8286_v7  ;;  %7608 = vmatpush3.bf16.msra.mxu1 %v8287_v10 }
 0xea2   :  { %7587 = vmatprep.subr.bf16.mxu0 %v8288_v11  ;;  %7609 = vmatprep.subr.bf16.mxu1 %v8289_v13  ;;  %v8300_v13 = vld [vmem:[%s10470_s12 + $0x170] sm:$0xff]  }
 0xea5   :  { %7588 = vmatpush3.bf16.msra.mxu0 %v8290_v14  ;;  %7610 = vmatpush3.bf16.msra.mxu1 %v8291_v16  ;;  %v8301_v14 = vld [vmem:[%s10470_s12 + $0x1f0] sm:$0xff]  }
 0xea6   :  { %7589 = vmatprep.subr.bf16.mxu0 %v8292_v19  ;;  %7611 = vmatprep.subr.bf16.mxu1 %v8293_v20 }
 0xea9   :  { %7590 = vmatpush3.bf16.msra.mxu0 %v8294_v21  ;;  %7612 = vmatpush3.bf16.msra.mxu1 %v8295_v22 }
 0xeaa   :  { %7619 = vmatprep.subr.bf16.mxu0 %v8296_v23  ;;  %7641 = vmatprep.subr.bf16.mxu1 %v8297_v25  ;;  %v8302_v25 = vld [vmem:[%s10470_s12 + $0x130] sm:$0xff]  }
 0xf34   :  { %v1657_v18 = vpop.f32.mrf.mxu0  ;;  %v1700_v35 = vpop.f32.mrf.mxu1 }
 0xf35   :  { %v1658_v34 = vadd.f32 %v1657_v18, %v1383_v38  ;;  %v1701_v47 = vadd.f32 %v1700_v35, %v1391_v39  ;;  %v8304_v18 = vld [vmem:[%s10470_s12 + $0x168] sm:$0xff]  }
 0xf36   :  { %v1659_v40 = vpop.f32.mrf.mxu0  ;;  %v1702_v41 = vpop.f32.mrf.mxu1 }
 0xf37   :  { %v1660_v12 = vadd.f32 %v1659_v40, %v1387_v36  ;;  %v1703_v32 = vadd.f32 %v1702_v41, %v1395_v37  ;;  %v1967_v61 = vmax.f32 %v1658_v34, 0.0  ;;  %v1969_v62 = vmax.f32 %v1701_v47, 0.0  ;;  %v8311_v47 = vld [vmem:[%s10470_s12 + $0x1a0] sm:$0xff]  }
 0xf38   :  { %v1661_v42 = vpop.f32.mrf.mxu0  ;;  %v1704_v43 = vpop.f32.mrf.mxu1 }
 0xf39   :  { %v1662_v46 = vadd.f32 %v1661_v42, %v1383_v38  ;;  %v1705_v15 = vadd.f32 %v1704_v43, %v1391_v39  ;;  %v1968_v58 = vmax.f32 %v1660_v12, 0.0  ;;  %v1970_v59 = vmax.f32 %v1703_v32, 0.0  ;;  %v8305_v39 = vld [vmem:[%s10470_s12 + $0x1e8] sm:$0xff]   ;;  %v8308_v12 = vld [vmem:[%s10470_s12 + $0x160] sm:$0xff]  }
 0xf3a   :  { %v1663_v48 = vpop.f32.mrf.mxu0  ;;  %v1706_v50 = vpop.f32.mrf.mxu1  ;;  %v8306_v42 = vld [vmem:[%s10470_s12 + $0x128] sm:$0xff]   ;;  %v8309_v32 = vld [vmem:[%s10470_s12 + $0x1e0] sm:$0xff]  }
 0xf3b   :  { %v1664_v24 = vadd.f32 %v1663_v48, %v1387_v36  ;;  %v1707_v51 = vadd.f32 %v1706_v50, %v1395_v37  ;;  %v1983_v52 = vmax.f32 %v1662_v46, 0.0  ;;  %v1985_v53 = vmax.f32 %v1705_v15, 0.0  ;;  %v8307_v43 = vld [vmem:[%s10470_s12 + $0x1a8] sm:$0xff]   ;;  %v8310_v15 = vld [vmem:[%s10470_s12 + $0x120] sm:$0xff]   ;;  %v8312_v48 = vld [vmem:[%s10470_s12 + $0x158] sm:$0xff]  }
 0xf3c   :  { %v9229_v54 = vpop.f32.mrf.mxu0  ;;  %v9231_v55 = vpop.f32.mrf.mxu1  ;;  %v8313_v50 = vld [vmem:[%s10470_s12 + $0x1d8] sm:$0xff]  }
 0xf3d   :  { %v1984_v60 = vmax.f32 %v1664_v24, 0.0  ;;  %v1986_v28 = vmax.f32 %v1707_v51, 0.0  ;;  %v1999_v6 = vpack.c.bf16 %v1983_v52, %v1967_v61  ;;  %v2001_v7 = vpack.c.bf16 %v1985_v53, %v1969_v62  ;;  %v8314_v51 = vld [vmem:[%s10470_s12 + $0x118] sm:$0xff]   ;;  %v8319_v62 = vld [vmem:[%s10470_s12 + $0x190] sm:$0xff]  }
 0xf3e   :  { %v1745_v63 = vpop.f32.mrf.mxu0  ;;  %v1788_v1 = vpop.f32.mrf.mxu1  ;;  %v8315_v53 = vld [vmem:[%s10470_s12 + $0x198] sm:$0xff]  }
 0xf3f   :  { %v2000_v2 = vpack.c.bf16 %v1984_v60, %v1968_v58  ;;  %v2002_v3 = vpack.c.bf16 %v1986_v28, %v1970_v59  ;;  %v1746_v16 = vadd.f32 %v1745_v63, %v1403_v56  ;;  %v1789_v19 = vadd.f32 %v1788_v1, %v1411_v57  ;;  %v8318_v28 = vld [vmem:[%s10470_s12 + $0x110] sm:$0xff]   ;;  %v8321_v63 = vld [vmem:[%s10470_s12 + $0x1c8] sm:$0xff]  }
 0xf40   :  { %v9243_v10 = vpop.f32.mrf.mxu0  ;;  %v9245_v11 = vpop.f32.mrf.mxu1  ;;  %v9306_v58 = vsub.s32 4, %v9196_v27  ;;  %v9309_v59 = vsub.s32 6, %v9196_v27  ;;  %v8320_v27 = vld [vmem:[%s10470_s12 + $0x148] sm:$0xff]  }
 0xf41   :  { %3078 = vmatprep.mubr.bf16.mxu0 %v2000_v2  ;;  %3119 = vmatprep.mubr.bf16.mxu1 %v2002_v3  ;;  %v1972_v35 = vmax.f32 %v1746_v16, 0.0  ;;  %v1974_v36 = vmax.f32 %v1789_v19, 0.0  ;;  %v9334_v3 = vld [vmem:[%s10473_s11 + $0x8] sm:$0xff] }
 0xf42   :  { %v1749_v20 = vpop.f32.mrf.mxu0  ;;  %v1792_v21 = vpop.f32.mrf.mxu1  ;;  %3079 = vmatmul.mubr.bf16.vlgmr.msra.gmra.mxu0 %v1999_v6  ;;  %3120 = vmatmul.mubr.bf16.vlgmr.msra.gmra.mxu1 %v2001_v7  ;;  %v1399_v1 = vrot.slane %v9213_v33, %v9306_v58  ;;  %v1407_v2 = vrot.slane %v9213_v33, %v9309_v59  ;;  %v1419_v7 = vrot.slane %v9334_v3, %v9199_v29  ;;  %v8323_v33 = vld [vmem:[%s10470_s12 + $0x188] sm:$0xff]  }
 0xf43   :  { %v1750_v22 = vadd.f32 %v1749_v20, %v1403_v56  ;;  %v1793_v23 = vadd.f32 %v1792_v21, %v1411_v57  ;;  %7620 = vmatpush3.bf16.msra.mxu0 %v8298_v4  ;;  %7642 = vmatpush3.bf16.msra.mxu1 %v8299_v5  ;;  %v8316_v56 = vld [vmem:[%s10470_s12 + $0x150] sm:$0xff]   ;;  %v8322_v5 = vld [vmem:[%s10470_s12 + $0x108] sm:$0xff]   ;;  %v1427_v19 = vrot.slane %v9334_v3, %v9202_v30 }
 0xf44   :  { %7621 = vmatprep.subr.bf16.mxu0 %v8300_v13  ;;  %7643 = vmatprep.subr.bf16.mxu1 %v8301_v14  ;;  %v9277_v46 = vpop.f32.mrf.mxu0  ;;  %v9282_v34 = vpop.f32.mrf.mxu1  ;;  %v8317_v57 = vld [vmem:[%s10470_s12 + $0x1d0] sm:$0xff]   ;;  %v1748_v6 = vadd.f32 %v9243_v10, %v1399_v1  ;;  %v8324_v14 = vld [vmem:[%s10470_s12 + $0x140] sm:$0xff]   ;;  %v1791_v16 = vadd.f32 %v9245_v11, %v1407_v2  ;;  %v1744_v20 = vadd.f32 %v9229_v54, %v1399_v1  ;;  %v8328_v54 = vld [vmem:[%s10470_s12 + $0x278] sm:$0xff]  }
 0xf45   :  { %v1988_v37 = vmax.f32 %v1750_v22, 0.0  ;;  %v1990_v38 = vmax.f32 %v1793_v23, 0.0  ;;  %v8325_v10 = vld [vmem:[%s10470_s12 + $0x1c0] sm:$0xff]   ;;  %v1787_v22 = vadd.f32 %v9231_v55, %v1407_v2 }
 0xf46   :  { %v1831_v24 = vpop.f32.mrf.mxu0  ;;  %v1874_v52 = vpop.f32.mrf.mxu1  ;;  %v1987_v11 = vmax.f32 %v1748_v6, 0.0  ;;  %v8342_v1 = vld [vmem:[%s10470_s12 + $0x220] sm:$0xff]   ;;  %v8345_v6 = vld [vmem:[%s10470_s12 + $0x2d8] sm:$0xff]  }
 0xf47   :  { %v2004_v40 = vpack.c.bf16 %v1988_v37, %v1972_v35  ;;  %v2006_v41 = vpack.c.bf16 %v1990_v38, %v1974_v36  ;;  %7622 = vmatpush3.bf16.msra.mxu0 %v8302_v25  ;;  %7644 = vmatpush3.bf16.msra.mxu1 %v8303_v26  ;;  %v8326_v25 = vld [vmem:[%s10470_s12 + $0x100] sm:$0xff]   ;;  %v1832_v26 = vadd.f32 %v1831_v24, %v1419_v7  ;;  %v1989_v35 = vmax.f32 %v1791_v16, 0.0  ;;  %v8329_v36 = vld [vmem:[%s10470_s12 + $0x2f8] sm:$0xff]   ;;  %v8348_v16 = vld [vmem:[%s10470_s12 + $0x250] sm:$0xff]  }
 0xf48   :  { %7623 = vmatprep.subr.bf16.mxu0 %v8304_v18  ;;  %7645 = vmatprep.subr.bf16.mxu1 %v8305_v39  ;;  %v9311_v60 = vpop.f32.mrf.mxu0  ;;  %v9316_v61 = vpop.f32.mrf.mxu1  ;;  %v8327_v18 = vld [vmem:[%s10470_s12 + $0x180] sm:$0xff]   ;;  %v1875_v55 = vadd.f32 %v1874_v52, %v1427_v19  ;;  %v1971_v37 = vmax.f32 %v1744_v20, 0.0  ;;  %v1973_v39 = vmax.f32 %v1787_v22, 0.0  ;;  %v8335_v52 = vld [vmem:[%s10470_s12 + $0x2b0] sm:$0xff]  }
 0xf49   :  { %3160 = vmatprep.mubr.bf16.mxu0 %v2004_v40  ;;  %3201 = vmatprep.mubr.bf16.mxu1 %v2006_v41  ;;  %v8330_v41 = vld [vmem:[%s10470_s12 + $0x238] sm:$0xff]   ;;  %v8350_v20 = vld [vmem:[%s10470_s12 + $0x210] sm:$0xff]  }
 0xf4a   :  { %v1835_v4 = vpop.f32.mrf.mxu0  ;;  %v1878_v13 = vpop.f32.mrf.mxu1  ;;  %v8351_v22 = vld [vmem:[%s10470_s12 + $0x290] sm:$0xff]  }
 0xf4b   :  { %7624 = vmatpush3.bf16.msra.mxu0 %v8306_v42  ;;  %7646 = vmatpush3.bf16.msra.mxu1 %v8307_v43  ;;  %v1836_v21 = vadd.f32 %v1835_v4, %v1419_v7  ;;  %v1879_v23 = vadd.f32 %v1878_v13, %v1427_v19  ;;  %v2003_v42 = vpack.c.bf16 %v1987_v11, %v1971_v37  ;;  %v1976_v43 = vmax.f32 %v1832_v26, 0.0  ;;  %v8343_v4 = vld [vmem:[%s10470_s12 + $0x2a0] sm:$0xff]   ;;  %v8346_v13 = vld [vmem:[%s10470_s12 + $0x218] sm:$0xff]   ;;  %v8349_v19 = vld [vmem:[%s10470_s12 + $0x2d0] sm:$0xff]  }
 0xf4c   :  { %7625 = vmatprep.subr.bf16.mxu0 %v8308_v12  ;;  %7647 = vmatprep.subr.bf16.mxu1 %v8309_v32  ;;  %v8331_v12 = vld [vmem:[%s10470_s12 + $0x2b8] sm:$0xff]   ;;  %v2005_v32 = vpack.c.bf16 %v1989_v35, %v1973_v39  ;;  %v9409_v2 = vpop.f32.mrf.mxu1  ;;  %v1415_v11 = vrot.slane %v9334_v3, %v9205_v31  ;;  %v1423_v26 = vrot.slane %v9334_v3, %v9208_v17  ;;  %v8355_v37 = vld [vmem:[%s10470_s12 + $0x288] sm:$0xff]  }
 0xf4d   :  { %v1992_v38 = vmax.f32 %v1836_v21, 0.0  ;;  %v1994_v40 = vmax.f32 %v1879_v23, 0.0  ;;  %v8352_v23 = vld [vmem:[%s10470_s12 + $0x248] sm:$0xff]  }
 0xf4e   :  { %v1834_v35 = vadd.f32 %v9311_v60, %v1415_v11  ;;  %v1877_v39 = vadd.f32 %v9316_v61, %v1423_v26  ;;  %v8357_v60 = vld [vmem:[%s10470_s12 + $0x2c0] sm:$0xff]  }
 0xf4f   :  { %7626 = vmatpush3.bf16.msra.mxu0 %v8310_v15  ;;  %7648 = vmatpush3.bf16.msra.mxu1 %v8311_v47  ;;  %v1978_v15 = vmax.f32 %v1875_v55, 0.0  ;;  %v8332_v47 = vld [vmem:[%s10470_s12 + $0x270] sm:$0xff]   ;;  %v1435_v55 = vrot.slane %v9334_v3, %v9224_v44 }
 0xf50   :  { %7627 = vmatprep.subr.bf16.mxu0 %v8312_v48  ;;  %7649 = vmatprep.subr.bf16.mxu1 %v8313_v50  ;;  %v2008_v48 = vpack.c.bf16 %v1992_v38, %v1976_v43  ;;  %v8333_v50 = vld [vmem:[%s10470_s12 + $0x2f0] sm:$0xff]   ;;  %v8356_v38 = vld [vmem:[%s10470_s12 + $0x240] sm:$0xff]   ;;  %v1873_v43 = vadd.f32 %v9282_v34, %v1423_v26  ;;  %v1991_v61 = vmax.f32 %v1834_v35, 0.0  ;;  %v8376_v26 = vld [vmem:[%s10470_s12 + $0x358] sm:$0xff]  }
 0xf51   :  { %v2010_v24 = vpack.c.bf16 %v1994_v40, %v1978_v15  ;;  %v1443_v40 = vrot.slane %v9334_v3, %v9227_v45  ;;  %v8379_v35 = vld [vmem:[%s10470_s12 + $0x398] sm:$0xff]  }
 0xf53   :  { %7628 = vmatpush3.bf16.msra.mxu0 %v8314_v51  ;;  %7650 = vmatpush3.bf16.msra.mxu1 %v8315_v53  ;;  %v8334_v51 = vld [vmem:[%s10470_s12 + $0x230] sm:$0xff]   ;;  %v8336_v53 = vld [vmem:[%s10470_s12 + $0x268] sm:$0xff]  }
 0xf54   :  { %7629 = vmatprep.subr.bf16.mxu0 %v8316_v56  ;;  %7651 = vmatprep.subr.bf16.mxu1 %v8317_v57  ;;  %v8337_v56 = vld [vmem:[%s10470_s12 + $0x2e8] sm:$0xff]  }
 0xf55   :  { %v8338_v57 = vld [vmem:[%s10470_s12 + $0x228] sm:$0xff]  }
 0xf57   :  { %7630 = vmatpush3.bf16.msra.mxu0 %v8318_v28  ;;  %7652 = vmatpush3.bf16.msra.mxu1 %v8319_v62  ;;  %v8339_v28 = vld [vmem:[%s10470_s12 + $0x2a8] sm:$0xff]   ;;  %v8340_v62 = vld [vmem:[%s10470_s12 + $0x260] sm:$0xff]  }
 0xf58   :  { %7631 = vmatprep.subr.bf16.mxu0 %v8320_v27  ;;  %7653 = vmatprep.subr.bf16.mxu1 %v8321_v63  ;;  %v8341_v27 = vld [vmem:[%s10470_s12 + $0x2e0] sm:$0xff]   ;;  %v9404_v63 = vpop.f32.mrf.mxu0 }
 0xf5a   :  { %v1917_v7 = vpop.f32.mrf.mxu0 }
 0xf5b   :  { %7632 = vmatpush3.bf16.msra.mxu0 %v8322_v5  ;;  %7654 = vmatpush3.bf16.msra.mxu1 %v8323_v33  ;;  %v8344_v5 = vld [vmem:[%s10470_s12 + $0x258] sm:$0xff]   ;;  %v1960_v33 = vpop.f32.mrf.mxu1  ;;  %v1918_v15 = vadd.f32 %v1917_v7, %v1435_v55 }
 0xf5c   :  { %7633 = vmatprep.subr.bf16.mxu0 %v8324_v14  ;;  %7655 = vmatprep.subr.bf16.mxu1 %v8325_v10  ;;  %v8347_v14 = vld [vmem:[%s10470_s12 + $0x298] sm:$0xff]   ;;  %v9432_v10 = vpop.f32.mrf.mxu0  ;;  %v1961_v34 = vadd.f32 %v1960_v33, %v1443_v40  ;;  %v8367_v33 = vld [vmem:[%s10470_s12 + $0x3b0] sm:$0xff]  }
 0xf5d   :  { %v9437_v21 = vpop.f32.mrf.mxu1 }
 0xf5f   :  { %7634 = vmatpush3.bf16.msra.mxu0 %v8326_v25  ;;  %7656 = vmatpush3.bf16.msra.mxu1 %v8327_v18  ;;  %v8353_v25 = vld [vmem:[%s10470_s12 + $0x2c8] sm:$0xff]   ;;  %v1921_v18 = vpop.f32.mrf.mxu0 }
 0xf60   :  { %7663 = vmatprep.subr.bf16.mxu0 %v8328_v54  ;;  %7685 = vmatprep.subr.bf16.mxu1 %v8329_v36  ;;  %v8354_v54 = vld [vmem:[%s10470_s12 + $0x208] sm:$0xff]   ;;  %v1964_v36 = vpop.f32.mrf.mxu1 }
 0xf62   :  { %3161 = vmatmul.mubr.bf16.vlgmr.msra.gmra.mxu0 %v2003_v42  ;;  %3202 = vmatmul.mubr.bf16.vlgmr.msra.gmra.mxu1 %v2005_v32  ;;  %v1922_v42 = vadd.f32 %v1921_v18, %v1435_v55  ;;  %v8358_v32 = vld [vmem:[%s10470_s12 + $0x200] sm:$0xff]   ;;  %v8377_v18 = vld [vmem:[%s10470_s12 + $0x3d8] sm:$0xff]   ;;  %v8380_v55 = vld [vmem:[%s10470_s12 + $0x350] sm:$0xff]  }
 0xf63   :  { %7664 = vmatpush3.bf16.msra.mxu0 %v8330_v41  ;;  %3242 = vmatprep.mubr.bf16.mxu0 %v2008_v48  ;;  %v1830_v41 = vadd.f32 %v9277_v46, %v1415_v11  ;;  %v8360_v46 = vld [vmem:[%s10470_s12 + $0x378] sm:$0xff]   ;;  %v1993_v48 = vmax.f32 %v1877_v39, 0.0  ;;  %v8375_v11 = vld [vmem:[%s10470_s12 + $0x3a0] sm:$0xff]   ;;  %v8384_v39 = vld [vmem:[%s10470_s12 + $0x348] sm:$0xff]  }
 0xf64   :  { %7686 = vmatpush3.bf16.msra.mxu1 %v8331_v12  ;;  %3283 = vmatprep.mubr.bf16.mxu1 %v2010_v24  ;;  %v1965_v12 = vadd.f32 %v1964_v36, %v1443_v40  ;;  %v8381_v36 = vld [vmem:[%s10470_s12 + $0x3d0] sm:$0xff]   ;;  %v8385_v40 = vld [vmem:[%s10470_s12 + $0x3c8] sm:$0xff]  }
 0xf65   :  { %7665 = vmatprep.subr.bf16.mxu0 %v8332_v47  ;;  %7687 = vmatprep.subr.bf16.mxu1 %v8333_v50  ;;  %v8359_v47 = vld [vmem:[%s10470_s12 + $0x280] sm:$0xff]   ;;  %v8361_v50 = vld [vmem:[%s10470_s12 + $0x3f8] sm:$0xff]   ;;  %v1975_v24 = vmax.f32 %v1830_v41, 0.0  ;;  %v1439_v41 = vrot.slane %v9334_v3, %v9309_v59 }
 0xf67   :  { %7666 = vmatpush3.bf16.msra.mxu0 %v8334_v51  ;;  %v1996_v51 = vmax.f32 %v1922_v42, 0.0  ;;  %v8386_v42 = vld [vmem:[%s10470_s12 + $0x308] sm:$0xff]  }
 0xf68   :  { %7688 = vmatpush3.bf16.msra.mxu1 %v8335_v52  ;;  %7667 = vmatprep.subr.bf16.mxu0 %v8336_v53  ;;  %v1977_v52 = vmax.f32 %v1873_v43, 0.0  ;;  %v1998_v53 = vmax.f32 %v1965_v12, 0.0  ;;  %v8387_v12 = vld [vmem:[%s10470_s12 + $0x388] sm:$0xff]  }
 0xf69   :  { %7689 = vmatprep.subr.bf16.mxu1 %v8337_v56  ;;  %v8362_v56 = vld [vmem:[%s10470_s12 + $0x338] sm:$0xff]  }
 0xf6b   :  { %7668 = vmatpush3.bf16.msra.mxu0 %v8338_v57  ;;  %v2007_v57 = vpack.c.bf16 %v1991_v61, %v1975_v24  ;;  %v1963_v61 = vadd.f32 %v9437_v21, %v1439_v41  ;;  %v8391_v21 = vld [vmem:[%s10470_s12 + $0x380] sm:$0xff]  }
 0xf6c   :  { %7690 = vmatpush3.bf16.msra.mxu1 %v8339_v28  ;;  %7669 = vmatprep.subr.bf16.mxu0 %v8340_v62  ;;  %v1980_v28 = vmax.f32 %v1918_v15, 0.0  ;;  %v8363_v62 = vld [vmem:[%s10470_s12 + $0x3b8] sm:$0xff]  }
 0xf6d   :  { %7691 = vmatprep.subr.bf16.mxu1 %v8341_v27  ;;  %v2009_v27 = vpack.c.bf16 %v1993_v48, %v1977_v52  ;;  %v1997_v48 = vmax.f32 %v1963_v61, 0.0 }
 0xf6f   :  { %7670 = vmatpush3.bf16.msra.mxu0 %v8342_v1  ;;  %v1982_v1 = vmax.f32 %v1961_v34, 0.0 }
 0xf70   :  { %7692 = vmatpush3.bf16.msra.mxu1 %v8343_v4  ;;  %7671 = vmatprep.subr.bf16.mxu0 %v8344_v5  ;;  %v8364_v4 = vld [vmem:[%s10470_s12 + $0x370] sm:$0xff]   ;;  %v2012_v5 = vpack.c.bf16 %v1996_v51, %v1980_v28 }
 0xf71   :  { %7693 = vmatprep.subr.bf16.mxu1 %v8345_v6  ;;  %v8365_v6 = vld [vmem:[%s10470_s12 + $0x3f0] sm:$0xff]   ;;  %v2014_v7 = vpack.c.bf16 %v1998_v53, %v1982_v1 }
 0xf73   :  { %7672 = vmatpush3.bf16.msra.mxu0 %v8346_v13  ;;  %v8366_v13 = vld [vmem:[%s10470_s12 + $0x330] sm:$0xff]  }
 0xf74   :  { %7694 = vmatpush3.bf16.msra.mxu1 %v8347_v14  ;;  %7673 = vmatprep.subr.bf16.mxu0 %v8348_v16  ;;  %v8368_v14 = vld [vmem:[%s10470_s12 + $0x368] sm:$0xff]  }
 0xf75   :  { %7695 = vmatprep.subr.bf16.mxu1 %v8349_v19  ;;  %v8369_v16 = vld [vmem:[%s10470_s12 + $0x3e8] sm:$0xff]  }
 0xf76   :  { %v8370_v19 = vld [vmem:[%s10470_s12 + $0x328] sm:$0xff]  }
 0xf77   :  { %7674 = vmatpush3.bf16.msra.mxu0 %v8350_v20  ;;  %v8371_v20 = vld [vmem:[%s10470_s12 + $0x3a8] sm:$0xff]  }
 0xf78   :  { %7696 = vmatpush3.bf16.msra.mxu1 %v8351_v22  ;;  %7675 = vmatprep.subr.bf16.mxu0 %v8352_v23  ;;  %v8372_v22 = vld [vmem:[%s10470_s12 + $0x360] sm:$0xff]  }
 0xf79   :  { %7697 = vmatprep.subr.bf16.mxu1 %v8353_v25  ;;  %v8373_v23 = vld [vmem:[%s10470_s12 + $0x3e0] sm:$0xff]  }
 0xf7a   :  { %v8374_v25 = vld [vmem:[%s10470_s12 + $0x320] sm:$0xff]  }
 0xf7b   :  { %7676 = vmatpush3.bf16.msra.mxu0 %v8354_v54  ;;  %v8378_v54 = vld [vmem:[%s10470_s12 + $0x318] sm:$0xff]  }
 0xf7c   :  { %7698 = vmatpush3.bf16.msra.mxu1 %v8355_v37  ;;  %7677 = vmatprep.subr.bf16.mxu0 %v8356_v38  ;;  %v8382_v37 = vld [vmem:[%s10470_s12 + $0x310] sm:$0xff]  }
 0xf7d   :  { %7699 = vmatprep.subr.bf16.mxu1 %v8357_v60  ;;  %v8383_v38 = vld [vmem:[%s10470_s12 + $0x390] sm:$0xff]   ;;  %v1431_v60 = vrot.slane %v9334_v3, %v9306_v58  ;;  %v8389_v3 = vld [vmem:[%s10470_s12 + $0x3c0] sm:$0xff]  }
 0xf7f   :  { %7678 = vmatpush3.bf16.msra.mxu0 %v8358_v32  ;;  %v1920_v43 = vadd.f32 %v9432_v10, %v1431_v60  ;;  %v8388_v32 = vld [vmem:[%s10470_s12 + $0x340] sm:$0xff]   ;;  %v1916_v15 = vadd.f32 %v9404_v63, %v1431_v60  ;;  %v1959_v10 = vadd.f32 %v9409_v2, %v1439_v41 }
 0xf80   :  { %7700 = vmatpush3.bf16.msra.mxu1 %v8359_v47  ;;  %7707 = vmatprep.subr.bf16.mxu0 %v8360_v46  ;;  %v8390_v47 = vld [vmem:[%s10470_s12 + $0x300] sm:$0xff]  }
 0xf81   :  { %7729 = vmatprep.subr.bf16.mxu1 %v8361_v50  ;;  %v1995_v46 = vmax.f32 %v1920_v43, 0.0  ;;  %v1979_v34 = vmax.f32 %v1916_v15, 0.0  ;;  %v1981_v50 = vmax.f32 %v1959_v10, 0.0 }
 0xf82   :  { %3243 = vmatmul.mubr.bf16.vlgmr.msra.gmra.mxu0 %v2007_v57 }
 0xf83   :  { %3284 = vmatmul.mubr.bf16.vlgmr.msra.gmra.mxu1 %v2009_v27  ;;  %7708 = vmatpush3.bf16.msra.mxu0 %v8362_v56  ;;  %v2011_v63 = vpack.c.bf16 %v1995_v46, %v1979_v34  ;;  %v2013_v2 = vpack.c.bf16 %v1997_v48, %v1981_v50 }
 0xf84   :  { %3324 = vmatprep.mubr.bf16.mxu0 %v2012_v5  ;;  %7730 = vmatpush3.bf16.msra.mxu1 %v8363_v62 }
 0xf85   :  { %3365 = vmatprep.mubr.bf16.mxu1 %v2014_v7  ;;  %7709 = vmatprep.subr.bf16.mxu0 %v8364_v4 }
 0xf86   :  { %7731 = vmatprep.subr.bf16.mxu1 %v8365_v6 }
 0xf87   :  { %7710 = vmatpush3.bf16.msra.mxu0 %v8366_v13 }
 0xf88   :  { %7732 = vmatpush3.bf16.msra.mxu1 %v8367_v33  ;;  %7711 = vmatprep.subr.bf16.mxu0 %v8368_v14  ;;  %v6888_v14 = vld [vmem:[%s10474_s13] ss:$0 sm:$0xff] }
 0xf89   :  { %7733 = vmatprep.subr.bf16.mxu1 %v8369_v16 }
 0xf8b   :  { %7712 = vmatpush3.bf16.msra.mxu0 %v8370_v19 }
 0xf8c   :  { %7734 = vmatpush3.bf16.msra.mxu1 %v8371_v20  ;;  %7713 = vmatprep.subr.bf16.mxu0 %v8372_v22 }
 0xf8d   :  { %7735 = vmatprep.subr.bf16.mxu1 %v8373_v23 }
 0xf8f   :  { %7714 = vmatpush3.bf16.msra.mxu0 %v8374_v25 }
 0xf90   :  { %7736 = vmatpush3.bf16.msra.mxu1 %v8375_v11  ;;  %7715 = vmatprep.subr.bf16.mxu0 %v8376_v26 }
 0xf91   :  { %7737 = vmatprep.subr.bf16.mxu1 %v8377_v18 }
 0xf93   :  { %7716 = vmatpush3.bf16.msra.mxu0 %v8378_v54 }
 0xf94   :  { %7738 = vmatpush3.bf16.msra.mxu1 %v8379_v35  ;;  %7717 = vmatprep.subr.bf16.mxu0 %v8380_v55 }
 0xf95   :  { %7739 = vmatprep.subr.bf16.mxu1 %v8381_v36 }
 0xf97   :  { %7718 = vmatpush3.bf16.msra.mxu0 %v8382_v37 }
 0xf98   :  { %7740 = vmatpush3.bf16.msra.mxu1 %v8383_v38  ;;  %7719 = vmatprep.subr.bf16.mxu0 %v8384_v39 }
 0xf99   :  { %7741 = vmatprep.subr.bf16.mxu1 %v8385_v40 }
 0xf9b   :  { %7720 = vmatpush3.bf16.msra.mxu0 %v8386_v42 }
 0xf9c   :  { %7742 = vmatpush3.bf16.msra.mxu1 %v8387_v12  ;;  %7721 = vmatprep.subr.bf16.mxu0 %v8388_v32 }
 0xf9d   :  { %7743 = vmatprep.subr.bf16.mxu1 %v8389_v3 }
 0xf9f   :  { %7722 = vmatpush3.bf16.msra.mxu0 %v8390_v47 }
 0xfa0   :  { %7744 = vmatpush3.bf16.msra.mxu1 %v8391_v21  ;;  %8109 = vmatprep.subr.bf16.mxu0 %v8602_v0 }
 0xfa1   :  { %8117 = vmatprep.subr.bf16.mxu1 %v8602_v0 }
 0xfa2   :  { %3325 = vmatmul.mubr.bf16.vlgmr.msra.gmra.mxu0 %v2011_v63 }
 0xfa3   :  { %3366 = vmatmul.mubr.bf16.vlgmr.msra.gmra.mxu1 %v2013_v2  ;;  %8113 = vmatprep.mubr.msk.bf16.mxu0 %vm8603_vm1, %v8602_v0 }
 0xfa4   :  { %8119 = vmatprep.mubr.msk.bf16.mxu1 %vm8603_vm1, %v8602_v0 }
0x1002   :  { %v7591_v24 = vpop.f32.mrf.mxu0  ;;  %v7613_v51 = vpop.f32.mrf.mxu1 }
0x1004   :  { %v7592_v52 = vpop.f32.mrf.mxu0  ;;  %v7614_v53 = vpop.f32.mrf.mxu1 }
0x1005   :  { %v7593_v33 = vadd.f32 %v7592_v52, %v7591_v24  ;;  %v7615_v11 = vadd.f32 %v7614_v53, %v7613_v51 }
0x1006   :  { %v7594_v56 = vpop.f32.mrf.mxu0  ;;  %v7616_v57 = vpop.f32.mrf.mxu1 }
0x1007   :  { %v3081_v20 = vadd.f32 %v7593_v33, %v6888_v14 }
0x1008   :  { %v7595_v28 = vpop.f32.mrf.mxu0  ;;  %v7617_v27 = vpop.f32.mrf.mxu1 }
0x1009   :  { %v7596_v22 = vadd.f32 %v7595_v28, %v7594_v56  ;;  %v3122_v18 = vadd.f32 %v7615_v11, %v3081_v20  ;;  %v7618_v36 = vadd.f32 %v7617_v27, %v7616_v57 }
0x100b   :  { %v3084_v54 = vadd.f32 %v7596_v22, %v6888_v14 }
0x100d   :  { %v3125_v39 = vadd.f32 %v7618_v36, %v3084_v54  ;;  %v8393_v54 = vld [vmem:[%s10497_s4 + $0x10] sm:$0xff]  }
0x1022   :  { %v7635_v62 = vpop.f32.mrf.mxu0  ;;  %v7657_v1 = vpop.f32.mrf.mxu1 }
0x1024   :  { %v7636_v4 = vpop.f32.mrf.mxu0  ;;  %v7658_v5 = vpop.f32.mrf.mxu1 }
0x1025   :  { %v7637_v26 = vadd.f32 %v7636_v4, %v7635_v62  ;;  %v7659_v40 = vadd.f32 %v7658_v5, %v7657_v1 }
0x1026   :  { %v7638_v6 = vpop.f32.mrf.mxu0  ;;  %v7660_v7 = vpop.f32.mrf.mxu1 }
0x1027   :  { %v3163_v37 = vadd.f32 %v7637_v26, %v3122_v18 }
0x1028   :  { %v7639_v13 = vpop.f32.mrf.mxu0  ;;  %v7661_v19 = vpop.f32.mrf.mxu1 }
0x1029   :  { %v7640_v38 = vadd.f32 %v7639_v13, %v7638_v6  ;;  %v3204_v43 = vadd.f32 %v7659_v40, %v3163_v37  ;;  %v7662_v32 = vadd.f32 %v7661_v19, %v7660_v7 }
0x102b   :  { %v3166_v12 = vadd.f32 %v7640_v38, %v3125_v39 }
0x102d   :  { %v3207_v47 = vadd.f32 %v7662_v32, %v3166_v12  ;;  %v7018_v32 = vld [vmem:[%s10476_s15] ss:$0 sm:$0xff] }
0x1042   :  { %v7679_v16 = vpop.f32.mrf.mxu0 }
0x1043   :  { %v7701_v23 = vpop.f32.mrf.mxu1 }
0x1044   :  { %v7680_v25 = vpop.f32.mrf.mxu0 }
0x1045   :  { %v7702_v35 = vpop.f32.mrf.mxu1  ;;  %v7681_v60 = vadd.f32 %v7680_v25, %v7679_v16 }
0x1046   :  { %v7682_v55 = vpop.f32.mrf.mxu0  ;;  %v7703_v46 = vadd.f32 %v7702_v35, %v7701_v23 }
0x1047   :  { %v7704_v41 = vpop.f32.mrf.mxu1  ;;  %v3245_v61 = vadd.f32 %v7681_v60, %v3204_v43 }
0x1048   :  { %v7683_v42 = vpop.f32.mrf.mxu0 }
0x1049   :  { %v7684_v3 = vadd.f32 %v7683_v42, %v7682_v55  ;;  %v7705_v15 = vpop.f32.mrf.mxu1  ;;  %v3286_v34 = vadd.f32 %v7703_v46, %v3245_v61 }
0x104a   :  { %v7706_v51 = vadd.f32 %v7705_v15, %v7704_v41  ;;  %v7017_v41 = vld [vmem:[%s10475_s14] ss:$0 sm:$0xff] }
0x104b   :  { %v3248_v50 = vadd.f32 %v7684_v3, %v3207_v47  ;;  %v7024_v47 = vld [vmem:[%s10466_s5 + $0x1] ss:$0 sm:$0xff]  ;;  %s10498_s5 = smov 112  }
0x104d   :  { %v3289_v28 = vadd.f32 %v7706_v51, %v3248_v50 }
0x1062   :  { %v7723_v10 = vpop.f32.mrf.mxu0 }
0x1063   :  { %v7745_v21 = vpop.f32.mrf.mxu1 }
0x1064   :  { %v7724_v48 = vpop.f32.mrf.mxu0 }
0x1065   :  { %v7725_v63 = vadd.f32 %v7724_v48, %v7723_v10  ;;  %v7746_v2 = vpop.f32.mrf.mxu1 }
0x1066   :  { %v7726_v24 = vpop.f32.mrf.mxu0  ;;  %v7747_v53 = vadd.f32 %v7746_v2, %v7745_v21 }
0x1067   :  { %v3327_v52 = vadd.f32 %v7725_v63, %v3286_v34  ;;  %v7748_v56 = vpop.f32.mrf.mxu1 }
0x1068   :  { %v7727_v57 = vpop.f32.mrf.mxu0 }
0x1069   :  { %v3368_v62 = vadd.f32 %v7747_v53, %v3327_v52  ;;  %v7728_v27 = vadd.f32 %v7727_v57, %v7726_v24  ;;  %v7749_v1 = vpop.f32.mrf.mxu1 }
0x106a   :  { %v7750_v5 = vadd.f32 %v7749_v1, %v7748_v56 }
0x106b   :  { %v3330_v4 = vadd.f32 %v7728_v27, %v3289_v28  ;;  %v3374_v6 = vadd.f32 %v3368_v62, %v9016_v8 }
0x106d   :  { %v3371_v7 = vadd.f32 %v7750_v5, %v3330_v4  ;;  %v3378_v13 = vsel %vm150_vm3, %v3374_v6, 0.0 }
0x106e   :  { %3379 = vadd.xlane.f32.xlu1 %v3378_v13 }
0x106f   :  { %v3375_v33 = vadd.f32 %v3371_v7, %v9018_v9  ;;  %v8392_v9 = vld [vmem:[%s10497_s4 + $0x18] sm:$0xff]  }
0x1070   :  { %8110 = vmatpush3.bf16.msra.mxu0 %v8392_v9 }
0x1071   :  { %v3381_v14 = vsel %vm150_vm3, %v3375_v33, 0.0  ;;  %8111 = vmatprep.subr.bf16.mxu0 %v8602_v0 }
0x1072   :  { %3382 = vadd.xlane.f32.xlu0 %v3381_v14 }
0x1074   :  { %8112 = vmatpush3.bf16.msra.mxu0 %v8393_v54 }
0x1075   :  { %8123 = vmatprep.subr.bf16.mxu0 %v8602_v0 }
0x10f7   :  { %v3380_v16 = vpop.xlane.xlu1 %3379 }
0x10f8   :  { %v3384_v19 = vmul.f32 0.03125, %v3380_v16 }
0x10fa   :  { %v3386_v20 = vsub.f32 %v3374_v6, %v3384_v19 }
0x10fb   :  { %v3383_v22 = vpop.xlane.xlu0 %3382 }
0x10fc   :  { %v3385_v23 = vmul.f32 0.03125, %v3383_v22  ;;  %v3388_v25 = vmul.f32 %v3386_v20, %v3386_v20 }
0x10fe   :  { %v3387_v11 = vsub.f32 %v3375_v33, %v3385_v23  ;;  %v3390_v26 = vsel %vm150_vm3, %v3388_v25, 0.0 }
0x10ff   :  { %3391 = vadd.xlane.f32.xlu1 %v3390_v26 }
0x1100   :  { %v3389_v8 = vmul.f32 %v3387_v11, %v3387_v11 }
0x1102   :  { %v3393_v18 = vsel %vm150_vm3, %v3389_v8, 0.0 }
0x1103   :  { %3394 = vadd.xlane.f32.xlu0 %v3393_v18 }
0x1188   :  { %v3392_v35 = vpop.xlane.xlu1 %3391 }
0x1189   :  { %v3396_v55 = vmul.f32 0.03125, %v3392_v35 }
0x118b   :  { %v3398_v36 = vadd.f32 1e-05, %v3396_v55 }
0x118c   :  { %v3395_v37 = vpop.xlane.xlu0 %3394 }
0x118d   :  { %8558 = vrsqrt.f32 %v3398_v36  ;;  %v3397_v38 = vmul.f32 0.03125, %v3395_v37 }
0x118f   :  { %v3399_v39 = vadd.f32 1e-05, %v3397_v38 }
0x1191   :  { %8560 = vrsqrt.f32 %v3399_v39 }
0x119a   :  { %v8559_v40 = vpop.eup %8558 }
0x119b   :  { %v3402_v60 = vmul.f32 %v8559_v40, %v3386_v20 }
0x119d   :  { %v3410_v12 = vmul.f32 %v7017_v41, %v3402_v60 }
0x119e   :  { %v8561_v42 = vpop.eup %8560 }
0x119f   :  { %v3403_v43 = vmul.f32 %v8561_v42, %v3387_v11  ;;  %v9611_v3 = vadd.f32 %v7018_v32, %v3410_v12 }
0x11a1   :  { %v3411_v61 = vmul.f32 %v7017_v41, %v3403_v43 }
0x11a3   :  { %v9613_v15 = vadd.f32 %v7018_v32, %v3411_v61 }
0x11a5   :  { %v3420_v10 = vpack.c.bf16 %v9613_v15, %v9611_v3 }
0x11a7   :  { %8114 = vmatmul.mubr.msk.bf16.vlgmr.msra.gmra.mxu0 %vm150_vm3, %v3420_v10 }
0x11a8   :  { %8125 = vmatprep.mubr.msk.bf16.mxu0 %vm8603_vm1, %v8602_v0 }
0x1267   :  { %v3483_v46 = vpop.f32.mrf.mxu0 }
0x1268   :  { %v3484_v21 = vadd.f32 %v7024_v47, %v3483_v46 }
0x1269   :  { %v8115_v48 = vpop.f32.mrf.mxu0 }
0x126a   :  { %v9623_v34 = vpack.c.bf16 %v3484_v21, %v3484_v21 }
0x126b   :  { %v3486_v50 = vpop.f32.mrf.mxu0 }
0x126c   :  { %v3487_v63 = vadd.f32 %v7024_v47, %v3486_v50  ;;  %3501 = vrot.lane.b32.xlu1 %v9623_v34, %s8604_s1 }
0x126d   :  { %v8116_v2 = vpop.f32.mrf.mxu0 }
0x126e   :  { %v9627_v24 = vpack.c.bf16 %v3487_v63, %v3487_v63 }
0x1270   :  { %3549 = vrot.lane.b32.xlu0 %v9627_v24, %s8604_s1 }
0x12de   :  { %v3502_v51 = vpop.permute.xlu1 %3501 }
0x12df   :  { %v3507_v52 = vsel %vm207_vm4, %v3502_v51, 0 }
0x12e0   :  { %8118 = vmatpush3.bf16.xpose.msra.mxu1 %v3507_v52 }
0x12e1   :  { %8129 = vmatprep.subr.bf16.mxu1 %v8602_v0 }
0x12e2   :  { %v3550_v53 = vpop.permute.xlu0 %3549 }
0x12e3   :  { %v3555_v56 = vsel %vm207_vm4, %v3550_v53, 0 }
0x12e4   :  { %8124 = vmatpush3.bf16.xpose.msra.mxu0 %v3555_v56 }
0x12e5   :  { %8135 = vmatprep.subr.bf16.mxu0 %v8602_v0 }
0x12e7   :  { %8120 = vmatmul.mubr.msk.bf16.vlgmr.msra.gmra.mxu1 %vm207_vm4, %v9623_v34 }
0x12e8   :  { %8131 = vmatprep.mubr.msk.bf16.mxu1 %vm8603_vm1, %v8602_v0 }
0x12eb   :  { %8126 = vmatmul.mubr.msk.bf16.vlgmr.msra.gmra.mxu0 %vm207_vm4, %v9627_v24 }
0x12ec   :  { %8137 = vmatprep.mubr.msk.bf16.mxu0 %vm8603_vm1, %v8602_v0 }
0x13a7   :  { %v3543_v57 = vpop.f32.mrf.mxu1 }
0x13a8   :  { %v3597_v28 = vmul.f32 0.35355338, %v3543_v57 }
0x13a9   :  { %v8121_v62 = vpop.f32.mrf.mxu1 }
0x13aa   :  { %v3599_v27 = vsel %vm207_vm4, %v3597_v28, -inf }
0x13ab   :  { %3600 = vmax.xlane.f32.xlu1 %v3599_v27  ;;  %v3546_v1 = vpop.f32.mrf.mxu1  ;;  %v3591_v4 = vpop.f32.mrf.mxu0 }
0x13ac   :  { %v3598_v5 = vmul.f32 0.35355338, %v3591_v4 }
0x13ad   :  { %v8122_v6 = vpop.f32.mrf.mxu1  ;;  %v8127_v7 = vpop.f32.mrf.mxu0 }
0x13ae   :  { %v3602_v13 = vsel %vm207_vm4, %v3598_v5, -inf }
0x13af   :  { %3603 = vmax.xlane.f32.xlu0 %v3602_v13  ;;  %v3594_v33 = vpop.f32.mrf.mxu0 }
0x13b1   :  { %v8128_v14 = vpop.f32.mrf.mxu0 }
0x13bc   :  { %3623 = vrot.lane.b32.xlu1 %v9623_v34, %s8605_s19 }
0x1434   :  { %v3601_v16 = vpop.xlane.xlu1 %3600 }
0x1435   :  { %v3605_v19 = vsub.f32 %v3597_v28, %v3601_v16 }
0x1437   :  { %v3607_v20 = vmul.f32 1.442695, %v3605_v19 }
0x1438   :  { %v3624_v22 = vpop.permute.xlu1 %3623  ;;  %v3604_v23 = vpop.xlane.xlu0 %3603 }
0x1439   :  { %8562 = vpow2.f32 %v3607_v20  ;;  %v3629_v25 = vsel %vm333_vm5, %v3624_v22, 0  ;;  %v3606_v11 = vsub.f32 %v3598_v5, %v3604_v23 }
0x143a   :  { %8130 = vmatpush3.bf16.msra.mxu1 %v3629_v25 }
0x143b   :  { %v3609_v26 = vmul.f32 1.442695, %v3606_v11  ;;  %8141 = vmatprep.subr.bf16.mxu1 %v8602_v0 }
0x143d   :  { %8564 = vpow2.f32 %v3609_v26 }
0x1446   :  { %v8563_v8 = vpop.eup %8562 }
0x1447   :  { %v3611_v18 = vsel %vm207_vm4, %v8563_v8, 0.0 }
0x1448   :  { %3612 = vadd.xlane.f32.xlu1 %v3611_v18 }
0x144a   :  { %v8565_v9 = vpop.eup %8564 }
0x144b   :  { %v3614_v54 = vsel %vm207_vm4, %v8565_v9, 0.0 }
0x144c   :  { %3615 = vadd.xlane.f32.xlu0 %v3614_v54 }
0x1459   :  { %3722 = vrot.lane.b32.xlu1 %v9623_v34, %s8606_s0 }
0x145d   :  { %3772 = vrot.lane.b32.xlu1 %v9627_v24, %s8606_s0 }
0x1461   :  { %3770 = vrot.lane.b32.xlu1 %v9627_v24, %s8607_s20 }
0x1462   :  { %3671 = vrot.lane.b32.xlu0 %v9627_v24, %s8605_s19 }
0x1466   :  { %3720 = vrot.lane.b32.xlu0 %v9623_v34, %s8607_s20 }
0x14d1   :  { %v3613_v35 = vpop.xlane.xlu1 %3612 }
0x14d2   :  { %8566 = vrcp.f32 %v3613_v35 }
0x14d5   :  { %v3616_v55 = vpop.xlane.xlu0 %3615  ;;  %v3723_v39 = vpop.permute.xlu1 %3722 }
0x14d6   :  { %8568 = vrcp.f32 %v3616_v55  ;;  %v3728_v42 = vsel %vm207_vm4, %v3723_v39, 0 }
0x14d9   :  { %v3672_v36 = vpop.permute.xlu0 %3671  ;;  %v3773_v12 = vpop.permute.xlu1 %3772 }
0x14da   :  { %v3677_v37 = vsel %vm333_vm5, %v3672_v36, 0  ;;  %v3778_v61 = vsel %vm207_vm4, %v3773_v12, 0 }
0x14db   :  { %8136 = vmatpush3.bf16.msra.mxu0 %v3677_v37 }
0x14dc   :  { %8147 = vmatprep.subr.bf16.mxu0 %v8602_v0 }
0x14dd   :  { %v3721_v10 = vpop.permute.xlu0 %3720  ;;  %v3771_v47 = vpop.permute.xlu1 %3770 }
0x14df   :  { %v8567_v38 = vpop.eup %8566 }
0x14e0   :  { %v3619_v40 = vmul.f32 %v8567_v38, %v8563_v8 }
0x14e2   :  { %v3621_v60 = vpack.c.bf16 %v3619_v40, %v3619_v40 }
0x14e3   :  { %v8569_v41 = vpop.eup %8568 }
0x14e4   :  { %8132 = vmatmul.mubr.msk.bf16.vlgmr.msra.gmra.mxu1 %vm207_vm4, %v3621_v60  ;;  %v3620_v43 = vmul.f32 %v8569_v41, %v8565_v9  ;;  %v7030_v60 = vld [vmem:[%s10467_s6 + $0x10] sm:$0xf] }
0x14e5   :  { %8142 = vmatpush3.bf16.xpose.msra.mxu1 %v3728_v42  ;;  %8143 = vmatprep.mubr.msk.bf16.mxu1 %vm8603_vm1, %v8602_v0 }
0x14e6   :  { %v3622_v32 = vpack.c.bf16 %v3620_v43, %v3620_v43  ;;  %8153 = vmatprep.subr.bf16.mxu1 %v8602_v0  ;;  %v3994_v43 = vsel %vm333_vm5, %v7030_v60, 0 }
0x14e8   :  { %8138 = vmatmul.mubr.msk.bf16.vlgmr.msra.gmra.mxu0 %vm207_vm4, %v3622_v32 }
0x14e9   :  { %8148 = vmatpush3.bf16.xpose.msra.mxu0 %v3778_v61  ;;  %8149 = vmatprep.mubr.msk.bf16.mxu0 %vm8603_vm1, %v8602_v0 }
0x14ea   :  { %8159 = vmatprep.subr.bf16.mxu0 %v8602_v0 }
0x14ec   :  { %8144 = vmatmul.mubr.msk.bf16.vlgmr.msra.gmra.mxu1 %vm207_vm4, %v3721_v10 }
0x14ed   :  { %8155 = vmatprep.mubr.msk.bf16.mxu1 %vm8603_vm1, %v8602_v0 }
0x14f0   :  { %8150 = vmatmul.mubr.msk.bf16.vlgmr.msra.gmra.mxu0 %vm207_vm4, %v3771_v47  ;;  %v7031_v47 = vld [vmem:[%s10467_s6 + $0x14] sm:$0xf] }
0x14f1   :  { %8161 = vmatprep.mubr.msk.bf16.mxu0 %vm8603_vm1, %v8602_v0 }
0x15a4   :  { %v9679_v46 = vpop.f32.mrf.mxu1 }
0x15a6   :  { %v8133_v21 = vpop.f32.mrf.mxu1 }
0x15a8   :  { %v3668_v48 = vpop.f32.mrf.mxu1  ;;  %v9681_v50 = vpop.f32.mrf.mxu0 }
0x15a9   :  { %v3719_v63 = vpack.c.bf16 %v9681_v50, %v9679_v46  ;;  %v3947_v46 = vsel %vm333_vm5, %v7031_v47, 0 }
0x15aa   :  { %v8134_v2 = vpop.f32.mrf.mxu1  ;;  %v8139_v51 = vpop.f32.mrf.mxu0 }
0x15ac   :  { %v3716_v52 = vpop.f32.mrf.mxu0  ;;  %v3764_v53 = vpop.f32.mrf.mxu1 }
0x15ad   :  { %v3820_v56 = vmul.f32 0.35355338, %v3764_v53 }
0x15ae   :  { %v8140_v57 = vpop.f32.mrf.mxu0  ;;  %v8145_v28 = vpop.f32.mrf.mxu1 }
0x15af   :  { %v3822_v62 = vsel %vm207_vm4, %v3820_v56, -inf }
0x15b0   :  { %3823 = vmax.xlane.f32.xlu0 %v3822_v62  ;;  %v3767_v27 = vpop.f32.mrf.mxu1  ;;  %v3814_v1 = vpop.f32.mrf.mxu0 }
0x15b1   :  { %v3821_v4 = vmul.f32 0.35355338, %v3814_v1 }
0x15b2   :  { %v8146_v5 = vpop.f32.mrf.mxu1  ;;  %v8151_v6 = vpop.f32.mrf.mxu0 }
0x15b3   :  { %v3825_v7 = vsel %vm207_vm4, %v3821_v4, -inf }
0x15b4   :  { %3826 = vmax.xlane.f32.xlu1 %v3825_v7  ;;  %v3817_v13 = vpop.f32.mrf.mxu0 }
0x15b6   :  { %v8152_v33 = vpop.f32.mrf.mxu0 }
0x15c5   :  { %3846 = vrot.lane.b32.xlu1 %v9623_v34, %s8608_s21 }
0x15c9   :  { %4039 = vrot.lane.b32.xlu1 %v9623_v34, %s8610_s23 }
0x15cd   :  { %4089 = vrot.lane.b32.xlu1 %v9627_v24, %s8610_s23  ;;  %s10500_s23 = smov 72  }
0x15d1   :  { %4087 = vrot.lane.b32.xlu1 %v9627_v24, %s10498_s5 }
0x1639   :  { %v3824_v14 = vpop.xlane.xlu0 %3823 }
0x163a   :  { %v3828_v16 = vsub.f32 %v3820_v56, %v3824_v14 }
0x163c   :  { %v3830_v19 = vmul.f32 1.442695, %v3828_v16 }
0x163d   :  { %v3827_v20 = vpop.xlane.xlu1 %3826 }
0x163e   :  { %8570 = vpow2.f32 %v3830_v19  ;;  %v3829_v22 = vsub.f32 %v3821_v4, %v3827_v20 }
0x1640   :  { %v3832_v23 = vmul.f32 1.442695, %v3829_v22 }
0x1641   :  { %v3847_v25 = vpop.permute.xlu1 %3846 }
0x1642   :  { %8572 = vpow2.f32 %v3832_v23  ;;  %v3852_v11 = vsel %vm333_vm5, %v3847_v25, 0 }
0x1643   :  { %8154 = vmatpush3.bf16.msra.mxu1 %v3852_v11 }
0x1644   :  { %8165 = vmatprep.subr.bf16.mxu1 %v8602_v0 }
0x1645   :  { %v4040_v12 = vpop.permute.xlu1 %4039 }
0x1646   :  { %v4045_v53 = vsel %vm207_vm4, %v4040_v12, 0 }
0x1649   :  { %v4090_v32 = vpop.permute.xlu1 %4089 }
0x164a   :  { %v4095_v61 = vsel %vm207_vm4, %v4090_v32, 0 }
0x164b   :  { %v8571_v26 = vpop.eup %8570 }
0x164c   :  { %v3834_v8 = vsel %vm207_vm4, %v8571_v26, 0.0 }
0x164d   :  { %3835 = vadd.xlane.f32.xlu0 %v3834_v8  ;;  %v4088_v10 = vpop.permute.xlu1 %4087 }
0x164f   :  { %v8573_v18 = vpop.eup %8572 }
0x1650   :  { %v3837_v9 = vsel %vm207_vm4, %v8573_v18, 0.0 }
0x1651   :  { %3838 = vadd.xlane.f32.xlu0 %v3837_v9 }
0x1667   :  { %3894 = vrot.lane.b32.xlu0 %v9627_v24, %s8608_s21  ;;  %s10499_s21 = smov 48  }
0x166b   :  { %4037 = vrot.lane.b32.xlu0 %v9623_v34, %s10498_s5 }
0x16d6   :  { %v3836_v54 = vpop.xlane.xlu0 %3835 }
0x16d7   :  { %8574 = vrcp.f32 %v3836_v54 }
0x16da   :  { %v3839_v35 = vpop.xlane.xlu0 %3838 }
0x16db   :  { %8576 = vrcp.f32 %v3839_v35 }
0x16de   :  { %v3895_v55 = vpop.permute.xlu0 %3894 }
0x16df   :  { %v3900_v36 = vsel %vm333_vm5, %v3895_v55, 0 }
0x16e0   :  { %8160 = vmatpush3.bf16.msra.mxu0 %v3900_v36 }
0x16e1   :  { %8171 = vmatprep.subr.bf16.mxu0 %v8602_v0 }
0x16e2   :  { %v4038_v62 = vpop.permute.xlu0 %4037 }
0x16e4   :  { %v8575_v37 = vpop.eup %8574 }
0x16e5   :  { %v3842_v38 = vmul.f32 %v8575_v37, %v8571_v26 }
0x16e7   :  { %v3844_v39 = vpack.c.bf16 %v3842_v38, %v3842_v38 }
0x16e8   :  { %v8577_v40 = vpop.eup %8576 }
0x16e9   :  { %8156 = vmatmul.mubr.msk.bf16.vlgmr.msra.gmra.mxu1 %vm207_vm4, %v3844_v39  ;;  %v3843_v41 = vmul.f32 %v8577_v40, %v8573_v18 }
0x16ea   :  { %8167 = vmatprep.mubr.msk.bf16.mxu1 %vm8603_vm1, %v8602_v0  ;;  %8166 = vmatpush3.bf16.msra.mxu1 %v3947_v46 }
0x16eb   :  { %v3845_v42 = vpack.c.bf16 %v3843_v41, %v3843_v41  ;;  %8177 = vmatprep.subr.bf16.mxu1 %v8602_v0 }
0x16ed   :  { %8162 = vmatmul.mubr.msk.bf16.vlgmr.msra.gmra.mxu0 %vm207_vm4, %v3845_v42 }
0x16ee   :  { %8172 = vmatpush3.bf16.msra.mxu0 %v3994_v43  ;;  %8173 = vmatprep.mubr.msk.bf16.mxu0 %vm8603_vm1, %v8602_v0 }
0x16ef   :  { %8183 = vmatprep.subr.bf16.mxu0 %v8602_v0 }
0x16f5   :  { %8174 = vmatmul.mubr.msk.bf16.vlgmr.msra.gmra.mxu0 %vm207_vm4, %v3719_v63 }
0x16f6   :  { %8184 = vmatpush3.bf16.xpose.msra.mxu0 %v4095_v61  ;;  %8185 = vmatprep.mubr.msk.bf16.mxu0 %vm8603_vm1, %v8602_v0 }
0x16f7   :  { %8195 = vmatprep.subr.bf16.mxu0 %v8602_v0 }
0x16fd   :  { %8186 = vmatmul.mubr.msk.bf16.vlgmr.msra.gmra.mxu0 %vm207_vm4, %v4088_v10 }
0x16fe   :  { %8197 = vmatprep.mubr.msk.bf16.mxu0 %vm8603_vm1, %v8602_v0 }
0x17a9   :  { %v3888_v21 = vpop.f32.mrf.mxu1 }
0x17ab   :  { %v8157_v48 = vpop.f32.mrf.mxu1 }
0x17ad   :  { %v3891_v50 = vpop.f32.mrf.mxu1  ;;  %v3936_v63 = vpop.f32.mrf.mxu0 }
0x17ae   :  { %v3942_v2 = vpack.c.bf16 %v3936_v63, %v3888_v21 }
0x17af   :  { %v8158_v51 = vpop.f32.mrf.mxu1  ;;  %v8163_v52 = vpop.f32.mrf.mxu0 }
0x17b0   :  { %8168 = vmatmul.mubr.msk.bf16.vlgmr.msra.gmra.mxu1 %vm207_vm4, %v3942_v2  ;;  %v7032_v52 = vld [vmem:[%s10467_s6 + $0x18] sm:$0xf] }
0x17b1   :  { %8178 = vmatpush3.bf16.xpose.msra.mxu1 %v4045_v53  ;;  %v3939_v56 = vpop.f32.mrf.mxu0  ;;  %8179 = vmatprep.mubr.msk.bf16.mxu1 %vm8603_vm1, %v8602_v0  ;;  %v4264_v53 = vsel %vm333_vm5, %v7032_v52, 0 }
0x17b2   :  { %8189 = vmatprep.subr.bf16.mxu1 %v8602_v0 }
0x17b3   :  { %v8164_v57 = vpop.f32.mrf.mxu0 }
0x17b5   :  { %v9737_v28 = vpop.f32.mrf.mxu0 }
0x17b7   :  { %v8175_v27 = vpop.f32.mrf.mxu0 }
0x17b8   :  { %8180 = vmatmul.mubr.msk.bf16.vlgmr.msra.gmra.mxu1 %vm207_vm4, %v4038_v62 }
0x17b9   :  { %v9740_v1 = vpop.f32.mrf.mxu0  ;;  %8191 = vmatprep.mubr.msk.bf16.mxu1 %vm8603_vm1, %v8602_v0 }
0x17bb   :  { %v8176_v4 = vpop.f32.mrf.mxu0 }
0x17bd   :  { %v4131_v5 = vpop.f32.mrf.mxu0 }
0x17be   :  { %v4138_v6 = vmul.f32 0.35355338, %v4131_v5 }
0x17bf   :  { %v8187_v7 = vpop.f32.mrf.mxu0 }
0x17c0   :  { %v4142_v13 = vsel %vm207_vm4, %v4138_v6, -inf }
0x17c1   :  { %4143 = vmax.xlane.f32.xlu1 %v4142_v13  ;;  %v4134_v33 = vpop.f32.mrf.mxu0 }
0x17c3   :  { %v8188_v14 = vpop.f32.mrf.mxu0 }
0x17d2   :  { %4163 = vrot.lane.b32.xlu1 %v9623_v34, %s10499_s21 }
0x17d6   :  { %4311 = vrot.lane.b32.xlu1 %v9623_v34, %s10500_s23 }
0x17da   :  { %4361 = vrot.lane.b32.xlu1 %v9627_v24, %s10500_s23 }
0x17de   :  { %4359 = vrot.lane.b32.xlu1 %v9627_v24, %s10501_s3 }
0x184a   :  { %v4144_v16 = vpop.xlane.xlu1 %4143 }
0x184b   :  { %v4146_v22 = vsub.f32 %v4138_v6, %v4144_v16 }
0x184d   :  { %v4149_v23 = vmul.f32 1.442695, %v4146_v22 }
0x184e   :  { %v4164_v19 = vpop.permute.xlu1 %4163 }
0x184f   :  { %v4169_v20 = vsel %vm333_vm5, %v4164_v19, 0  ;;  %8578 = vpow2.f32 %v4149_v23 }
0x1850   :  { %8190 = vmatpush3.bf16.msra.mxu1 %v4169_v20 }
0x1851   :  { %8201 = vmatprep.subr.bf16.mxu1 %v8602_v0 }
0x1852   :  { %v4312_v46 = vpop.permute.xlu1 %4311 }
0x1853   :  { %v4317_v48 = vsel %vm207_vm4, %v4312_v46, 0 }
0x1856   :  { %v4362_v5 = vpop.permute.xlu1 %4361 }
0x1857   :  { %v4367_v20 = vsel %vm207_vm4, %v4362_v5, 0 }
0x185c   :  { %v8579_v55 = vpop.eup %8578 }
0x185d   :  { %v4154_v38 = vsel %vm207_vm4, %v8579_v55, 0.0 }
0x1870   :  { %v9755_v25 = vpop.f32.mrf.mxu1 }
0x1872   :  { %v8169_v11 = vpop.f32.mrf.mxu1 }
0x1874   :  { %v9757_v26 = vpop.f32.mrf.mxu1 }
0x1876   :  { %v8170_v8 = vpop.f32.mrf.mxu1 }
0x1877   :  { %v4360_v8 = vpop.permute.xlu1 %4359 }
0x1878   :  { %v4081_v18 = vpop.f32.mrf.mxu1 }
0x1879   :  { %v4137_v9 = vmul.f32 0.35355338, %v4081_v18 }
0x187a   :  { %v8181_v54 = vpop.f32.mrf.mxu1 }
0x187b   :  { %v4139_v35 = vsel %vm207_vm4, %v4137_v9, -inf }
0x187c   :  { %4140 = vmax.xlane.f32.xlu0 %v4139_v35  ;;  %v4084_v36 = vpop.f32.mrf.mxu1 }
0x187d   :  { %v4031_v36 = vadd.f32 %v9737_v28, %v9755_v25 }
0x187e   :  { %v8182_v37 = vpop.f32.mrf.mxu1 }
0x1880   :  { %4155 = vadd.xlane.f32.xlu0 %v4154_v38 }
0x1905   :  { %v4141_v39 = vpop.xlane.xlu0 %4140 }
0x1906   :  { %v4145_v40 = vsub.f32 %v4137_v9, %v4141_v39 }
0x1908   :  { %v4147_v60 = vmul.f32 1.442695, %v4145_v40  ;;  %v4034_v40 = vadd.f32 %v9740_v1, %v9757_v26 }
0x1909   :  { %v4156_v43 = vpop.xlane.xlu0 %4155 }
0x190a   :  { %8580 = vpow2.f32 %v4147_v60 }
0x190b   :  { %8582 = vrcp.f32 %v4156_v43 }
0x1917   :  { %v8581_v41 = vpop.eup %8580 }
0x1918   :  { %v4151_v42 = vsel %vm207_vm4, %v8581_v41, 0.0  ;;  %v8583_v12 = vpop.eup %8582 }
0x1919   :  { %4152 = vadd.xlane.f32.xlu0 %v4151_v42  ;;  %v4160_v61 = vmul.f32 %v8583_v12, %v8579_v55 }
0x191b   :  { %v4162_v21 = vpack.c.bf16 %v4160_v61, %v4160_v61 }
0x192f   :  { %4211 = vrot.lane.b32.xlu0 %v9627_v24, %s10499_s21 }
0x1933   :  { %4309 = vrot.lane.b32.xlu0 %v9623_v34, %s10501_s3 }
0x19a2   :  { %v4153_v32 = vpop.xlane.xlu0 %4152 }
0x19a3   :  { %8584 = vrcp.f32 %v4153_v32 }
0x19a6   :  { %v4212_v10 = vpop.permute.xlu0 %4211 }
0x19a7   :  { %v4217_v47 = vsel %vm333_vm5, %v4212_v10, 0 }
0x19a8   :  { %8196 = vmatpush3.bf16.msra.mxu0 %v4217_v47 }
0x19a9   :  { %8207 = vmatprep.subr.bf16.mxu0 %v8602_v0 }
0x19aa   :  { %v4310_v2 = vpop.permute.xlu0 %4309 }
0x19ab   :  { %8198 = vmatmul.mubr.msk.bf16.vlgmr.msra.gmra.mxu0 %vm207_vm4, %v4162_v21 }
0x19ac   :  { %8208 = vmatpush3.bf16.xpose.msra.mxu0 %v4317_v48  ;;  %8209 = vmatprep.mubr.msk.bf16.mxu0 %vm8603_vm1, %v8602_v0 }
0x19ad   :  { %8219 = vmatprep.subr.bf16.mxu0 %v8602_v0 }
0x19b0   :  { %v8585_v50 = vpop.eup %8584 }
0x19b1   :  { %v4159_v63 = vmul.f32 %v8585_v50, %v8581_v41 }
0x19b3   :  { %8210 = vmatmul.mubr.msk.bf16.vlgmr.msra.gmra.mxu0 %vm207_vm4, %v4310_v2  ;;  %v4161_v51 = vpack.c.bf16 %v4159_v63, %v4159_v63 }
0x19b4   :  { %8221 = vmatprep.mubr.msk.bf16.mxu0 %vm8603_vm1, %v8602_v0 }
0x19b5   :  { %8192 = vmatmul.mubr.msk.bf16.vlgmr.msra.gmra.mxu1 %vm207_vm4, %v4161_v51  ;;  %v7033_v51 = vld [vmem:[%s10467_s6 + $0x1c] sm:$0xf] }
0x19b6   :  { %8203 = vmatprep.mubr.msk.bf16.mxu1 %vm8603_vm1, %v8602_v0  ;;  %8202 = vmatpush3.bf16.msra.mxu1 %v4264_v53  ;;  %v4536_v52 = vsel %vm333_vm5, %v7033_v51, 0 }
0x19b7   :  { %8213 = vmatprep.subr.bf16.mxu1 %v8602_v0 }
0x1a6b   :  { %v4253_v56 = vpop.f32.mrf.mxu0 }
0x1a6d   :  { %v8199_v57 = vpop.f32.mrf.mxu0 }
0x1a6f   :  { %v4256_v62 = vpop.f32.mrf.mxu0 }
0x1a71   :  { %v8200_v27 = vpop.f32.mrf.mxu0 }
0x1a73   :  { %v4353_v4 = vpop.f32.mrf.mxu0 }
0x1a74   :  { %v4409_v6 = vmul.f32 0.35355338, %v4353_v4 }
0x1a75   :  { %v4205_v7 = vpop.f32.mrf.mxu1  ;;  %v8211_v13 = vpop.f32.mrf.mxu0 }
0x1a76   :  { %v4259_v33 = vpack.c.bf16 %v4253_v56, %v4205_v7  ;;  %v4411_v14 = vsel %vm207_vm4, %v4409_v6, -inf }
0x1a77   :  { %v8193_v16 = vpop.f32.mrf.mxu1  ;;  %4412 = vmax.xlane.f32.xlu0 %v4411_v14  ;;  %v4356_v19 = vpop.f32.mrf.mxu0 }
0x1a78   :  { %8204 = vmatmul.mubr.msk.bf16.vlgmr.msra.gmra.mxu1 %vm207_vm4, %v4259_v33 }
0x1a79   :  { %8214 = vmatpush3.bf16.xpose.msra.mxu1 %v4367_v20  ;;  %v4208_v22 = vpop.f32.mrf.mxu1  ;;  %v8212_v23 = vpop.f32.mrf.mxu0  ;;  %8215 = vmatprep.mubr.msk.bf16.mxu1 %vm8603_vm1, %v8602_v0 }
0x1a7a   :  { %8225 = vmatprep.subr.bf16.mxu1 %v8602_v0  ;;  %v7055_v22 = vld [vmem:[%s10468_s7 + $0x1] ss:$0 sm:$0xff] }
0x1a7b   :  { %v8194_v11 = vpop.f32.mrf.mxu1 }
0x1a80   :  { %8216 = vmatmul.mubr.msk.bf16.vlgmr.msra.gmra.mxu1 %vm207_vm4, %v4360_v8 }
0x1a81   :  { %8227 = vmatprep.mubr.msk.bf16.mxu1 %vm8603_vm1, %v8602_v0 }
0x1b00   :  { %v4413_v18 = vpop.xlane.xlu0 %4412 }
0x1b01   :  { %v4417_v9 = vsub.f32 %v4409_v6, %v4413_v18 }
0x1b03   :  { %v4419_v54 = vmul.f32 1.442695, %v4417_v9 }
0x1b05   :  { %8586 = vpow2.f32 %v4419_v54 }
0x1b12   :  { %v8587_v35 = vpop.eup %8586 }
0x1b13   :  { %v4423_v55 = vsel %vm207_vm4, %v8587_v35, 0.0 }
0x1b14   :  { %4424 = vadd.xlane.f32.xlu0 %v4423_v55 }
0x1b38   :  { %v4300_v37 = vpop.f32.mrf.mxu1 }
0x1b39   :  { %v4307_v38 = vadd.f32 %v4300_v37, %v4031_v36 }
0x1b3a   :  { %v8205_v39 = vpop.f32.mrf.mxu1 }
0x1b3c   :  { %v4303_v60 = vpop.f32.mrf.mxu1 }
0x1b3d   :  { %v4308_v41 = vadd.f32 %v4303_v60, %v4034_v40 }
0x1b3e   :  { %v8206_v42 = vpop.f32.mrf.mxu1 }
0x1b40   :  { %v4403_v43 = vpop.f32.mrf.mxu1 }
0x1b41   :  { %v4410_v12 = vmul.f32 0.35355338, %v4403_v43 }
0x1b42   :  { %v8217_v32 = vpop.f32.mrf.mxu1 }
0x1b43   :  { %v4414_v61 = vsel %vm207_vm4, %v4410_v12, -inf }
0x1b44   :  { %4415 = vmax.xlane.f32.xlu1 %v4414_v61  ;;  %v4406_v10 = vpop.f32.mrf.mxu1 }
0x1b45   :  { %v7084_v10 = vld [vmem:[%s10469_s10 + $0x1c0] sm:$0xff] }
0x1b46   :  { %v8218_v47 = vpop.f32.mrf.mxu1 }
0x1b47   :  { %v7077_v47 = vld [vmem:[%s10469_s10 + $0x188] sm:$0xff] }
0x1b55   :  { %4435 = vrot.lane.b32.xlu1 %v9623_v34, %s10502_s28 }
0x1b9d   :  { %v4425_v28 = vpop.xlane.xlu0 %4424 }
0x1b9e   :  { %8588 = vrcp.f32 %v4425_v28 }
0x1bab   :  { %v8589_v25 = vpop.eup %8588 }
0x1bac   :  { %v4431_v1 = vmul.f32 %v8589_v25, %v8587_v35  ;;  %v7085_v25 = vld [vmem:[%s10469_s10 + $0x1c8] sm:$0xff] }
0x1bae   :  { %v4433_v63 = vpack.c.bf16 %v4431_v1, %v4431_v1  ;;  %v7113_v1 = vcombine.high %v7077_v47, %v7085_v25 }
0x1bcd   :  { %v4416_v46 = vpop.xlane.xlu1 %4415 }
0x1bce   :  { %v4418_v21 = vsub.f32 %v4410_v12, %v4416_v46 }
0x1bd0   :  { %v4421_v26 = vmul.f32 1.442695, %v4418_v21  ;;  %v7112_v21 = vcombine.low %v7077_v47, %v7085_v25  ;;  %v7072_v47 = vld [vmem:[%s10469_s10 + $0x160] sm:$0xff]  ;;  %v7073_v25 = vld [vmem:[%s10469_s10 + $0x168] sm:$0xff] }
0x1bd1   :  { %v4436_v48 = vpop.permute.xlu1 %4435 }
0x1bd2   :  { %8590 = vpow2.f32 %v4421_v26  ;;  %v4441_v50 = vsel %vm333_vm5, %v4436_v48, 0  ;;  %v7060_v26 = vld [vmem:[%s10469_s10 + $0x100] sm:$0xff] }
0x1bd3   :  { %8220 = vmatpush3.bf16.msra.mxu0 %v4441_v50  ;;  %v7068_v48 = vld [vmem:[%s10469_s10 + $0x140] sm:$0xff]  ;;  %v7061_v50 = vld [vmem:[%s10469_s10 + $0x108] sm:$0xff] }
0x1bd4   :  { %8231 = vmatprep.subr.bf16.mxu0 %v8602_v0 }
0x1bd6   :  { %8222 = vmatmul.mubr.msk.bf16.vlgmr.msra.gmra.mxu0 %vm207_vm4, %v4433_v63  ;;  %v7095_v63 = vcombine.high %v7060_v26, %v7068_v48 }
0x1bd7   :  { %8233 = vmatprep.mubr.msk.bf16.mxu0 %vm8603_vm1, %v8602_v0  ;;  %8232 = vmatpush3.bf16.msra.mxu0 %v4536_v52 }
0x1bd8   :  { %4976 = vmatprep.subr.bf16.mxu0 %v7113_v1 }
0x1bdf   :  { %v8591_v34 = vpop.eup %8590 }
0x1be0   :  { %v4426_v2 = vsel %vm207_vm4, %v8591_v34, 0.0 }
0x1be1   :  { %4427 = vadd.xlane.f32.xlu0 %v4426_v2  ;;  %v7094_v2 = vcombine.low %v7060_v26, %v7068_v48  ;;  %v7082_v48 = vld [vmem:[%s10469_s10 + $0x1b0] sm:$0xff] }
0x1bf7   :  { %4483 = vrot.lane.b32.xlu0 %v9627_v24, %s10502_s28 }
0x1c6a   :  { %v4428_v53 = vpop.xlane.xlu0 %4427 }
0x1c6b   :  { %8592 = vrcp.f32 %v4428_v53  ;;  %v7078_v53 = vld [vmem:[%s10469_s10 + $0x190] sm:$0xff] }
0x1c6e   :  { %v4484_v56 = vpop.permute.xlu0 %4483 }
0x1c6f   :  { %v4489_v57 = vsel %vm333_vm5, %v4484_v56, 0  ;;  %v7086_v56 = vld [vmem:[%s10469_s10 + $0x1d0] sm:$0xff] }
0x1c70   :  { %8226 = vmatpush3.bf16.msra.mxu1 %v4489_v57  ;;  %v7079_v57 = vld [vmem:[%s10469_s10 + $0x198] sm:$0xff] }
0x1c78   :  { %v8593_v62 = vpop.eup %8592 }
0x1c79   :  { %v4432_v27 = vmul.f32 %v8593_v62, %v8591_v34  ;;  %v7069_v34 = vld [vmem:[%s10469_s10 + $0x148] sm:$0xff]  ;;  %v7114_v62 = vcombine.low %v7078_v53, %v7086_v56 }
0x1c7a   :  { %v7096_v51 = vcombine.low %v7061_v50, %v7069_v34  ;;  %v7097_v52 = vcombine.high %v7061_v50, %v7069_v34  ;;  %v7090_v50 = vld [vmem:[%s10469_s10 + $0x1f0] sm:$0xff]  ;;  %v7091_v34 = vld [vmem:[%s10469_s10 + $0x1f8] sm:$0xff] }
0x1c7b   :  { %v4434_v4 = vpack.c.bf16 %v4432_v27, %v4432_v27  ;;  %v7115_v27 = vcombine.high %v7078_v53, %v7086_v56  ;;  %v7066_v56 = vld [vmem:[%s10469_s10 + $0x130] sm:$0xff] }
0x1c7d   :  { %8228 = vmatmul.mubr.msk.bf16.vlgmr.msra.gmra.mxu1 %vm207_vm4, %v4434_v4  ;;  %v7087_v4 = vld [vmem:[%s10469_s10 + $0x1d8] sm:$0xff] }
0x1c7e   :  { %4953 = vmatprep.mubr.bf16.mxu1 %v8615_v49 }
0x1c96   :  { %v4477_v24 = vpop.f32.mrf.mxu0 }
0x1c98   :  { %v8223_v5 = vpop.f32.mrf.mxu0 }
0x1c99   :  { %v7117_v5 = vcombine.high %v7079_v57, %v7087_v4 }
0x1c9a   :  { %v4480_v6 = vpop.f32.mrf.mxu0 }
0x1c9c   :  { %v8224_v7 = vpop.f32.mrf.mxu0 }
0x1d3d   :  { %v4525_v13 = vpop.f32.mrf.mxu1 }
0x1d3e   :  { %v4531_v33 = vpack.c.bf16 %v4525_v13, %v4477_v24  ;;  %v7116_v24 = vcombine.low %v7079_v57, %v7087_v4  ;;  %v7074_v57 = vld [vmem:[%s10469_s10 + $0x170] sm:$0xff]  ;;  %v7122_v4 = vcombine.low %v7082_v48, %v7090_v50 }
0x1d3f   :  { %v8229_v14 = vpop.f32.mrf.mxu1 }
0x1d40   :  { %8234 = vmatmul.mubr.msk.bf16.vlgmr.msra.gmra.mxu0 %vm207_vm4, %v4531_v33 }
0x1d41   :  { %v4528_v16 = vpop.f32.mrf.mxu1  ;;  %4996 = vmatprep.mubr.bf16.mxu0 %v8615_v49  ;;  %4977 = vmatpush1.bf16.msra.mxu0 %v7112_v21 }
0x1d42   :  { %4978 = vmatprep.subr.bf16.mxu0 %v7097_v52  ;;  %v7123_v52 = vcombine.high %v7082_v48, %v7090_v50 }
0x1d43   :  { %v8230_v19 = vpop.f32.mrf.mxu1 }
0x1d45   :  { %4979 = vmatpush1.bf16.msra.mxu0 %v7096_v51 }
0x1d46   :  { %5062 = vmatprep.subr.bf16.mxu0 %v7117_v5  ;;  %v7107_v5 = vcombine.high %v7066_v56, %v7074_v57 }
0x1e00   :  { %v4572_v20 = vpop.f32.mrf.mxu0 }
0x1e01   :  { %v4579_v23 = vadd.f32 %v4572_v20, %v4307_v38 }
0x1e02   :  { %v8235_v11 = vpop.f32.mrf.mxu0 }
0x1e03   :  { %v4589_v8 = vadd.f32 %v7055_v22, %v4579_v23 }
0x1e04   :  { %v4575_v18 = vpop.f32.mrf.mxu0 }
0x1e05   :  { %v4580_v9 = vadd.f32 %v4575_v18, %v4308_v41  ;;  %v4591_v54 = vadd.f32 %v4589_v8, %v9611_v3  ;;  %v7059_v18 = vld [vmem:[%s10472_s9 + $0x1] ss:$0 sm:$0xff] }
0x1e06   :  { %v8236_v35 = vpop.f32.mrf.mxu0 }
0x1e07   :  { %v4590_v55 = vadd.f32 %v7055_v22, %v4580_v9  ;;  %v4597_v36 = vsel %vm150_vm3, %v4591_v54, 0.0  ;;  %v7058_v22 = vld [vmem:[%s10471_s8 + $0x1] ss:$0 sm:$0xff]  ;;  %v7070_v35 = vld [vmem:[%s10469_s10 + $0x150] sm:$0xff] }
0x1e08   :  { %4598 = vadd.xlane.f32.xlu1 %v4597_v36  ;;  %v7071_v36 = vld [vmem:[%s10469_s10 + $0x158] sm:$0xff] }
0x1e09   :  { %v4592_v37 = vadd.f32 %v4590_v55, %v9613_v15  ;;  %v7076_v15 = vld [vmem:[%s10469_s10 + $0x180] sm:$0xff]  ;;  %v7063_v55 = vld [vmem:[%s10469_s10 + $0x118] sm:$0xff] }
0x1e0a   :  { %v7111_v28 = vcombine.high %v7076_v15, %v7084_v10  ;;  %v7110_v46 = vcombine.low %v7076_v15, %v7084_v10  ;;  %v7064_v10 = vld [vmem:[%s10469_s10 + $0x120] sm:$0xff] }
0x1e0b   :  { %v4600_v39 = vsel %vm150_vm3, %v4592_v37, 0.0  ;;  %v7103_v1 = vcombine.high %v7064_v10, %v7072_v47 }
0x1e0c   :  { %4601 = vadd.xlane.f32.xlu0 %v4600_v39  ;;  %4933 = vmatprep.subr.bf16.mxu1 %v7111_v28  ;;  %v7065_v28 = vld [vmem:[%s10469_s10 + $0x128] sm:$0xff] }
0x1e0d   :  { %4934 = vmatpush1.bf16.msra.mxu1 %v7110_v46  ;;  %v7105_v26 = vcombine.high %v7065_v28, %v7073_v25  ;;  %v7104_v51 = vcombine.low %v7065_v28, %v7073_v25  ;;  %v8423_v28 = vld [vmem:[%s10470_s12 + $0x4c0] sm:$0xff]  }
0x1e0e   :  { %4935 = vmatprep.subr.bf16.mxu1 %v7095_v63  ;;  %v7083_v63 = vld [vmem:[%s10469_s10 + $0x1b8] sm:$0xff]  ;;  %v8424_v25 = vld [vmem:[%s10470_s12 + $0x400] sm:$0xff]  }
0x1e0f   :  { %v7125_v53 = vcombine.high %v7083_v63, %v7091_v34 }
0x1e11   :  { %4936 = vmatpush1.bf16.msra.mxu1 %v7094_v2  ;;  %v7102_v2 = vcombine.low %v7064_v10, %v7072_v47  ;;  %v8421_v10 = vld [vmem:[%s10470_s12 + $0x488] sm:$0xff]   ;;  %v8422_v47 = vld [vmem:[%s10470_s12 + $0x440] sm:$0xff]  }
0x1e12   :  { %5019 = vmatprep.subr.bf16.mxu1 %v7115_v27  ;;  %v7075_v27 = vld [vmem:[%s10469_s10 + $0x178] sm:$0xff] }
0x1e91   :  { %v4599_v40 = vpop.xlane.xlu1 %4598 }
0x1e92   :  { %v4603_v60 = vmul.f32 0.03125, %v4599_v40 }
0x1e94   :  { %v4605_v42 = vsub.f32 %v4591_v54, %v4603_v60  ;;  %v7062_v54 = vld [vmem:[%s10469_s10 + $0x110] sm:$0xff] }
0x1e95   :  { %v4602_v38 = vpop.xlane.xlu0 %4601  ;;  %v7099_v60 = vcombine.high %v7062_v54, %v7070_v35 }
0x1e96   :  { %v4604_v43 = vmul.f32 0.03125, %v4602_v38  ;;  %v4607_v12 = vmul.f32 %v4605_v42, %v4605_v42  ;;  %v7080_v38 = vld [vmem:[%s10469_s10 + $0x1a0] sm:$0xff] }
0x1e98   :  { %v4606_v32 = vsub.f32 %v4592_v37, %v4604_v43  ;;  %v4609_v41 = vsel %vm150_vm3, %v4607_v12, 0.0  ;;  %v7088_v43 = vld [vmem:[%s10469_s10 + $0x1e0] sm:$0xff]  ;;  %v7081_v12 = vld [vmem:[%s10469_s10 + $0x1a8] sm:$0xff] }
0x1e99   :  { %4610 = vadd.xlane.f32.xlu1 %v4609_v41  ;;  %v7098_v41 = vcombine.low %v7062_v54, %v7070_v35  ;;  %v7118_v46 = vcombine.low %v7080_v38, %v7088_v43  ;;  %v8406_v54 = vld [vmem:[%s10470_s12 + $0x460] sm:$0xff]  }
0x1e9a   :  { %v4608_v3 = vmul.f32 %v4606_v32, %v4606_v32  ;;  %v8407_v35 = vld [vmem:[%s10470_s12 + $0x4e0] sm:$0xff]  }
0x1e9c   :  { %v4612_v61 = vsel %vm150_vm3, %v4608_v3, 0.0  ;;  %v7100_v3 = vcombine.low %v7063_v55, %v7071_v36 }
0x1e9d   :  { %4613 = vadd.xlane.f32.xlu0 %v4612_v61  ;;  %v7119_v61 = vcombine.high %v7080_v38, %v7088_v43  ;;  %v8413_v38 = vld [vmem:[%s10470_s12 + $0x498] sm:$0xff]   ;;  %v8414_v43 = vld [vmem:[%s10470_s12 + $0x450] sm:$0xff]  }
0x1f22   :  { %v4611_v6 = vpop.xlane.xlu1 %4610 }
0x1f23   :  { %v4615_v7 = vmul.f32 0.03125, %v4611_v6 }
0x1f25   :  { %v4617_v13 = vadd.f32 1e-05, %v4615_v7  ;;  %v7106_v7 = vcombine.low %v7066_v56, %v7074_v57 }
0x1f26   :  { %v4614_v33 = vpop.xlane.xlu0 %4613 }
0x1f27   :  { %8594 = vrsqrt.f32 %v4617_v13  ;;  %v4616_v14 = vmul.f32 0.03125, %v4614_v33  ;;  %v8394_v33 = vld [vmem:[%s10470_s12 + $0x478] sm:$0xff]  }
0x1f29   :  { %v4618_v16 = vadd.f32 1e-05, %v4616_v14  ;;  %v8395_v14 = vld [vmem:[%s10470_s12 + $0x4f8] sm:$0xff]  }
0x1f2b   :  { %8596 = vrsqrt.f32 %v4618_v16  ;;  %v8396_v16 = vld [vmem:[%s10470_s12 + $0x438] sm:$0xff]  }
0x1f34   :  { %v8595_v19 = vpop.eup %8594 }
0x1f35   :  { %v4621_v20 = vmul.f32 %v8595_v19, %v4605_v42  ;;  %v7101_v42 = vcombine.high %v7063_v55, %v7071_v36  ;;  %v8397_v19 = vld [vmem:[%s10470_s12 + $0x4b8] sm:$0xff]   ;;  %v8408_v55 = vld [vmem:[%s10470_s12 + $0x420] sm:$0xff]  }
0x1f36   :  { %v8409_v36 = vld [vmem:[%s10470_s12 + $0x4a0] sm:$0xff]  }
0x1f37   :  { %v4629_v11 = vmul.f32 %v7058_v22, %v4621_v20  ;;  %v8398_v20 = vld [vmem:[%s10470_s12 + $0x470] sm:$0xff]  }
0x1f38   :  { %v8597_v23 = vpop.eup %8596 }
0x1f39   :  { %v4622_v8 = vmul.f32 %v8597_v23, %v4606_v32  ;;  %v9881_v37 = vadd.f32 %v7059_v18, %v4629_v11  ;;  %v7089_v32 = vld [vmem:[%s10469_s10 + $0x1e8] sm:$0xff]  ;;  %v8401_v23 = vld [vmem:[%s10470_s12 + $0x4b0] sm:$0xff]  }
0x1f3a   :  { %v7121_v15 = vcombine.high %v7081_v12, %v7089_v32  ;;  %v7120_v21 = vcombine.low %v7081_v12, %v7089_v32  ;;  %v8402_v11 = vld [vmem:[%s10470_s12 + $0x468] sm:$0xff]   ;;  %v8415_v12 = vld [vmem:[%s10470_s12 + $0x4d0] sm:$0xff]  }
0x1f3b   :  { %v4630_v9 = vmul.f32 %v7058_v22, %v4622_v8  ;;  %v8400_v22 = vld [vmem:[%s10470_s12 + $0x430] sm:$0xff]   ;;  %v8403_v8 = vld [vmem:[%s10470_s12 + $0x4e8] sm:$0xff]  }
0x1f3c   :  { %v8416_v32 = vld [vmem:[%s10470_s12 + $0x410] sm:$0xff]  }
0x1f3d   :  { %v9883_v39 = vadd.f32 %v7059_v18, %v4630_v9  ;;  %v8404_v18 = vld [vmem:[%s10470_s12 + $0x428] sm:$0xff]  }
0x1f3e   :  { %v8405_v9 = vld [vmem:[%s10470_s12 + $0x4a8] sm:$0xff]  }
0x1f3f   :  { %v9887_v40 = vpack.c.bf16 %v9883_v39, %v9881_v37 }
0x1f41   :  { %7126 = vmatmul.mubr.msk.bf16.vlgmr.msra.gmra.mxu1 %vm150_vm3, %v9887_v40  ;;  %7127 = vmatmul.mubr.msk.bf16.vlgmr.msra.gmra.mxu0 %vm150_vm3, %v9887_v40 }
0x1f42   :  { %5020 = vmatpush1.bf16.msra.mxu1 %v7114_v62  ;;  %5063 = vmatpush1.bf16.msra.mxu0 %v7116_v24  ;;  %v7067_v62 = vld [vmem:[%s10469_s10 + $0x138] sm:$0xff]  ;;  %v7124_v24 = vcombine.low %v7083_v63, %v7091_v34 }
0x1f43   :  { %5021 = vmatprep.subr.bf16.mxu1 %v7099_v60  ;;  %5064 = vmatprep.subr.bf16.mxu0 %v7101_v42  ;;  %v7109_v6 = vcombine.high %v7067_v62, %v7075_v27  ;;  %v7108_v13 = vcombine.low %v7067_v62, %v7075_v27  ;;  %v8411_v60 = vld [vmem:[%s10470_s12 + $0x4d8] sm:$0xff]  }
0x1f44   :  { %5039 = vmatprep.mubr.bf16.mxu1 %v8615_v49  ;;  %5082 = vmatprep.mubr.bf16.mxu0 %v8615_v49  ;;  %v8412_v42 = vld [vmem:[%s10470_s12 + $0x418] sm:$0xff]  }
0x1f46   :  { %5022 = vmatpush1.bf16.msra.mxu1 %v7098_v41  ;;  %5065 = vmatpush1.bf16.msra.mxu0 %v7100_v3  ;;  %v8417_v41 = vld [vmem:[%s10470_s12 + $0x490] sm:$0xff]   ;;  %v8418_v3 = vld [vmem:[%s10470_s12 + $0x448] sm:$0xff]  }
0x1f47   :  { %5105 = vmatprep.subr.bf16.mxu1 %v7119_v61  ;;  %5148 = vmatprep.subr.bf16.mxu0 %v7121_v15  ;;  %v8419_v61 = vld [vmem:[%s10470_s12 + $0x4c8] sm:$0xff]  }
0x1f48   :  { %v8420_v15 = vld [vmem:[%s10470_s12 + $0x408] sm:$0xff]  }
0x1f49   :  { %7128 = vmatmul.mubr.msk.bf16.vlgmr.msra.gmra.mxu1 %vm150_vm3, %v9887_v40  ;;  %7129 = vmatmul.mubr.msk.bf16.vlgmr.msra.gmra.mxu0 %vm150_vm3, %v9887_v40 }
0x1f4a   :  { %5106 = vmatpush1.bf16.msra.mxu1 %v7118_v46  ;;  %5149 = vmatpush1.bf16.msra.mxu0 %v7120_v21  ;;  %v8425_v46 = vld [vmem:[%s10470_s12 + $0x480] sm:$0xff]   ;;  %v8426_v21 = vld [vmem:[%s10470_s12 + $0x578] sm:$0xff]  }
0x1f4b   :  { %5107 = vmatprep.subr.bf16.mxu1 %v7103_v1  ;;  %5150 = vmatprep.subr.bf16.mxu0 %v7105_v26  ;;  %v8427_v1 = vld [vmem:[%s10470_s12 + $0x5f8] sm:$0xff]   ;;  %v10064_v26 = vld [vmem:[%s10473_s11 + $0x10] sm:$0xff] }
0x1f4c   :  { %5125 = vmatprep.mubr.bf16.mxu1 %v8615_v49  ;;  %5168 = vmatprep.mubr.bf16.mxu0 %v8615_v49  ;;  %v4685_v63 = vrot.slane %v10064_v26, %v9199_v29  ;;  %v4693_v34 = vrot.slane %v10064_v26, %v9202_v30 }
0x1f4e   :  { %5108 = vmatpush1.bf16.msra.mxu1 %v7102_v2  ;;  %5151 = vmatpush1.bf16.msra.mxu0 %v7104_v51  ;;  %v4681_v2 = vrot.slane %v10064_v26, %v9205_v31  ;;  %v4689_v51 = vrot.slane %v10064_v26, %v9208_v17 }
0x1f4f   :  { %5191 = vmatprep.subr.bf16.mxu1 %v7123_v52  ;;  %5234 = vmatprep.subr.bf16.mxu0 %v7125_v53 }
0x1f51   :  { %7130 = vmatmul.mubr.msk.bf16.vlgmr.msra.gmra.mxu1 %vm150_vm3, %v9887_v40  ;;  %7131 = vmatmul.mubr.msk.bf16.vlgmr.msra.gmra.mxu0 %vm150_vm3, %v9887_v40 }
0x1f52   :  { %5192 = vmatpush1.bf16.msra.mxu1 %v7122_v4  ;;  %5235 = vmatpush1.bf16.msra.mxu0 %v7124_v24 }
0x1f53   :  { %5193 = vmatprep.subr.bf16.mxu1 %v7107_v5  ;;  %5236 = vmatprep.subr.bf16.mxu0 %v7109_v6 }
0x1f54   :  { %5211 = vmatprep.mubr.bf16.mxu1 %v8615_v49  ;;  %5254 = vmatprep.mubr.bf16.mxu0 %v8615_v49  ;;  %v8399_v49 = vld [vmem:[%s10470_s12 + $0x4f0] sm:$0xff]  }
0x1f56   :  { %5194 = vmatpush1.bf16.msra.mxu1 %v7106_v7  ;;  %5237 = vmatpush1.bf16.msra.mxu0 %v7108_v13 }
0x1f57   :  { %7794 = vmatprep.subr.bf16.mxu1 %v8394_v33  ;;  %7816 = vmatprep.subr.bf16.mxu0 %v8395_v14 }
0x1f59   :  { %7132 = vmatmul.mubr.msk.bf16.vlgmr.msra.gmra.mxu1 %vm150_vm3, %v9887_v40  ;;  %7133 = vmatmul.mubr.msk.bf16.vlgmr.msra.gmra.mxu0 %vm150_vm3, %v9887_v40  ;;  %v8410_v40 = vld [vmem:[%s10470_s12 + $0x458] sm:$0xff]  }
0x1f5a   :  { %7795 = vmatpush3.bf16.msra.mxu1 %v8396_v16  ;;  %7817 = vmatpush3.bf16.msra.mxu0 %v8397_v19 }
0x1f5b   :  { %7796 = vmatprep.subr.bf16.mxu1 %v8398_v20  ;;  %7818 = vmatprep.subr.bf16.mxu0 %v8399_v49 }
0x1f5e   :  { %7797 = vmatpush3.bf16.msra.mxu1 %v8400_v22  ;;  %7819 = vmatpush3.bf16.msra.mxu0 %v8401_v23  ;;  %v4701_v22 = vrot.slane %v10064_v26, %v9224_v44  ;;  %v4709_v23 = vrot.slane %v10064_v26, %v9227_v45 }
0x1f5f   :  { %7798 = vmatprep.subr.bf16.mxu1 %v8402_v11  ;;  %7820 = vmatprep.subr.bf16.mxu0 %v8403_v8 }
0x1f62   :  { %7799 = vmatpush3.bf16.msra.mxu1 %v8404_v18  ;;  %7821 = vmatpush3.bf16.msra.mxu0 %v8405_v9 }
0x1f63   :  { %7800 = vmatprep.subr.bf16.mxu1 %v8406_v54  ;;  %7822 = vmatprep.subr.bf16.mxu0 %v8407_v35 }
0x1f66   :  { %7801 = vmatpush3.bf16.msra.mxu1 %v8408_v55  ;;  %7823 = vmatpush3.bf16.msra.mxu0 %v8409_v36 }
0x1f67   :  { %7802 = vmatprep.subr.bf16.mxu1 %v8410_v40  ;;  %7824 = vmatprep.subr.bf16.mxu0 %v8411_v60 }
0x1f6a   :  { %7803 = vmatpush3.bf16.msra.mxu1 %v8412_v42  ;;  %7825 = vmatpush3.bf16.msra.mxu0 %v8413_v38  ;;  %v8428_v42 = vld [vmem:[%s10470_s12 + $0x538] sm:$0xff]  }
0x1f6b   :  { %7804 = vmatprep.subr.bf16.mxu1 %v8414_v43  ;;  %7826 = vmatprep.subr.bf16.mxu0 %v8415_v12  ;;  %v8429_v38 = vld [vmem:[%s10470_s12 + $0x5b8] sm:$0xff]  }
0x1f6e   :  { %7805 = vmatpush3.bf16.msra.mxu1 %v8416_v32  ;;  %7827 = vmatpush3.bf16.msra.mxu0 %v8417_v41 }
0x1f6f   :  { %7806 = vmatprep.subr.bf16.mxu1 %v8418_v3  ;;  %7828 = vmatprep.subr.bf16.mxu0 %v8419_v61  ;;  %v8430_v3 = vld [vmem:[%s10470_s12 + $0x570] sm:$0xff]  }
0x1f70   :  { %v8431_v61 = vld [vmem:[%s10470_s12 + $0x5f0] sm:$0xff]  }
0x1f72   :  { %7807 = vmatpush3.bf16.msra.mxu1 %v8420_v15  ;;  %7829 = vmatpush3.bf16.msra.mxu0 %v8421_v10 }
0x1f73   :  { %7808 = vmatprep.subr.bf16.mxu1 %v8422_v47  ;;  %7830 = vmatprep.subr.bf16.mxu0 %v8423_v28 }
0x1f76   :  { %7809 = vmatpush3.bf16.msra.mxu1 %v8424_v25  ;;  %7831 = vmatpush3.bf16.msra.mxu0 %v8425_v46 }
0x1f77   :  { %7838 = vmatprep.subr.bf16.mxu1 %v8426_v21  ;;  %7860 = vmatprep.subr.bf16.mxu0 %v8427_v1  ;;  %v8432_v21 = vld [vmem:[%s10470_s12 + $0x530] sm:$0xff]  }
0x1f78   :  { %v8433_v1 = vld [vmem:[%s10470_s12 + $0x5b0] sm:$0xff]  }
0x2001   :  { %v4955_v48 = vpop.f32.mrf.mxu1  ;;  %v4998_v50 = vpop.f32.mrf.mxu0 }
0x2002   :  { %v4956_v5 = vadd.f32 %v4955_v48, %v4681_v2  ;;  %v4999_v6 = vadd.f32 %v4998_v50, %v4689_v51  ;;  %v8434_v48 = vld [vmem:[%s10470_s12 + $0x568] sm:$0xff]  }
0x2003   :  { %v4957_v52 = vpop.f32.mrf.mxu1  ;;  %v5000_v53 = vpop.f32.mrf.mxu0 }
0x2004   :  { %v4958_v62 = vadd.f32 %v4957_v52, %v4685_v63  ;;  %v5001_v27 = vadd.f32 %v5000_v53, %v4693_v34  ;;  %v5265_v54 = vmax.f32 %v4956_v5, 0.0  ;;  %v5267_v35 = vmax.f32 %v4999_v6, 0.0  ;;  %v8441_v6 = vld [vmem:[%s10470_s12 + $0x5a0] sm:$0xff]  }
0x2005   :  { %v4959_v56 = vpop.f32.mrf.mxu1  ;;  %v5002_v57 = vpop.f32.mrf.mxu0 }
0x2006   :  { %v4960_v4 = vadd.f32 %v4959_v56, %v4681_v2  ;;  %v5003_v24 = vadd.f32 %v5002_v57, %v4689_v51  ;;  %v5266_v11 = vmax.f32 %v4958_v62, 0.0  ;;  %v5268_v8 = vmax.f32 %v5001_v27, 0.0  ;;  %v8435_v51 = vld [vmem:[%s10470_s12 + $0x5e8] sm:$0xff]   ;;  %v8438_v62 = vld [vmem:[%s10470_s12 + $0x560] sm:$0xff]  }
0x2007   :  { %v4961_v7 = vpop.f32.mrf.mxu1  ;;  %v5004_v13 = vpop.f32.mrf.mxu0  ;;  %v8436_v56 = vld [vmem:[%s10470_s12 + $0x528] sm:$0xff]   ;;  %v8439_v27 = vld [vmem:[%s10470_s12 + $0x5e0] sm:$0xff]  }
0x2008   :  { %v4962_v33 = vadd.f32 %v4961_v7, %v4685_v63  ;;  %v5005_v14 = vadd.f32 %v5004_v13, %v4693_v34  ;;  %v5281_v16 = vmax.f32 %v4960_v4, 0.0  ;;  %v5283_v19 = vmax.f32 %v5003_v24, 0.0  ;;  %v8437_v57 = vld [vmem:[%s10470_s12 + $0x5a8] sm:$0xff]   ;;  %v8440_v24 = vld [vmem:[%s10470_s12 + $0x520] sm:$0xff]   ;;  %v8442_v7 = vld [vmem:[%s10470_s12 + $0x558] sm:$0xff]  }
0x2009   :  { %v10074_v20 = vpop.f32.mrf.mxu1  ;;  %v10076_v49 = vpop.f32.mrf.mxu0  ;;  %v8443_v13 = vld [vmem:[%s10470_s12 + $0x5d8] sm:$0xff]  }
0x200a   :  { %v5282_v18 = vmax.f32 %v4962_v33, 0.0  ;;  %v5284_v9 = vmax.f32 %v5005_v14, 0.0  ;;  %v5297_v43 = vpack.c.bf16 %v5281_v16, %v5265_v54  ;;  %v5299_v12 = vpack.c.bf16 %v5283_v19, %v5267_v35  ;;  %v8444_v14 = vld [vmem:[%s10470_s12 + $0x518] sm:$0xff]   ;;  %v8450_v54 = vld [vmem:[%s10470_s12 + $0x548] sm:$0xff]  }
0x200b   :  { %v5043_v55 = vpop.f32.mrf.mxu1  ;;  %v5086_v36 = vpop.f32.mrf.mxu0  ;;  %v8445_v19 = vld [vmem:[%s10470_s12 + $0x598] sm:$0xff]   ;;  %v8451_v35 = vld [vmem:[%s10470_s12 + $0x5c8] sm:$0xff]  }
0x200c   :  { %v5298_v40 = vpack.c.bf16 %v5282_v18, %v5266_v11  ;;  %v5300_v60 = vpack.c.bf16 %v5284_v9, %v5268_v8  ;;  %v5044_v15 = vadd.f32 %v5043_v55, %v4701_v22  ;;  %v5087_v10 = vadd.f32 %v5086_v36, %v4709_v23  ;;  %v8448_v8 = vld [vmem:[%s10470_s12 + $0x510] sm:$0xff]  }
0x200d   :  { %v10088_v32 = vpop.f32.mrf.mxu1  ;;  %v10090_v41 = vpop.f32.mrf.mxu0  ;;  %v8449_v9 = vld [vmem:[%s10470_s12 + $0x590] sm:$0xff]   ;;  %v4697_v55 = vrot.slane %v10064_v26, %v9306_v58  ;;  %v4705_v36 = vrot.slane %v10064_v26, %v9309_v59  ;;  %v8453_v26 = vld [vmem:[%s10470_s12 + $0x588] sm:$0xff]  }
0x200e   :  { %6378 = vmatprep.mubr.bf16.mxu1 %v5298_v40  ;;  %6419 = vmatprep.mubr.bf16.mxu0 %v5300_v60  ;;  %v5270_v50 = vmax.f32 %v5044_v15, 0.0  ;;  %v5272_v63 = vmax.f32 %v5087_v10, 0.0  ;;  %v10173_v40 = vld [vmem:[%s10473_s11 + $0x18] sm:$0xff] }
0x200f   :  { %v5047_v47 = vpop.f32.mrf.mxu1  ;;  %v5090_v28 = vpop.f32.mrf.mxu0  ;;  %6379 = vmatmul.mubr.bf16.vlgmr.msra.gmra.mxu1 %v5297_v43  ;;  %6420 = vmatmul.mubr.bf16.vlgmr.msra.gmra.mxu0 %v5299_v12  ;;  %v4717_v43 = vrot.slane %v10173_v40, %v9199_v29  ;;  %v4725_v15 = vrot.slane %v10173_v40, %v9202_v30  ;;  %v8455_v29 = vld [vmem:[%s10470_s12 + $0x5c0] sm:$0xff]  }
0x2010   :  { %v5048_v25 = vadd.f32 %v5047_v47, %v4701_v22  ;;  %v5091_v46 = vadd.f32 %v5090_v28, %v4709_v23  ;;  %7839 = vmatpush3.bf16.msra.mxu1 %v8428_v42  ;;  %7861 = vmatpush3.bf16.msra.mxu0 %v8429_v38  ;;  %v8446_v22 = vld [vmem:[%s10470_s12 + $0x550] sm:$0xff]   ;;  %v8452_v42 = vld [vmem:[%s10470_s12 + $0x508] sm:$0xff]   ;;  %v5046_v38 = vadd.f32 %v10088_v32, %v4697_v55  ;;  %v8457_v30 = vld [vmem:[%s10470_s12 + $0x580] sm:$0xff]  }
0x2011   :  { %7840 = vmatprep.subr.bf16.mxu1 %v8430_v3  ;;  %7862 = vmatprep.subr.bf16.mxu0 %v8431_v61  ;;  %v10122_v4 = vpop.f32.mrf.mxu1  ;;  %v10127_v5 = vpop.f32.mrf.mxu0  ;;  %v8447_v23 = vld [vmem:[%s10470_s12 + $0x5d0] sm:$0xff]   ;;  %v8454_v3 = vld [vmem:[%s10470_s12 + $0x540] sm:$0xff]   ;;  %v5089_v61 = vadd.f32 %v10090_v41, %v4705_v36  ;;  %v5042_v32 = vadd.f32 %v10074_v20, %v4697_v55  ;;  %v5085_v47 = vadd.f32 %v10076_v49, %v4705_v36  ;;  %v8458_v20 = vld [vmem:[%s10470_s12 + $0x678] sm:$0xff]  }
0x2012   :  { %v5286_v34 = vmax.f32 %v5048_v25, 0.0  ;;  %v5288_v2 = vmax.f32 %v5091_v46, 0.0  ;;  %v8456_v25 = vld [vmem:[%s10470_s12 + $0x500] sm:$0xff]   ;;  %v5285_v41 = vmax.f32 %v5046_v38, 0.0  ;;  %v8474_v55 = vld [vmem:[%s10470_s12 + $0x658] sm:$0xff]  }
0x2013   :  { %v5129_v33 = vpop.f32.mrf.mxu1  ;;  %v5172_v16 = vpop.f32.mrf.mxu0  ;;  %v8475_v36 = vld [vmem:[%s10470_s12 + $0x6d8] sm:$0xff]  }
0x2014   :  { %v5302_v52 = vpack.c.bf16 %v5286_v34, %v5270_v50  ;;  %v5304_v53 = vpack.c.bf16 %v5288_v2, %v5272_v63  ;;  %7841 = vmatpush3.bf16.msra.mxu1 %v8432_v21  ;;  %7863 = vmatpush3.bf16.msra.mxu0 %v8433_v1  ;;  %v5130_v46 = vadd.f32 %v5129_v33, %v4717_v43  ;;  %v5287_v21 = vmax.f32 %v5089_v61, 0.0  ;;  %v8459_v1 = vld [vmem:[%s10470_s12 + $0x6f8] sm:$0xff]   ;;  %v8466_v33 = vld [vmem:[%s10470_s12 + $0x668] sm:$0xff]   ;;  %v8480_v61 = vld [vmem:[%s10470_s12 + $0x610] sm:$0xff]  }
0x2015   :  { %7842 = vmatprep.subr.bf16.mxu1 %v8434_v48  ;;  %7864 = vmatprep.subr.bf16.mxu0 %v8435_v51  ;;  %v10150_v11 = vpop.f32.mrf.mxu1  ;;  %v10155_v18 = vpop.f32.mrf.mxu0  ;;  %v5173_v49 = vadd.f32 %v5172_v16, %v4725_v15  ;;  %v5269_v48 = vmax.f32 %v5042_v32, 0.0  ;;  %v5271_v63 = vmax.f32 %v5085_v47, 0.0  ;;  %v8460_v2 = vld [vmem:[%s10470_s12 + $0x638] sm:$0xff]   ;;  %v8468_v16 = vld [vmem:[%s10470_s12 + $0x628] sm:$0xff]   ;;  %v4713_v47 = vrot.slane %v10173_v40, %v9205_v31 }
0x2016   :  { %6460 = vmatprep.mubr.bf16.mxu1 %v5302_v52  ;;  %6501 = vmatprep.mubr.bf16.mxu0 %v5304_v53  ;;  %v5274_v52 = vmax.f32 %v5130_v46, 0.0  ;;  %v8461_v53 = vld [vmem:[%s10470_s12 + $0x6b8] sm:$0xff]   ;;  %v8482_v32 = vld [vmem:[%s10470_s12 + $0x648] sm:$0xff]  }
0x2017   :  { %v5133_v60 = vpop.f32.mrf.mxu1  ;;  %v5176_v12 = vpop.f32.mrf.mxu0  ;;  %v5301_v51 = vpack.c.bf16 %v5285_v41, %v5269_v48  ;;  %v8484_v41 = vld [vmem:[%s10470_s12 + $0x608] sm:$0xff]   ;;  %v5132_v46 = vadd.f32 %v10150_v11, %v4713_v47  ;;  %v5128_v11 = vadd.f32 %v10122_v4, %v4713_v47  ;;  %v8490_v4 = vld [vmem:[%s10470_s12 + $0x778] sm:$0xff]   ;;  %v8512_v47 = vld [vmem:[%s10470_s12 + $0x710] sm:$0xff]  }
0x2018   :  { %7843 = vmatpush3.bf16.msra.mxu1 %v8436_v56  ;;  %7865 = vmatpush3.bf16.msra.mxu0 %v8437_v57  ;;  %v5134_v10 = vadd.f32 %v5133_v60, %v4717_v43  ;;  %v5177_v28 = vadd.f32 %v5176_v12, %v4725_v15  ;;  %v5303_v56 = vpack.c.bf16 %v5287_v21, %v5271_v63  ;;  %v5276_v57 = vmax.f32 %v5173_v49, 0.0  ;;  %v8477_v43 = vld [vmem:[%s10470_s12 + $0x698] sm:$0xff]   ;;  %v8478_v12 = vld [vmem:[%s10470_s12 + $0x650] sm:$0xff]   ;;  %v8485_v31 = vld [vmem:[%s10470_s12 + $0x688] sm:$0xff]  }
0x2019   :  { %7844 = vmatprep.subr.bf16.mxu1 %v8438_v62  ;;  %7866 = vmatprep.subr.bf16.mxu0 %v8439_v27  ;;  %v8462_v62 = vld [vmem:[%s10470_s12 + $0x670] sm:$0xff]   ;;  %v4741_v49 = vrot.slane %v10173_v40, %v9227_v45  ;;  %v8488_v63 = vld [vmem:[%s10470_s12 + $0x600] sm:$0xff]  }
0x201a   :  { %v5290_v50 = vmax.f32 %v5134_v10, 0.0  ;;  %v5292_v34 = vmax.f32 %v5177_v28, 0.0  ;;  %v8483_v10 = vld [vmem:[%s10470_s12 + $0x6c8] sm:$0xff]   ;;  %v4721_v28 = vrot.slane %v10173_v40, %v9208_v17  ;;  %v8486_v17 = vld [vmem:[%s10470_s12 + $0x640] sm:$0xff]  }
0x201b   :  { %v8489_v45 = vld [vmem:[%s10470_s12 + $0x680] sm:$0xff]  }
0x201c   :  { %7845 = vmatpush3.bf16.msra.mxu1 %v8440_v24  ;;  %7867 = vmatpush3.bf16.msra.mxu0 %v8441_v6  ;;  %v5306_v27 = vpack.c.bf16 %v5290_v50, %v5274_v52  ;;  %v8463_v24 = vld [vmem:[%s10470_s12 + $0x6f0] sm:$0xff]   ;;  %v5308_v6 = vpack.c.bf16 %v5292_v34, %v5276_v57  ;;  %v5175_v21 = vadd.f32 %v10155_v18, %v4721_v28  ;;  %v5289_v18 = vmax.f32 %v5132_v46, 0.0 }
0x201d   :  { %7846 = vmatprep.subr.bf16.mxu1 %v8442_v7  ;;  %7868 = vmatprep.subr.bf16.mxu0 %v8443_v13  ;;  %v8464_v7 = vld [vmem:[%s10470_s12 + $0x630] sm:$0xff]   ;;  %v5171_v48 = vadd.f32 %v10127_v5, %v4721_v28  ;;  %v5273_v52 = vmax.f32 %v5128_v11, 0.0  ;;  %v4729_v46 = vrot.slane %v10173_v40, %v9306_v58  ;;  %v8518_v58 = vld [vmem:[%s10470_s12 + $0x740] sm:$0xff]  }
0x201e   :  { %v8465_v13 = vld [vmem:[%s10470_s12 + $0x6b0] sm:$0xff]  }
0x201f   :  { %v8513_v28 = vld [vmem:[%s10470_s12 + $0x790] sm:$0xff]  }
0x2020   :  { %7847 = vmatpush3.bf16.msra.mxu1 %v8444_v14  ;;  %7869 = vmatpush3.bf16.msra.mxu0 %v8445_v19  ;;  %v8467_v14 = vld [vmem:[%s10470_s12 + $0x6e8] sm:$0xff]  }
0x2021   :  { %7848 = vmatprep.subr.bf16.mxu1 %v8446_v22  ;;  %7870 = vmatprep.subr.bf16.mxu0 %v8447_v23  ;;  %v8469_v19 = vld [vmem:[%s10470_s12 + $0x6a8] sm:$0xff]   ;;  %v8470_v22 = vld [vmem:[%s10470_s12 + $0x660] sm:$0xff]  }
0x2022   :  { %v8471_v23 = vld [vmem:[%s10470_s12 + $0x6e0] sm:$0xff]  }
0x2024   :  { %7849 = vmatpush3.bf16.msra.mxu1 %v8448_v8  ;;  %7871 = vmatpush3.bf16.msra.mxu0 %v8449_v9  ;;  %v10243_v8 = vpop.f32.mrf.mxu1  ;;  %v8472_v9 = vld [vmem:[%s10470_s12 + $0x620] sm:$0xff]  }
0x2025   :  { %7850 = vmatprep.subr.bf16.mxu1 %v8450_v54  ;;  %7872 = vmatprep.subr.bf16.mxu0 %v8451_v35  ;;  %v10248_v54 = vpop.f32.mrf.mxu0  ;;  %v8473_v35 = vld [vmem:[%s10470_s12 + $0x6a0] sm:$0xff]  }
0x2026   :  { %v5215_v60 = vpop.f32.mrf.mxu1 }
0x2027   :  { %v5258_v38 = vpop.f32.mrf.mxu0 }
0x2028   :  { %7851 = vmatpush3.bf16.msra.mxu1 %v8452_v42  ;;  %7873 = vmatpush3.bf16.msra.mxu0 %v8453_v26  ;;  %v8476_v42 = vld [vmem:[%s10470_s12 + $0x618] sm:$0xff]   ;;  %v8479_v26 = vld [vmem:[%s10470_s12 + $0x6d0] sm:$0xff]   ;;  %v5259_v5 = vadd.f32 %v5258_v38, %v4741_v49  ;;  %v8504_v38 = vld [vmem:[%s10470_s12 + $0x720] sm:$0xff]  }
0x2029   :  { %7852 = vmatprep.subr.bf16.mxu1 %v8454_v3  ;;  %7874 = vmatprep.subr.bf16.mxu0 %v8455_v29  ;;  %v10271_v3 = vpop.f32.mrf.mxu1  ;;  %v10276_v15 = vpop.f32.mrf.mxu0  ;;  %v8481_v29 = vld [vmem:[%s10470_s12 + $0x690] sm:$0xff]  }
0x202c   :  { %7853 = vmatpush3.bf16.msra.mxu1 %v8456_v25  ;;  %7875 = vmatpush3.bf16.msra.mxu0 %v8457_v30  ;;  %v5219_v25 = vpop.f32.mrf.mxu1  ;;  %v4733_v30 = vrot.slane %v10173_v40, %v9224_v44  ;;  %v8487_v44 = vld [vmem:[%s10470_s12 + $0x6c0] sm:$0xff]  }
0x202d   :  { %7882 = vmatprep.subr.bf16.mxu1 %v8458_v20  ;;  %7904 = vmatprep.subr.bf16.mxu0 %v8459_v1  ;;  %v5262_v20 = vpop.f32.mrf.mxu0 }
0x202e   :  { %v5220_v1 = vadd.f32 %v5219_v25, %v4733_v30  ;;  %v5263_v50 = vadd.f32 %v5262_v20, %v4741_v49  ;;  %v5216_v34 = vadd.f32 %v5215_v60, %v4733_v30  ;;  %v8502_v60 = vld [vmem:[%s10470_s12 + $0x760] sm:$0xff]   ;;  %v8514_v25 = vld [vmem:[%s10470_s12 + $0x748] sm:$0xff]   ;;  %v4737_v30 = vrot.slane %v10173_v40, %v9309_v59 }
0x202f   :  { %6461 = vmatmul.mubr.bf16.vlgmr.msra.gmra.mxu1 %v5301_v51  ;;  %6502 = vmatmul.mubr.bf16.vlgmr.msra.gmra.mxu0 %v5303_v56  ;;  %v8491_v51 = vld [vmem:[%s10470_s12 + $0x7f8] sm:$0xff]   ;;  %v5275_v56 = vmax.f32 %v5171_v48, 0.0  ;;  %v8516_v20 = vld [vmem:[%s10470_s12 + $0x708] sm:$0xff]   ;;  %v8519_v59 = vld [vmem:[%s10470_s12 + $0x7c0] sm:$0xff]   ;;  %v5214_v40 = vadd.f32 %v10243_v8, %v4729_v46 }
0x2030   :  { %7883 = vmatpush3.bf16.msra.mxu1 %v8460_v2  ;;  %6542 = vmatprep.mubr.bf16.mxu1 %v5306_v27  ;;  %v5291_v2 = vmax.f32 %v5175_v21, 0.0  ;;  %v5296_v57 = vmax.f32 %v5263_v50, 0.0  ;;  %v5305_v27 = vpack.c.bf16 %v5289_v18, %v5273_v52  ;;  %v5261_v21 = vadd.f32 %v10276_v15, %v4737_v30  ;;  %v8520_v49 = vld [vmem:[%s10470_s12 + $0x700] sm:$0xff]  }
0x2031   :  { %7905 = vmatpush3.bf16.msra.mxu0 %v8461_v53  ;;  %6583 = vmatprep.mubr.bf16.mxu0 %v5308_v6  ;;  %v5294_v53 = vmax.f32 %v5220_v1, 0.0  ;;  %v8493_v6 = vld [vmem:[%s10470_s12 + $0x7b8] sm:$0xff]   ;;  %v8521_v15 = vld [vmem:[%s10470_s12 + $0x780] sm:$0xff]   ;;  %v5277_v1 = vmax.f32 %v5214_v40, 0.0 }
0x2032   :  { %7884 = vmatprep.subr.bf16.mxu1 %v8462_v62  ;;  %7906 = vmatprep.subr.bf16.mxu0 %v8463_v24  ;;  %v8492_v62 = vld [vmem:[%s10470_s12 + $0x738] sm:$0xff]   ;;  %v5278_v24 = vmax.f32 %v5216_v34, 0.0  ;;  %v5295_v11 = vmax.f32 %v5261_v21, 0.0 }
0x2034   :  { %7885 = vmatpush3.bf16.msra.mxu1 %v8464_v7  ;;  %v5307_v7 = vpack.c.bf16 %v5291_v2, %v5275_v56 }
0x2035   :  { %7907 = vmatpush3.bf16.msra.mxu0 %v8465_v13  ;;  %7886 = vmatprep.subr.bf16.mxu1 %v8466_v33  ;;  %v5280_v13 = vmax.f32 %v5259_v5, 0.0  ;;  %v8494_v33 = vld [vmem:[%s10470_s12 + $0x770] sm:$0xff]  }
0x2036   :  { %7908 = vmatprep.subr.bf16.mxu0 %v8467_v14  ;;  %v5310_v14 = vpack.c.bf16 %v5294_v53, %v5278_v24 }
0x2038   :  { %7887 = vmatpush3.bf16.msra.mxu1 %v8468_v16  ;;  %v8495_v16 = vld [vmem:[%s10470_s12 + $0x7f0] sm:$0xff]  }
0x2039   :  { %7909 = vmatpush3.bf16.msra.mxu0 %v8469_v19  ;;  %7888 = vmatprep.subr.bf16.mxu1 %v8470_v22  ;;  %v5312_v19 = vpack.c.bf16 %v5296_v57, %v5280_v13  ;;  %v8496_v22 = vld [vmem:[%s10470_s12 + $0x730] sm:$0xff]  }
0x203a   :  { %7910 = vmatprep.subr.bf16.mxu0 %v8471_v23  ;;  %v8497_v23 = vld [vmem:[%s10470_s12 + $0x7b0] sm:$0xff]  }
0x203c   :  { %7889 = vmatpush3.bf16.msra.mxu1 %v8472_v9  ;;  %v8498_v9 = vld [vmem:[%s10470_s12 + $0x768] sm:$0xff]  }
0x203d   :  { %7911 = vmatpush3.bf16.msra.mxu0 %v8473_v35  ;;  %7890 = vmatprep.subr.bf16.mxu1 %v8474_v55  ;;  %v8499_v35 = vld [vmem:[%s10470_s12 + $0x7e8] sm:$0xff]  }
0x203e   :  { %7912 = vmatprep.subr.bf16.mxu0 %v8475_v36  ;;  %v8500_v55 = vld [vmem:[%s10470_s12 + $0x728] sm:$0xff]  }
0x203f   :  { %v8501_v36 = vld [vmem:[%s10470_s12 + $0x7a8] sm:$0xff]  }
0x2040   :  { %7891 = vmatpush3.bf16.msra.mxu1 %v8476_v42  ;;  %v8503_v42 = vld [vmem:[%s10470_s12 + $0x7e0] sm:$0xff]  }
0x2041   :  { %7913 = vmatpush3.bf16.msra.mxu0 %v8477_v43  ;;  %7892 = vmatprep.subr.bf16.mxu1 %v8478_v12  ;;  %v8505_v43 = vld [vmem:[%s10470_s12 + $0x7a0] sm:$0xff]   ;;  %v8506_v12 = vld [vmem:[%s10470_s12 + $0x758] sm:$0xff]  }
0x2042   :  { %7914 = vmatprep.subr.bf16.mxu0 %v8479_v26  ;;  %v8507_v26 = vld [vmem:[%s10470_s12 + $0x7d8] sm:$0xff]  }
0x2044   :  { %7893 = vmatpush3.bf16.msra.mxu1 %v8480_v61  ;;  %v8508_v61 = vld [vmem:[%s10470_s12 + $0x718] sm:$0xff]  }
0x2045   :  { %7915 = vmatpush3.bf16.msra.mxu0 %v8481_v29  ;;  %7894 = vmatprep.subr.bf16.mxu1 %v8482_v32  ;;  %v8509_v29 = vld [vmem:[%s10470_s12 + $0x798] sm:$0xff]   ;;  %v8510_v32 = vld [vmem:[%s10470_s12 + $0x750] sm:$0xff]  }
0x2046   :  { %7916 = vmatprep.subr.bf16.mxu0 %v8483_v10  ;;  %v8511_v10 = vld [vmem:[%s10470_s12 + $0x7d0] sm:$0xff]  }
0x2048   :  { %7895 = vmatpush3.bf16.msra.mxu1 %v8484_v41  ;;  %v8515_v41 = vld [vmem:[%s10470_s12 + $0x7c8] sm:$0xff]  }
0x2049   :  { %7917 = vmatpush3.bf16.msra.mxu0 %v8485_v31  ;;  %7896 = vmatprep.subr.bf16.mxu1 %v8486_v17  ;;  %v5218_v31 = vadd.f32 %v10271_v3, %v4729_v46  ;;  %v8517_v17 = vld [vmem:[%s10470_s12 + $0x788] sm:$0xff]   ;;  %v5257_v3 = vadd.f32 %v10248_v54, %v4737_v30 }
0x204a   :  { %7918 = vmatprep.subr.bf16.mxu0 %v8487_v44 }
0x204b   :  { %v5293_v44 = vmax.f32 %v5218_v31, 0.0  ;;  %v5279_v48 = vmax.f32 %v5257_v3, 0.0 }
0x204c   :  { %7897 = vmatpush3.bf16.msra.mxu1 %v8488_v63 }
0x204d   :  { %7919 = vmatpush3.bf16.msra.mxu0 %v8489_v45  ;;  %7926 = vmatprep.subr.bf16.mxu1 %v8490_v4  ;;  %v5309_v8 = vpack.c.bf16 %v5293_v44, %v5277_v1  ;;  %v5311_v54 = vpack.c.bf16 %v5295_v11, %v5279_v48 }
0x204e   :  { %7948 = vmatprep.subr.bf16.mxu0 %v8491_v51 }
0x204f   :  { %6543 = vmatmul.mubr.bf16.vlgmr.msra.gmra.mxu1 %v5305_v27 }
0x2050   :  { %6584 = vmatmul.mubr.bf16.vlgmr.msra.gmra.mxu0 %v5307_v7  ;;  %7927 = vmatpush3.bf16.msra.mxu1 %v8492_v62 }
0x2051   :  { %6624 = vmatprep.mubr.bf16.mxu1 %v5310_v14  ;;  %7949 = vmatpush3.bf16.msra.mxu0 %v8493_v6  ;;  %v7391_v6 = vld [vmem:[%s10474_s13 + $0x1] ss:$0 sm:$0xff] }
0x2052   :  { %6665 = vmatprep.mubr.bf16.mxu0 %v5312_v19  ;;  %7928 = vmatprep.subr.bf16.mxu1 %v8494_v33 }
0x2053   :  { %7950 = vmatprep.subr.bf16.mxu0 %v8495_v16 }
0x2054   :  { %7929 = vmatpush3.bf16.msra.mxu1 %v8496_v22 }
0x2055   :  { %7951 = vmatpush3.bf16.msra.mxu0 %v8497_v23  ;;  %7930 = vmatprep.subr.bf16.mxu1 %v8498_v9 }
0x2056   :  { %7952 = vmatprep.subr.bf16.mxu0 %v8499_v35 }
0x2058   :  { %7931 = vmatpush3.bf16.msra.mxu1 %v8500_v55 }
0x2059   :  { %7953 = vmatpush3.bf16.msra.mxu0 %v8501_v36  ;;  %7932 = vmatprep.subr.bf16.mxu1 %v8502_v60 }
0x205a   :  { %7954 = vmatprep.subr.bf16.mxu0 %v8503_v42 }
0x205c   :  { %7933 = vmatpush3.bf16.msra.mxu1 %v8504_v38 }
0x205d   :  { %7955 = vmatpush3.bf16.msra.mxu0 %v8505_v43  ;;  %7934 = vmatprep.subr.bf16.mxu1 %v8506_v12 }
0x205e   :  { %7956 = vmatprep.subr.bf16.mxu0 %v8507_v26 }
0x2060   :  { %7935 = vmatpush3.bf16.msra.mxu1 %v8508_v61 }
0x2061   :  { %7957 = vmatpush3.bf16.msra.mxu0 %v8509_v29  ;;  %7936 = vmatprep.subr.bf16.mxu1 %v8510_v32 }
0x2062   :  { %7958 = vmatprep.subr.bf16.mxu0 %v8511_v10 }
0x2064   :  { %7937 = vmatpush3.bf16.msra.mxu1 %v8512_v47 }
0x2065   :  { %7959 = vmatpush3.bf16.msra.mxu0 %v8513_v28  ;;  %7938 = vmatprep.subr.bf16.mxu1 %v8514_v25 }
0x2066   :  { %7960 = vmatprep.subr.bf16.mxu0 %v8515_v41 }
0x2068   :  { %7939 = vmatpush3.bf16.msra.mxu1 %v8516_v20 }
0x2069   :  { %7961 = vmatpush3.bf16.msra.mxu0 %v8517_v17  ;;  %7940 = vmatprep.subr.bf16.mxu1 %v8518_v58 }
0x206a   :  { %7962 = vmatprep.subr.bf16.mxu0 %v8519_v59 }
0x206c   :  { %7941 = vmatpush3.bf16.msra.mxu1 %v8520_v49 }
0x206d   :  { %7963 = vmatpush3.bf16.msra.mxu0 %v8521_v15  ;;  %8237 = vmatprep.subr.mxu1 %v8602_v0 }
0x206f   :  { %6625 = vmatmul.mubr.bf16.vlgmr.msra.gmra.mxu1 %v5309_v8 }
0x2070   :  { %6666 = vmatmul.mubr.bf16.vlgmr.msra.gmra.mxu0 %v5311_v54  ;;  %8245 = vmatprep.mubr.msk.f32.mxu1 %vm8603_vm1, %v8602_v0 }
0x20cf   :  { %v7810_v50 = vpop.f32.mrf.mxu1  ;;  %v7832_v63 = vpop.f32.mrf.mxu0 }
0x20d1   :  { %v7811_v18 = vpop.f32.mrf.mxu1  ;;  %v7833_v34 = vpop.f32.mrf.mxu0 }
0x20d2   :  { %v7812_v24 = vadd.f32 %v7811_v18, %v7810_v50  ;;  %v7834_v22 = vadd.f32 %v7833_v34, %v7832_v63 }
0x20d3   :  { %v7813_v45 = vpop.f32.mrf.mxu1  ;;  %v7835_v4 = vpop.f32.mrf.mxu0 }
0x20d4   :  { %v6381_v33 = vadd.f32 %v7812_v24, %v7391_v6 }
0x20d5   :  { %v7814_v2 = vpop.f32.mrf.mxu1  ;;  %v7836_v51 = vpop.f32.mrf.mxu0 }
0x20d6   :  { %v7815_v14 = vadd.f32 %v7814_v2, %v7813_v45  ;;  %v6422_v9 = vadd.f32 %v7834_v22, %v6381_v33  ;;  %v7837_v60 = vadd.f32 %v7836_v51, %v7835_v4  ;;  %v6722_v33 = vld [vmem:[%s10477_s16] sm:$0xff] }
0x20d8   :  { %v6384_v35 = vadd.f32 %v7815_v14, %v7391_v6  ;;  %v23_v14 = vstv %s10478_s17 }
0x20d9   :  { %24 = vst [vmem:[#allocation2] sm:$0x1] %v23_v14 }
0x20da   :  { %v6425_v43 = vadd.f32 %v7837_v60, %v6384_v35 }
0x20ef   :  { %v7854_v5 = vpop.f32.mrf.mxu1  ;;  %v7876_v52 = vpop.f32.mrf.mxu0 }
0x20f1   :  { %v7855_v53 = vpop.f32.mrf.mxu1  ;;  %v7877_v56 = vpop.f32.mrf.mxu0 }
0x20f2   :  { %v7856_v23 = vadd.f32 %v7855_v53, %v7854_v5  ;;  %v7878_v12 = vadd.f32 %v7877_v56, %v7876_v52 }
0x20f3   :  { %v7857_v57 = vpop.f32.mrf.mxu1  ;;  %v7879_v62 = vpop.f32.mrf.mxu0 }
0x20f4   :  { %v6463_v42 = vadd.f32 %v7856_v23, %v6422_v9 }
0x20f5   :  { %v7858_v27 = vpop.f32.mrf.mxu1  ;;  %v7880_v13 = vpop.f32.mrf.mxu0 }
0x20f6   :  { %v7859_v38 = vadd.f32 %v7858_v27, %v7857_v57  ;;  %v6504_v32 = vadd.f32 %v7878_v12, %v6463_v42  ;;  %v7881_v47 = vadd.f32 %v7880_v13, %v7879_v62  ;;  %v6723_v13 = vld [vmem:[%s10477_s16 + $0x8] sm:$0xff] }
0x20f8   :  { %v6466_v10 = vadd.f32 %v7859_v38, %v6425_v43  ;;  %v7523_v38 = vld [vmem:[%s10476_s15 + $0x1] ss:$0 sm:$0xff] }
0x20fa   :  { %v6507_v30 = vadd.f32 %v7881_v47, %v6466_v10  ;;  %v7524_v47 = vld [vmem:[#allocation2] ss:$0 sm:$0xff] }
0x210f   :  { %v7898_v7 = vpop.f32.mrf.mxu1 }
0x2110   :  { %v7920_v16 = vpop.f32.mrf.mxu0 }
0x2111   :  { %v7899_v19 = vpop.f32.mrf.mxu1 }
0x2112   :  { %v7921_v55 = vpop.f32.mrf.mxu0  ;;  %v7900_v26 = vadd.f32 %v7899_v19, %v7898_v7  ;;  %v6724_v7 = vld [vmem:[%s10477_s16 + $0x10] sm:$0xff] }
0x2113   :  { %v7901_v36 = vpop.f32.mrf.mxu1  ;;  %v7922_v20 = vadd.f32 %v7921_v55, %v7920_v16 }
0x2114   :  { %v7923_v61 = vpop.f32.mrf.mxu0  ;;  %v6545_v28 = vadd.f32 %v7900_v26, %v6504_v32 }
0x2115   :  { %v7902_v29 = vpop.f32.mrf.mxu1 }
0x2116   :  { %v7903_v25 = vadd.f32 %v7902_v29, %v7901_v36  ;;  %v7924_v41 = vpop.f32.mrf.mxu0  ;;  %v6586_v58 = vadd.f32 %v7922_v20, %v6545_v28  ;;  %v7522_v36 = vld [vmem:[%s10475_s14 + $0x1] ss:$0 sm:$0xff] }
0x2117   :  { %v7925_v49 = vadd.f32 %v7924_v41, %v7923_v61 }
0x2118   :  { %v6548_v21 = vadd.f32 %v7903_v25, %v6507_v30 }
0x211a   :  { %v6589_v48 = vadd.f32 %v7925_v49, %v6548_v21 }
0x212f   :  { %v7942_v46 = vpop.f32.mrf.mxu1 }
0x2130   :  { %v7964_v31 = vpop.f32.mrf.mxu0 }
0x2131   :  { %v7943_v17 = vpop.f32.mrf.mxu1 }
0x2132   :  { %v7944_v59 = vadd.f32 %v7943_v17, %v7942_v46  ;;  %v7965_v40 = vpop.f32.mrf.mxu0 }
0x2133   :  { %v7945_v3 = vpop.f32.mrf.mxu1  ;;  %v7966_v15 = vadd.f32 %v7965_v40, %v7964_v31 }
0x2134   :  { %v6627_v44 = vadd.f32 %v7944_v59, %v6586_v58  ;;  %v7967_v11 = vpop.f32.mrf.mxu0 }
0x2135   :  { %v7946_v1 = vpop.f32.mrf.mxu1 }
0x2136   :  { %v6668_v8 = vadd.f32 %v7966_v15, %v6627_v44  ;;  %v7947_v54 = vadd.f32 %v7946_v1, %v7945_v3  ;;  %v7968_v50 = vpop.f32.mrf.mxu0 }
0x2137   :  { %v7969_v18 = vadd.f32 %v7968_v50, %v7967_v11 }
0x2138   :  { %v6630_v63 = vadd.f32 %v7947_v54, %v6589_v48  ;;  %v6674_v34 = vadd.f32 %v6668_v8, %v9881_v37 }
0x213a   :  { %v6671_v45 = vadd.f32 %v7969_v18, %v6630_v63  ;;  %v6680_v4 = vsel %vm150_vm3, %v6674_v34, 0.0 }
0x213b   :  { %6681 = vadd.xlane.f32.xlu1 %v6680_v4 }
0x213c   :  { %v6675_v2 = vadd.f32 %v6671_v45, %v9883_v39  ;;  %v6725_v39 = vld [vmem:[%s10477_s16 + $0x18] sm:$0xff] }
0x213d   :  { %8238 = vmatpush3.msra.mxu1 %v6725_v39 }
0x213e   :  { %v6683_v5 = vsel %vm150_vm3, %v6675_v2, 0.0  ;;  %8239 = vmatprep.subr.mxu1 %v8602_v0 }
0x213f   :  { %6684 = vadd.xlane.f32.xlu0 %v6683_v5  ;;  %8240 = vmatpush3.msra.mxu1 %v6724_v7 }
0x2140   :  { %8241 = vmatprep.subr.mxu1 %v8602_v0 }
0x2141   :  { %8242 = vmatpush3.msra.mxu1 %v6723_v13 }
0x2142   :  { %8243 = vmatprep.subr.mxu1 %v8602_v0 }
0x2143   :  { %8244 = vmatpush3.msra.mxu1 %v6722_v33 }
0x21c4   :  { %v6682_v51 = vpop.xlane.xlu1 %6681 }
0x21c5   :  { %v6686_v52 = vmul.f32 0.03125, %v6682_v51 }
0x21c7   :  { %v6688_v53 = vsub.f32 %v6674_v34, %v6686_v52 }
0x21c8   :  { %v6685_v56 = vpop.xlane.xlu0 %6684 }
0x21c9   :  { %v6687_v57 = vmul.f32 0.03125, %v6685_v56  ;;  %v6690_v62 = vmul.f32 %v6688_v53, %v6688_v53 }
0x21cb   :  { %v6689_v27 = vsub.f32 %v6675_v2, %v6687_v57  ;;  %v6692_v24 = vsel %vm150_vm3, %v6690_v62, 0.0 }
0x21cc   :  { %6693 = vadd.xlane.f32.xlu1 %v6692_v24 }
0x21cd   :  { %v6691_v37 = vmul.f32 %v6689_v27, %v6689_v27 }
0x21cf   :  { %v6695_v6 = vsel %vm150_vm3, %v6691_v37, 0.0 }
0x21d0   :  { %6696 = vadd.xlane.f32.xlu0 %v6695_v6 }
0x2255   :  { %v6694_v16 = vpop.xlane.xlu1 %6693 }
0x2256   :  { %v6698_v19 = vmul.f32 0.03125, %v6694_v16 }
0x2258   :  { %v6700_v22 = vadd.f32 1e-05, %v6698_v19 }
0x2259   :  { %v6697_v23 = vpop.xlane.xlu0 %6696 }
0x225a   :  { %8598 = vrsqrt.f32 %v6700_v22  ;;  %v6699_v9 = vmul.f32 0.03125, %v6697_v23 }
0x225c   :  { %v6701_v35 = vadd.f32 1e-05, %v6699_v9 }
0x225e   :  { %8600 = vrsqrt.f32 %v6701_v35 }
0x2267   :  { %v8599_v55 = vpop.eup %8598 }
0x2268   :  { %v6704_v0 = vmul.f32 %v8599_v55, %v6688_v53 }
0x226a   :  { %v6712_v60 = vmul.f32 %v7522_v36, %v6704_v0 }
0x226b   :  { %v8601_v42 = vpop.eup %8600 }
0x226c   :  { %v6705_v43 = vmul.f32 %v8601_v42, %v6689_v27  ;;  %v6720_v26 = vadd.f32 %v7523_v38, %v6712_v60 }
0x226e   :  { %v6713_v12 = vmul.f32 %v7522_v36, %v6705_v43  ;;  %v6735_v29 = vrot.slane %v6720_v26, 7 }
0x2270   :  { %v6721_v61 = vadd.f32 %v7523_v38, %v6713_v12 }
0x2272   :  { %v6736_v32 = vrot.slane %v6721_v61, 6 }
0x2274   :  { %v6738_v10 = vsel %vm6737_vm6, %v6736_v32, %v6735_v29 }
0x2275   :  { %8246 = vmatmul.mubr.msk.f32.vlgmr.msra.gmra.mxu1 %vm150_vm3, %v6738_v10 }
0x2335   :  { %v6807_v28 = vpop.f32.mrf.mxu1 }
0x2336   :  { %v6808_v25 = vadd.f32 %v7524_v47, %v6807_v28 }
0x2337   :  { %v8247_v41 = vpop.f32.mrf.mxu1 }
0x2338   :  { %6812 = vst.msk [vmem:[%s10479_s18] sm:$0x3] %vm6811_vm7, %v6808_v25 }

</bundles_post_ra>
